<compile_context>
chip_gen: v7x
topology: tpu7x:2x2x1
jax: 0.10.0
libtpu: 0.0.40
codegen_flags: <defaults>
</compile_context>

<pallas_src>
import functools

import jax
import jax.numpy as jnp
import numpy as np
from jax.experimental import pallas as pl
from jax.experimental.pallas import tpu as pltpu

EPS = 1e-5
CPAD = 128  # lane-padded width for per-channel vectors (stats / gamma / beta)


@functools.lru_cache(maxsize=None)
def _compiler_params():
    """Generation-dependent scoped-VMEM limit (~half of physical): 32 MiB on
    v7x (64 MiB physical), 64 MiB on v5e/v6e (128 MiB physical)."""
    try:
        phys = pltpu.get_tpu_info().vmem_capacity_bytes
    except Exception:
        phys = 128 * 1024 * 1024
    return pltpu.CompilerParams(
        dimension_semantics=("parallel",),
        vmem_limit_bytes=int(min(96 << 20, max(32 << 20, phys // 2))),
    )


def _pick_images_per_block(n, h):
    """Images per conv-stage block: flatten NT images to NT*H MXU rows
    (target ~256 rows) while keeping >=4 grid steps when the batch allows it."""
    best = 1
    for cand in range(1, n + 1):
        if n % cand:
            continue
        if cand * h > 256:
            break
        if n >= 8 and n // cand < 4:
            break
        best = cand
    return best


# ------------------------------ in-kernel helpers ----------------------------
def _bn_scale_shift_lanes(stats, gamma, beta, pt, inv_count):
    """Finalize train-mode BatchNorm from channel-padded (sum, sumsq) and
    broadcast scale/shift to the lane-dense [1, W*C] layout via a 0/1 matmul.

    stats: [2, CPAD]   gamma/beta: [1, CPAD]   pt: [CPAD, W*C]
    """
    mean = stats[0:1, :] * inv_count
    var = jnp.maximum(stats[1:2, :] * inv_count - mean * mean, 0.0)
    scale = gamma * jax.lax.rsqrt(var + EPS)        # EUP slot
    shift = beta - mean * scale
    scale_l = jnp.dot(scale, pt, preferred_element_type=jnp.float32)
    shift_l = jnp.dot(shift, pt, preferred_element_type=jnp.float32)
    return scale_l, shift_l


# --------------------------------- kernels -----------------------------------
def conv_stats_kernel(*refs, h, prenorm, inv_count):
    """3x3 conv over a flattened multi-image block + BN partial stats.

    Layout: x [M, W*Cin], y [M, W*Cout] with M = NT*H (NT whole images).
    The W taps and W zero-padding live inside the block-Toeplitz weights A;
    the H taps are aligned with pltpu.roll + per-image edge masks.
    """
    if prenorm:
        (x_ref, a_ref, p_ref, pt_ref, stats_in_ref, gamma_ref, beta_ref,
         y_ref, stats_ref) = refs
    else:
        x_ref, a_ref, p_ref, y_ref, stats_ref = refs

    m = x_ref.shape[0]

    xf = x_ref[...].astype(jnp.float32)
    if prenorm:
        # Previous stage's BatchNorm + ReLU fused into the load (no HBM pass).
        scale_l, shift_l = _bn_scale_shift_lanes(
            stats_in_ref[...], gamma_ref[...], beta_ref[...], pt_ref[...],
            inv_count)
        xf = jnp.maximum(xf * scale_l + shift_l, 0.0)
    x = xf.astype(a_ref.dtype)                      # bf16 MXU operands

    # Three sublane-aligned MXU pushes, K = W*Cin, f32 accumulation.
    t0 = jnp.dot(x, a_ref[0], preferred_element_type=jnp.float32)
    t1 = jnp.dot(x, a_ref[1], preferred_element_type=jnp.float32)
    t2 = jnp.dot(x, a_ref[2], preferred_element_type=jnp.float32)

    # Row alignment on the XLU; mask kills both the per-image H padding and
    # the wrap-around / cross-image rows introduced by the cyclic roll.
    hrow = jax.lax.broadcasted_iota(jnp.int32, (m, 1), 0) % h
    acc = t1
    acc = acc + jnp.where(hrow != 0, pltpu.roll(t0, 1, 0), 0.0)
    acc = acc + jnp.where(hrow != h - 1, pltpu.roll(t2, m - 1, 0), 0.0)
    # No conv-bias add: train-mode BatchNorm cancels per-channel constants.

    y_ref[...] = acc.astype(y_ref.dtype)

    # BN partial stats: sublane-reduce first (XLU), then ONE tiny matmul that
    # sums the W lane groups per channel into a lane-padded [2, CPAD] block.
    srow = jnp.sum(acc, axis=0, keepdims=True)
    ssrow = jnp.sum(acc * acc, axis=0, keepdims=True)
    stats_ref[0] = jnp.dot(jnp.concatenate([srow, ssrow], axis=0), p_ref[...],
                           preferred_element_type=jnp.float32)


def bn_relu_nchw_kernel(y_ref, stats_ref, gamma_ref, beta_ref, pt_ref, sel_ref,
                        o_ref, *, inv_count):
    """Final BatchNorm + ReLU fused with the NCHW re-layout (per image)."""
    scale_l, shift_l = _bn_scale_shift_lanes(
        stats_ref[...], gamma_ref[...], beta_ref[...], pt_ref[...], inv_count)
    yn = jnp.maximum(y_ref[...].astype(jnp.float32) * scale_l + shift_l, 0.0)
    cout = o_ref.shape[1]
    for c in range(cout):
        # [H, W*Cout] @ [W*Cout, W] 0/1 selection -> channel-c [H, W] slab.
        o_ref[0, c] = jnp.dot(yn, sel_ref[c],
                              preferred_element_type=jnp.float32
                              ).astype(o_ref.dtype)


# --------------------------- pallas_call wrappers -----------------------------
def conv_stage(x2d, a, p, n_img, h, nt, *, prenorm=None, inv_count=None):
    """One conv stage on the lane-dense [N*H, W*C] slab -> (y bf16, stats)."""
    m_total, lin = x2d.shape
    lout = a.shape[-1]
    cpad = p.shape[-1]
    nblk = n_img // nt
    mb = nt * h

    in_specs = [
        pl.BlockSpec((mb, lin), lambda i: (i, 0)),
        pl.BlockSpec(a.shape, lambda i: (0, 0, 0)),   # resident Toeplitz weights
        pl.BlockSpec(p.shape, lambda i: (0, 0)),      # resident group-sum matrix
    ]
    args = [x2d, a, p]
    if prenorm is not None:
        for arr in prenorm:                           # pt, stats_in, gamma, beta
            in_specs.append(pl.BlockSpec(arr.shape, lambda i: (0, 0)))
            args.append(arr)

    return pl.pallas_call(
        functools.partial(conv_stats_kernel, h=h,
                          prenorm=prenorm is not None, inv_count=inv_count),
        grid=(nblk,),
        in_specs=in_specs,
        out_specs=(pl.BlockSpec((mb, lout), lambda i: (i, 0)),
                   pl.BlockSpec((1, 2, cpad), lambda i: (i, 0, 0))),
        out_shape=(jax.ShapeDtypeStruct((m_total, lout), jnp.bfloat16),
                   jax.ShapeDtypeStruct((nblk, 2, cpad), jnp.float32)),
        compiler_params=_compiler_params(),
    )(*args)


def bn_relu_nchw_stage(y2d, stats_red, gamma, beta, pt, sel, n_img, h, w, cout,
                       inv_count, out_dtype):
    lout = y2d.shape[-1]
    return pl.pallas_call(
        functools.partial(bn_relu_nchw_kernel, inv_count=inv_count),
        grid=(n_img,),
        in_specs=[pl.BlockSpec((h, lout), lambda i: (i, 0)),
                  pl.BlockSpec(stats_red.shape, lambda i: (0, 0)),
                  pl.BlockSpec(gamma.shape, lambda i: (0, 0)),
                  pl.BlockSpec(beta.shape, lambda i: (0, 0)),
                  pl.BlockSpec(pt.shape, lambda i: (0, 0)),
                  pl.BlockSpec(sel.shape, lambda i: (0, 0, 0))],
        out_specs=pl.BlockSpec((1, cout, h, w), lambda i: (i, 0, 0, 0)),
        out_shape=jax.ShapeDtypeStruct((n_img, cout, h, w), out_dtype),
        compiler_params=_compiler_params(),
    )(y2d, stats_red, gamma, beta, pt, sel)


# --------------------------- plain-JAX glue ----------------------------------
def _toeplitz_conv_weights(w_oihw, width):
    """Fold the 3 W-taps and the W zero-padding of a 3x3 'same' conv into a
    block-Toeplitz matrix per H-tap: A[ky] in [W*Cin, W*Cout]."""
    cout, cin, kh, kw = w_oihw.shape
    wi = jnp.arange(width)[:, None]
    wo = jnp.arange(width)[None, :]
    a = jnp.zeros((kh, width, cin, width, cout), jnp.float32)
    for kx in range(kw):
        m = (wi == wo + kx - 1).astype(jnp.float32)                 # [Win, Wout]
        tap = jnp.transpose(w_oihw[:, :, :, kx], (2, 1, 0))         # [KH,Cin,Cout]
        a = a + m[None, :, None, :, None] * tap[:, None, :, None, :]
    return a.reshape(kh, width * cin, width * cout)


def _group_sum_matrix(width, cout):
    """P[w*Cout + c, c] = 1, lane-padded to CPAD columns (zeros beyond Cout)."""
    lane = jnp.arange(width * cout)[:, None]
    col = jnp.arange(CPAD)[None, :]
    return ((lane % cout) == col).astype(jnp.float32)


def _nchw_select_matrix(width, cout):
    """sel[c, w*Cout + c, w] = 1: right-multiplying a lane-dense [H, W*Cout]
    slab by sel[c] extracts channel c as an [H, W] NCHW slab."""
    lane = jnp.arange(width * cout)[None, :, None]
    wv = jnp.arange(width)[None, None, :]
    cv = jnp.arange(cout)[:, None, None]
    return (lane == wv * cout + cv).astype(jnp.float32)


def _pad_channels(v):
    return jnp.zeros((1, CPAD), jnp.float32).at[0, : v.shape[0]].set(
        v.astype(jnp.float32))


@jax.jit
def double_conv(x_nchw, w1, b1, g1, be1, w2, b2, g2, be2):
    # b1/b2 are accepted for API parity with nn.Conv2d but intentionally
    # unused: train-mode BatchNorm cancels a per-channel constant exactly.
    del b1, b2
    n, cin, h, w = x_nchw.shape
    cout1, cout2 = w1.shape[0], w2.shape[0]
    assert cout1 <= CPAD and cout2 <= CPAD
    inv_count = 1.0 / float(n * h * w)
    nt = _pick_images_per_block(n, h)

    # Lane-dense 2-D activation slab: [N*H, W*C], channel fastest on lanes.
    x2d = jnp.transpose(x_nchw, (0, 2, 3, 1)).reshape(n * h, w * cin)

    a1 = _toeplitz_conv_weights(w1, w).astype(jnp.bfloat16)
    a2 = _toeplitz_conv_weights(w2, w).astype(jnp.bfloat16)
    p1 = _group_sum_matrix(w, cout1)          # [W*Cout1, CPAD]
    p2 = _group_sum_matrix(w, cout2)
    pt1, pt2 = p1.T, p2.T                     # [CPAD, W*Cout]
    sel2 = _nchw_select_matrix(w, cout2)      # [Cout2, W*Cout2, W]
    g1p, be1p = _pad_channels(g1), _pad_channels(be1)
    g2p, be2p = _pad_channels(g2), _pad_channels(be2)

    # Stage 1: conv1 + per-block BN1 partial stats (f32).
    y1, st1 = conv_stage(x2d, a1, p1, n, h, nt)
    st1r = jnp.sum(st1, axis=0)               # global (sum, sumsq) [2, CPAD]

    # Stage 2: BN1 + ReLU fused into the load, conv2, BN2 partial stats.
    y2, st2 = conv_stage(y1, a2, p2, n, h, nt,
                         prenorm=(pt1, st1r, g1p, be1p), inv_count=inv_count)
    st2r = jnp.sum(st2, axis=0)

    # Final: BN2 + ReLU + NCHW re-layout in a single pass over y2.
    return bn_relu_nchw_stage(y2, st2r, g2p, be2p, pt2, sel2, n, h, w, cout2,
                              inv_count, x_nchw.dtype)


# ---------------- pure-JAX reference (faithful PyTorch semantics) ------------
def _ref_stage(x_nhwc, w_oihw, b, gamma, beta):
    y = jax.lax.conv_general_dilated(
        x_nhwc, jnp.transpose(w_oihw, (2, 3, 1, 0)),
        window_strides=(1, 1), padding="SAME",
        dimension_numbers=("NHWC", "HWIO", "NHWC"))
    y = y + b
    mean = jnp.mean(y, axis=(0, 1, 2), keepdims=True)
    var = jnp.mean((y - mean) ** 2, axis=(0, 1, 2), keepdims=True)
    y = (y - mean) * jax.lax.rsqrt(var + EPS)
    y = y * gamma + beta
    return jnp.maximum(y, 0.0)


def double_conv_ref(x_nchw, w1, b1, g1, be1, w2, b2, g2, be2):
    x = jnp.transpose(x_nchw, (0, 2, 3, 1))
    x = _ref_stage(x, w1, b1, g1, be1)
    x = _ref_stage(x, w2, b2, g2, be2)
    return jnp.transpose(x, (0, 3, 1, 2))


# ---------------- deterministic parameter init (PyTorch-like) ----------------
def init_conv(key, cin, cout, k=3):
    kw, kb = jax.random.split(key)
    bound = 1.0 / np.sqrt(cin * k * k)
    w = jax.random.uniform(kw, (cout, cin, k, k), jnp.float32, -bound, bound)
    b = jax.random.uniform(kb, (cout,), jnp.float32, -bound, bound)
    return w, b


if __name__ == "__main__":
    key = jax.random.PRNGKey(0)
    k_x, k_c1, k_c2, k_g1, k_b1, k_g2, k_b2 = jax.random.split(key, 7)

    N, Cin, Cout, H, W = 2, 4, 8, 16, 16
    x = jax.random.normal(k_x, (N, Cin, H, W), jnp.float32)

    w1, b1 = init_conv(k_c1, Cin, Cout)
    g1 = jax.random.uniform(k_g1, (Cout,), jnp.float32, 0.5, 1.5)
    be1 = jax.random.uniform(k_b1, (Cout,), jnp.float32, -0.5, 0.5)
    w2, b2 = init_conv(k_c2, Cout, Cout)
    g2 = jax.random.uniform(k_g2, (Cout,), jnp.float32, 0.5, 1.5)
    be2 = jax.random.uniform(k_b2, (Cout,), jnp.float32, -0.5, 0.5)

    out = jax.block_until_ready(
        double_conv(x, w1, b1, g1, be1, w2, b2, g2, be2))
    ref = jax.block_until_ready(
        double_conv_ref(x, w1, b1, g1, be1, w2, b2, g2, be2))

    assert out.shape == (N, Cout, H, W), out.shape
    # Tolerance reflects bf16 MXU operands (x / y1 / conv weights rounded to
    # bf16, f32 accumulation); genuine kernel bugs would give O(1) errors.
    np.testing.assert_allclose(np.asarray(out), np.asarray(ref),
                               rtol=5e-2, atol=7e-2)
    print("KERNEL_OK")
</pallas_src>

<mosaic_0001>
module attributes {stable_mosaic.version = 11 : i64} {
  func.func @conv_stats_kernel(%arg0: i32, %arg1: memref<32x64xf32, #tpu.memory_space<vmem>>, %arg2: memref<3x64x128xbf16, #tpu.memory_space<vmem>>, %arg3: memref<128x128xf32, #tpu.memory_space<vmem>>, %arg4: memref<32x128xbf16, #tpu.memory_space<vmem>>, %arg5: memref<1x2x128xf32, #tpu.memory_space<vmem>>) attributes {dimension_semantics = [#tpu.dimension_semantics<parallel>], iteration_bounds = array<i64: 1>, scalar_prefetch = 0 : i64, scratch_operands = 0 : i64, tpu.core_type = #tpu.core_type<tc>, window_params = [{transform_indices = @transform_0, window_bounds = array<i64: 32, 64>}, {pipeline_mode = #tpu.pipeline_mode<synchronous>, transform_indices = @transform_1, window_bounds = array<i64: 3, 64, 128>}, {pipeline_mode = #tpu.pipeline_mode<synchronous>, transform_indices = @transform_2, window_bounds = array<i64: 128, 128>}, {transform_indices = @transform_3, window_bounds = array<i64: 32, 128>}, {transform_indices = @transform_4, window_bounds = array<i64: 1, 2, 128>}]} {
    %c0 = arith.constant 0 : index
    %c0_0 = arith.constant 0 : index
    %0 = vector.load %arg1[%c0, %c0_0] : memref<32x64xf32, #tpu.memory_space<vmem>>, vector<32x64xf32>
    %1 = arith.truncf %0 : vector<32x64xf32> to vector<32x64xbf16>
    %c0_1 = arith.constant 0 : index
    %c0_2 = arith.constant 0 : index
    %c0_3 = arith.constant 0 : index
    %2 = vector.load %arg2[%c0_1, %c0_2, %c0_3] : memref<3x64x128xbf16, #tpu.memory_space<vmem>>, vector<1x64x128xbf16>
    %3 = vector.shape_cast %2 : vector<1x64x128xbf16> to vector<64x128xbf16>
    %cst = arith.constant dense<0.000000e+00> : vector<32x128xf32>
    %4 = tpu.matmul %1, %3, %cst {dimension_numbers = #tpu.dot_dimension_numbers<[1], [0], [0], [1], [0, 0, 1, 1], [], []>} : vector<32x64xbf16>, vector<64x128xbf16>, vector<32x128xf32> -> vector<32x128xf32>
    %c1 = arith.constant 1 : index
    %c0_4 = arith.constant 0 : index
    %c0_5 = arith.constant 0 : index
    %5 = vector.load %arg2[%c1, %c0_4, %c0_5] : memref<3x64x128xbf16, #tpu.memory_space<vmem>>, vector<1x64x128xbf16>
    %6 = vector.shape_cast %5 : vector<1x64x128xbf16> to vector<64x128xbf16>
    %cst_6 = arith.constant dense<0.000000e+00> : vector<32x128xf32>
    %7 = tpu.matmul %1, %6, %cst_6 {dimension_numbers = #tpu.dot_dimension_numbers<[1], [0], [0], [1], [0, 0, 1, 1], [], []>} : vector<32x64xbf16>, vector<64x128xbf16>, vector<32x128xf32> -> vector<32x128xf32>
    %c2 = arith.constant 2 : index
    %c0_7 = arith.constant 0 : index
    %c0_8 = arith.constant 0 : index
    %8 = vector.load %arg2[%c2, %c0_7, %c0_8] : memref<3x64x128xbf16, #tpu.memory_space<vmem>>, vector<1x64x128xbf16>
    %9 = vector.shape_cast %8 : vector<1x64x128xbf16> to vector<64x128xbf16>
    %cst_9 = arith.constant dense<0.000000e+00> : vector<32x128xf32>
    %10 = tpu.matmul %1, %9, %cst_9 {dimension_numbers = #tpu.dot_dimension_numbers<[1], [0], [0], [1], [0, 0, 1, 1], [], []>} : vector<32x64xbf16>, vector<64x128xbf16>, vector<32x128xf32> -> vector<32x128xf32>
    %11 = tpu.iota {dimensions = array<i32: 0>} : vector<32x1xi32>
    %c16_i32 = arith.constant 16 : i32
    %c0_i32 = arith.constant 0 : i32
    %12 = arith.cmpi eq, %c16_i32, %c0_i32 : i32
    %c1_i32 = arith.constant 1 : i32
    %13 = arith.select %12, %c1_i32, %c16_i32 : i32
    %14 = vector.broadcast %13 : i32 to vector<32x1xi32>
    %15 = arith.remsi %11, %14 : vector<32x1xi32>
    %c0_i32_10 = arith.constant 0 : i32
    %16 = vector.broadcast %c0_i32_10 : i32 to vector<32x1xi32>
    %17 = arith.cmpi ne, %15, %16 : vector<32x1xi32>
    %c0_i32_11 = arith.constant 0 : i32
    %18 = vector.broadcast %c0_i32_11 : i32 to vector<32x1xi32>
    %19 = arith.cmpi slt, %15, %18 : vector<32x1xi32>
    %c0_i32_12 = arith.constant 0 : i32
    %20 = arith.cmpi slt, %13, %c0_i32_12 : i32
    %21 = vector.broadcast %20 : i1 to vector<32x1xi1>
    %22 = vector.broadcast %21 : vector<32x1xi1> to vector<32x1xi1>
    %23 = arith.xori %19, %22 : vector<32x1xi1>
    %24 = arith.andi %23, %17 : vector<32x1xi1>
    %25 = vector.broadcast %13 : i32 to vector<32x1xi32>
    %26 = arith.addi %15, %25 : vector<32x1xi32>
    %27 = arith.select %24, %26, %15 : vector<32x1xi1>, vector<32x1xi32>
    %c0_i32_13 = arith.constant 0 : i32
    %28 = vector.broadcast %c0_i32_13 : i32 to vector<32x1xi32>
    %29 = arith.cmpi ne, %27, %28 : vector<32x1xi32>
    %c1_i32_14 = arith.constant 1 : i32
    %30 = tpu.dynamic_rotate %4 by %c1_i32_14 dim 0 : vector<32x128xf32>, i32 -> vector<32x128xf32>
    %cst_15 = arith.constant 0.000000e+00 : f32
    %31 = vector.shape_cast %29 : vector<32x1xi1> to vector<32x1xi1>
    %32 = vector.broadcast %31 : vector<32x1xi1> to vector<32x128xi1>
    %33 = vector.broadcast %cst_15 : f32 to vector<32x128xf32>
    %34 = arith.select %32, %30, %33 : vector<32x128xi1>, vector<32x128xf32>
    %35 = arith.addf %7, %34 : vector<32x128xf32>
    %c15_i32 = arith.constant 15 : i32
    %36 = vector.broadcast %c15_i32 : i32 to vector<32x1xi32>
    %37 = arith.cmpi ne, %27, %36 : vector<32x1xi32>
    %c31_i32 = arith.constant 31 : i32
    %38 = tpu.dynamic_rotate %10 by %c31_i32 dim 0 : vector<32x128xf32>, i32 -> vector<32x128xf32>
    %cst_16 = arith.constant 0.000000e+00 : f32
    %39 = vector.shape_cast %37 : vector<32x1xi1> to vector<32x1xi1>
    %40 = vector.broadcast %39 : vector<32x1xi1> to vector<32x128xi1>
    %41 = vector.broadcast %cst_16 : f32 to vector<32x128xf32>
    %42 = arith.select %40, %38, %41 : vector<32x128xi1>, vector<32x128xf32>
    %43 = arith.addf %35, %42 : vector<32x128xf32>
    %44 = arith.truncf %43 : vector<32x128xf32> to vector<32x128xbf16>
    %c0_17 = arith.constant 0 : index
    %c0_18 = arith.constant 0 : index
    %45 = vector.load %arg4[%c0_17, %c0_18] : memref<32x128xbf16, #tpu.memory_space<vmem>>, vector<32x128xbf16>
    tpu.vector_store %arg4[%c0_17, %c0_18], %44 {strides = array<i32>} : memref<32x128xbf16, #tpu.memory_space<vmem>>, vector<32x128xbf16>,
    %cst_19 = arith.constant dense<0.000000e+00> : vector<128xf32>
    %46 = vector.multi_reduction <add>, %43, %cst_19 [0] : vector<32x128xf32> to vector<128xf32>
    %47 = vector.shape_cast %46 : vector<128xf32> to vector<1x128xf32>
    %48 = arith.mulf %43, %43 : vector<32x128xf32>
    %cst_20 = arith.constant dense<0.000000e+00> : vector<128xf32>
    %49 = vector.multi_reduction <add>, %48, %cst_20 [0] : vector<32x128xf32> to vector<128xf32>
    %50 = vector.shape_cast %49 : vector<128xf32> to vector<1x128xf32>
    %51 = tpu.concatenate %47, %50 in 0 : vector<1x128xf32>, vector<1x128xf32> -> vector<2x128xf32>
    %c0_21 = arith.constant 0 : index
    %c0_22 = arith.constant 0 : index
    %52 = vector.load %arg3[%c0_21, %c0_22] : memref<128x128xf32, #tpu.memory_space<vmem>>, vector<128x128xf32>
    %cst_23 = arith.constant dense<0.000000e+00> : vector<2x128xf32>
    %53 = tpu.matmul %51, %52, %cst_23 {dimension_numbers = #tpu.dot_dimension_numbers<[1], [0], [0], [1], [0, 0, 1, 1], [], []>} : vector<2x128xf32>, vector<128x128xf32>, vector<2x128xf32> -> vector<2x128xf32>
    %c0_24 = arith.constant 0 : index
    %c0_25 = arith.constant 0 : index
    %c0_26 = arith.constant 0 : index
    %54 = vector.load %arg5[%c0_24, %c0_25, %c0_26] : memref<1x2x128xf32, #tpu.memory_space<vmem>>, vector<1x2x128xf32>
    %55 = vector.shape_cast %54 : vector<1x2x128xf32> to vector<2x128xf32>
    %56 = vector.shape_cast %53 : vector<2x128xf32> to vector<1x2x128xf32>
    tpu.vector_store %arg5[%c0_24, %c0_25, %c0_26], %56 {strides = array<i32>} : memref<1x2x128xf32, #tpu.memory_space<vmem>>, vector<1x2x128xf32>,
    return
  }
  func.func @transform_0(%arg0: i32) -> (i32, i32) {
    %c0_i32 = arith.constant 0 : i32
    %c0_i32_0 = arith.constant 0 : i32
    return %arg0, %c0_i32 : i32, i32
  }
  func.func @transform_1(%arg0: i32) -> (i32, i32, i32) {
    %c0_i32 = arith.constant 0 : i32
    %c0_i32_0 = arith.constant 0 : i32
    %c0_i32_1 = arith.constant 0 : i32
    %c0_i32_2 = arith.constant 0 : i32
    return %c0_i32, %c0_i32_0, %c0_i32_1 : i32, i32, i32
  }
  func.func @transform_2(%arg0: i32) -> (i32, i32) {
    %c0_i32 = arith.constant 0 : i32
    %c0_i32_0 = arith.constant 0 : i32
    %c0_i32_1 = arith.constant 0 : i32
    return %c0_i32, %c0_i32_0 : i32, i32
  }
  func.func @transform_3(%arg0: i32) -> (i32, i32) {
    %c0_i32 = arith.constant 0 : i32
    %c0_i32_0 = arith.constant 0 : i32
    return %arg0, %c0_i32 : i32, i32
  }
  func.func @transform_4(%arg0: i32) -> (i32, i32, i32) {
    %c0_i32 = arith.constant 0 : i32
    %c0_i32_0 = arith.constant 0 : i32
    %c0_i32_1 = arith.constant 0 : i32
    return %arg0, %c0_i32, %c0_i32_0 : i32, i32, i32
  }
}

module attributes {stable_mosaic.version = 11 : i64} {
  func.func @conv_stats_kernel(%arg0: i32, %arg1: memref<32x128xbf16, #tpu.memory_space<vmem>>, %arg2: memref<3x128x128xbf16, #tpu.memory_space<vmem>>, %arg3: memref<128x128xf32, #tpu.memory_space<vmem>>, %arg4: memref<128x128xf32, #tpu.memory_space<vmem>>, %arg5: memref<2x128xf32, #tpu.memory_space<vmem>>, %arg6: memref<1x128xf32, #tpu.memory_space<vmem>>, %arg7: memref<1x128xf32, #tpu.memory_space<vmem>>, %arg8: memref<32x128xbf16, #tpu.memory_space<vmem>>, %arg9: memref<1x2x128xf32, #tpu.memory_space<vmem>>) attributes {dimension_semantics = [#tpu.dimension_semantics<parallel>], iteration_bounds = array<i64: 1>, scalar_prefetch = 0 : i64, scratch_operands = 0 : i64, tpu.core_type = #tpu.core_type<tc>, window_params = [{transform_indices = @transform_0, window_bounds = array<i64: 32, 128>}, {pipeline_mode = #tpu.pipeline_mode<synchronous>, transform_indices = @transform_1, window_bounds = array<i64: 3, 128, 128>}, {pipeline_mode = #tpu.pipeline_mode<synchronous>, transform_indices = @transform_2, window_bounds = array<i64: 128, 128>}, {pipeline_mode = #tpu.pipeline_mode<synchronous>, transform_indices = @transform_3, window_bounds = array<i64: 128, 128>}, {pipeline_mode = #tpu.pipeline_mode<synchronous>, transform_indices = @transform_4, window_bounds = array<i64: 2, 128>}, {pipeline_mode = #tpu.pipeline_mode<synchronous>, transform_indices = @transform_5, window_bounds = array<i64: 1, 128>}, {pipeline_mode = #tpu.pipeline_mode<synchronous>, transform_indices = @transform_6, window_bounds = array<i64: 1, 128>}, {transform_indices = @transform_7, window_bounds = array<i64: 32, 128>}, {transform_indices = @transform_8, window_bounds = array<i64: 1, 2, 128>}]} {
    %c0 = arith.constant 0 : index
    %c0_0 = arith.constant 0 : index
    %0 = vector.load %arg1[%c0, %c0_0] : memref<32x128xbf16, #tpu.memory_space<vmem>>, vector<32x128xbf16>
    %1 = arith.extf %0 : vector<32x128xbf16> to vector<32x128xf32>
    %c0_1 = arith.constant 0 : index
    %c0_2 = arith.constant 0 : index
    %2 = vector.load %arg5[%c0_1, %c0_2] : memref<2x128xf32, #tpu.memory_space<vmem>>, vector<2x128xf32>
    %c0_3 = arith.constant 0 : index
    %c0_4 = arith.constant 0 : index
    %3 = vector.load %arg6[%c0_3, %c0_4] : memref<1x128xf32, #tpu.memory_space<vmem>>, vector<1x128xf32>
    %c0_5 = arith.constant 0 : index
    %c0_6 = arith.constant 0 : index
    %4 = vector.load %arg7[%c0_5, %c0_6] : memref<1x128xf32, #tpu.memory_space<vmem>>, vector<1x128xf32>
    %c0_7 = arith.constant 0 : index
    %c0_8 = arith.constant 0 : index
    %5 = vector.load %arg4[%c0_7, %c0_8] : memref<128x128xf32, #tpu.memory_space<vmem>>, vector<128x128xf32>
    %6 = vector.extract_strided_slice %2 {offsets = [0, 0], sizes = [1, 128], strides = [1, 1]} : vector<2x128xf32> to vector<1x128xf32>
    %cst = arith.constant 0.001953125 : f32
    %7 = vector.broadcast %cst : f32 to vector<1x128xf32>
    %8 = arith.mulf %6, %7 : vector<1x128xf32>
    %9 = vector.extract_strided_slice %2 {offsets = [1, 0], sizes = [1, 128], strides = [1, 1]} : vector<2x128xf32> to vector<1x128xf32>
    %cst_9 = arith.constant 0.001953125 : f32
    %10 = vector.broadcast %cst_9 : f32 to vector<1x128xf32>
    %11 = arith.mulf %9, %10 : vector<1x128xf32>
    %12 = arith.mulf %8, %8 : vector<1x128xf32>
    %13 = arith.subf %11, %12 : vector<1x128xf32>
    %cst_10 = arith.constant 0.000000e+00 : f32
    %14 = vector.broadcast %cst_10 : f32 to vector<1x128xf32>
    %15 = arith.maximumf %13, %14 : vector<1x128xf32>
    %cst_11 = arith.constant 9.99999974E-6 : f32
    %16 = vector.broadcast %cst_11 : f32 to vector<1x128xf32>
    %17 = arith.addf %15, %16 : vector<1x128xf32>
    %18 = math.rsqrt %17 : vector<1x128xf32>
    %19 = arith.mulf %3, %18 : vector<1x128xf32>
    %20 = arith.mulf %8, %19 : vector<1x128xf32>
    %21 = arith.subf %4, %20 : vector<1x128xf32>
    %cst_12 = arith.constant dense<0.000000e+00> : vector<1x128xf32>
    %22 = tpu.matmul %19, %5, %cst_12 {dimension_numbers = #tpu.dot_dimension_numbers<[1], [0], [0], [1], [0, 0, 1, 1], [], []>} : vector<1x128xf32>, vector<128x128xf32>, vector<1x128xf32> -> vector<1x128xf32>
    %cst_13 = arith.constant dense<0.000000e+00> : vector<1x128xf32>
    %23 = tpu.matmul %21, %5, %cst_13 {dimension_numbers = #tpu.dot_dimension_numbers<[1], [0], [0], [1], [0, 0, 1, 1], [], []>} : vector<1x128xf32>, vector<128x128xf32>, vector<1x128xf32> -> vector<1x128xf32>
    %24 = vector.broadcast %22 : vector<1x128xf32> to vector<32x128xf32>
    %25 = arith.mulf %1, %24 : vector<32x128xf32>
    %26 = vector.broadcast %23 : vector<1x128xf32> to vector<32x128xf32>
    %27 = arith.addf %25, %26 : vector<32x128xf32>
    %cst_14 = arith.constant 0.000000e+00 : f32
    %28 = vector.broadcast %cst_14 : f32 to vector<32x128xf32>
    %29 = arith.maximumf %27, %28 : vector<32x128xf32>
    %30 = arith.truncf %29 : vector<32x128xf32> to vector<32x128xbf16>
    %c0_15 = arith.constant 0 : index
    %c0_16 = arith.constant 0 : index
    %c0_17 = arith.constant 0 : index
    %31 = vector.load %arg2[%c0_15, %c0_16, %c0_17] : memref<3x128x128xbf16, #tpu.memory_space<vmem>>, vector<1x128x128xbf16>
    %32 = vector.shape_cast %31 : vector<1x128x128xbf16> to vector<128x128xbf16>
    %cst_18 = arith.constant dense<0.000000e+00> : vector<32x128xf32>
    %33 = tpu.matmul %30, %32, %cst_18 {dimension_numbers = #tpu.dot_dimension_numbers<[1], [0], [0], [1], [0, 0, 1, 1], [], []>} : vector<32x128xbf16>, vector<128x128xbf16>, vector<32x128xf32> -> vector<32x128xf32>
    %c1 = arith.constant 1 : index
    %c0_19 = arith.constant 0 : index
    %c0_20 = arith.constant 0 : index
    %34 = vector.load %arg2[%c1, %c0_19, %c0_20] : memref<3x128x128xbf16, #tpu.memory_space<vmem>>, vector<1x128x128xbf16>
    %35 = vector.shape_cast %34 : vector<1x128x128xbf16> to vector<128x128xbf16>
    %cst_21 = arith.constant dense<0.000000e+00> : vector<32x128xf32>
    %36 = tpu.matmul %30, %35, %cst_21 {dimension_numbers = #tpu.dot_dimension_numbers<[1], [0], [0], [1], [0, 0, 1, 1], [], []>} : vector<32x128xbf16>, vector<128x128xbf16>, vector<32x128xf32> -> vector<32x128xf32>
    %c2 = arith.constant 2 : index
    %c0_22 = arith.constant 0 : index
    %c0_23 = arith.constant 0 : index
    %37 = vector.load %arg2[%c2, %c0_22, %c0_23] : memref<3x128x128xbf16, #tpu.memory_space<vmem>>, vector<1x128x128xbf16>
    %38 = vector.shape_cast %37 : vector<1x128x128xbf16> to vector<128x128xbf16>
    %cst_24 = arith.constant dense<0.000000e+00> : vector<32x128xf32>
    %39 = tpu.matmul %30, %38, %cst_24 {dimension_numbers = #tpu.dot_dimension_numbers<[1], [0], [0], [1], [0, 0, 1, 1], [], []>} : vector<32x128xbf16>, vector<128x128xbf16>, vector<32x128xf32> -> vector<32x128xf32>
    %40 = tpu.iota {dimensions = array<i32: 0>} : vector<32x1xi32>
    %c16_i32 = arith.constant 16 : i32
    %c0_i32 = arith.constant 0 : i32
    %41 = arith.cmpi eq, %c16_i32, %c0_i32 : i32
    %c1_i32 = arith.constant 1 : i32
    %42 = arith.select %41, %c1_i32, %c16_i32 : i32
    %43 = vector.broadcast %42 : i32 to vector<32x1xi32>
    %44 = arith.remsi %40, %43 : vector<32x1xi32>
    %c0_i32_25 = arith.constant 0 : i32
    %45 = vector.broadcast %c0_i32_25 : i32 to vector<32x1xi32>
    %46 = arith.cmpi ne, %44, %45 : vector<32x1xi32>
    %c0_i32_26 = arith.constant 0 : i32
    %47 = vector.broadcast %c0_i32_26 : i32 to vector<32x1xi32>
    %48 = arith.cmpi slt, %44, %47 : vector<32x1xi32>
    %c0_i32_27 = arith.constant 0 : i32
    %49 = arith.cmpi slt, %42, %c0_i32_27 : i32
    %50 = vector.broadcast %49 : i1 to vector<32x1xi1>
    %51 = vector.broadcast %50 : vector<32x1xi1> to vector<32x1xi1>
    %52 = arith.xori %48, %51 : vector<32x1xi1>
    %53 = arith.andi %52, %46 : vector<32x1xi1>
    %54 = vector.broadcast %42 : i32 to vector<32x1xi32>
    %55 = arith.addi %44, %54 : vector<32x1xi32>
    %56 = arith.select %53, %55, %44 : vector<32x1xi1>, vector<32x1xi32>
    %c0_i32_28 = arith.constant 0 : i32
    %57 = vector.broadcast %c0_i32_28 : i32 to vector<32x1xi32>
    %58 = arith.cmpi ne, %56, %57 : vector<32x1xi32>
    %c1_i32_29 = arith.constant 1 : i32
    %59 = tpu.dynamic_rotate %33 by %c1_i32_29 dim 0 : vector<32x128xf32>, i32 -> vector<32x128xf32>
    %cst_30 = arith.constant 0.000000e+00 : f32
    %60 = vector.shape_cast %58 : vector<32x1xi1> to vector<32x1xi1>
    %61 = vector.broadcast %60 : vector<32x1xi1> to vector<32x128xi1>
    %62 = vector.broadcast %cst_30 : f32 to vector<32x128xf32>
    %63 = arith.select %61, %59, %62 : vector<32x128xi1>, vector<32x128xf32>
    %64 = arith.addf %36, %63 : vector<32x128xf32>
    %c15_i32 = arith.constant 15 : i32
    %65 = vector.broadcast %c15_i32 : i32 to vector<32x1xi32>
    %66 = arith.cmpi ne, %56, %65 : vector<32x1xi32>
    %c31_i32 = arith.constant 31 : i32
    %67 = tpu.dynamic_rotate %39 by %c31_i32 dim 0 : vector<32x128xf32>, i32 -> vector<32x128xf32>
    %cst_31 = arith.constant 0.000000e+00 : f32
    %68 = vector.shape_cast %66 : vector<32x1xi1> to vector<32x1xi1>
    %69 = vector.broadcast %68 : vector<32x1xi1> to vector<32x128xi1>
    %70 = vector.broadcast %cst_31 : f32 to vector<32x128xf32>
    %71 = arith.select %69, %67, %70 : vector<32x128xi1>, vector<32x128xf32>
    %72 = arith.addf %64, %71 : vector<32x128xf32>
    %73 = arith.truncf %72 : vector<32x128xf32> to vector<32x128xbf16>
    %c0_32 = arith.constant 0 : index
    %c0_33 = arith.constant 0 : index
    %74 = vector.load %arg8[%c0_32, %c0_33] : memref<32x128xbf16, #tpu.memory_space<vmem>>, vector<32x128xbf16>
    tpu.vector_store %arg8[%c0_32, %c0_33], %73 {strides = array<i32>} : memref<32x128xbf16, #tpu.memory_space<vmem>>, vector<32x128xbf16>,
    %cst_34 = arith.constant dense<0.000000e+00> : vector<128xf32>
    %75 = vector.multi_reduction <add>, %72, %cst_34 [0] : vector<32x128xf32> to vector<128xf32>
    %76 = vector.shape_cast %75 : vector<128xf32> to vector<1x128xf32>
    %77 = arith.mulf %72, %72 : vector<32x128xf32>
    %cst_35 = arith.constant dense<0.000000e+00> : vector<128xf32>
    %78 = vector.multi_reduction <add>, %77, %cst_35 [0] : vector<32x128xf32> to vector<128xf32>
    %79 = vector.shape_cast %78 : vector<128xf32> to vector<1x128xf32>
    %80 = tpu.concatenate %76, %79 in 0 : vector<1x128xf32>, vector<1x128xf32> -> vector<2x128xf32>
    %c0_36 = arith.constant 0 : index
    %c0_37 = arith.constant 0 : index
    %81 = vector.load %arg3[%c0_36, %c0_37] : memref<128x128xf32, #tpu.memory_space<vmem>>, vector<128x128xf32>
    %cst_38 = arith.constant dense<0.000000e+00> : vector<2x128xf32>
    %82 = tpu.matmul %80, %81, %cst_38 {dimension_numbers = #tpu.dot_dimension_numbers<[1], [0], [0], [1], [0, 0, 1, 1], [], []>} : vector<2x128xf32>, vector<128x128xf32>, vector<2x128xf32> -> vector<2x128xf32>
    %c0_39 = arith.constant 0 : index
    %c0_40 = arith.constant 0 : index
    %c0_41 = arith.constant 0 : index
    %83 = vector.load %arg9[%c0_39, %c0_40, %c0_41] : memref<1x2x128xf32, #tpu.memory_space<vmem>>, vector<1x2x128xf32>
    %84 = vector.shape_cast %83 : vector<1x2x128xf32> to vector<2x128xf32>
    %85 = vector.shape_cast %82 : vector<2x128xf32> to vector<1x2x128xf32>
    tpu.vector_store %arg9[%c0_39, %c0_40, %c0_41], %85 {strides = array<i32>} : memref<1x2x128xf32, #tpu.memory_space<vmem>>, vector<1x2x128xf32>,
    return
  }
  func.func @transform_0(%arg0: i32) -> (i32, i32) {
    %c0_i32 = arith.constant 0 : i32
    %c0_i32_0 = arith.constant 0 : i32
    return %arg0, %c0_i32 : i32, i32
  }
  func.func @transform_1(%arg0: i32) -> (i32, i32, i32) {
    %c0_i32 = arith.constant 0 : i32
    %c0_i32_0 = arith.constant 0 : i32
    %c0_i32_1 = arith.constant 0 : i32
    %c0_i32_2 = arith.constant 0 : i32
    return %c0_i32, %c0_i32_0, %c0_i32_1 : i32, i32, i32
  }
  func.func @transform_2(%arg0: i32) -> (i32, i32) {
    %c0_i32 = arith.constant 0 : i32
    %c0_i32_0 = arith.constant 0 : i32
    %c0_i32_1 = arith.constant 0 : i32
    return %c0_i32, %c0_i32_0 : i32, i32
  }
  func.func @transform_3(%arg0: i32) -> (i32, i32) {
    %c0_i32 = arith.constant 0 : i32
    %c0_i32_0 = arith.constant 0 : i32
    %c0_i32_1 = arith.constant 0 : i32
    return %c0_i32, %c0_i32_0 : i32, i32
  }
  func.func @transform_4(%arg0: i32) -> (i32, i32) {
    %c0_i32 = arith.constant 0 : i32
    %c0_i32_0 = arith.constant 0 : i32
    %c0_i32_1 = arith.constant 0 : i32
    return %c0_i32, %c0_i32_0 : i32, i32
  }
  func.func @transform_5(%arg0: i32) -> (i32, i32) {
    %c0_i32 = arith.constant 0 : i32
    %c0_i32_0 = arith.constant 0 : i32
    %c0_i32_1 = arith.constant 0 : i32
    return %c0_i32, %c0_i32_0 : i32, i32
  }
  func.func @transform_6(%arg0: i32) -> (i32, i32) {
    %c0_i32 = arith.constant 0 : i32
    %c0_i32_0 = arith.constant 0 : i32
    %c0_i32_1 = arith.constant 0 : i32
    return %c0_i32, %c0_i32_0 : i32, i32
  }
  func.func @transform_7(%arg0: i32) -> (i32, i32) {
    %c0_i32 = arith.constant 0 : i32
    %c0_i32_0 = arith.constant 0 : i32
    return %arg0, %c0_i32 : i32, i32
  }
  func.func @transform_8(%arg0: i32) -> (i32, i32, i32) {
    %c0_i32 = arith.constant 0 : i32
    %c0_i32_0 = arith.constant 0 : i32
    %c0_i32_1 = arith.constant 0 : i32
    return %arg0, %c0_i32, %c0_i32_0 : i32, i32, i32
  }
}

module attributes {stable_mosaic.version = 11 : i64} {
  func.func @bn_relu_nchw_kernel(%arg0: i32, %arg1: memref<16x128xbf16, #tpu.memory_space<vmem>>, %arg2: memref<2x128xf32, #tpu.memory_space<vmem>>, %arg3: memref<1x128xf32, #tpu.memory_space<vmem>>, %arg4: memref<1x128xf32, #tpu.memory_space<vmem>>, %arg5: memref<128x128xf32, #tpu.memory_space<vmem>>, %arg6: memref<8x128x16xf32, #tpu.memory_space<vmem>>, %arg7: memref<1x8x16x16xf32, #tpu.memory_space<vmem>>) attributes {dimension_semantics = [#tpu.dimension_semantics<parallel>], iteration_bounds = array<i64: 2>, scalar_prefetch = 0 : i64, scratch_operands = 0 : i64, tpu.core_type = #tpu.core_type<tc>, window_params = [{transform_indices = @transform_0, window_bounds = array<i64: 16, 128>}, {pipeline_mode = #tpu.pipeline_mode<synchronous>, transform_indices = @transform_1, window_bounds = array<i64: 2, 128>}, {pipeline_mode = #tpu.pipeline_mode<synchronous>, transform_indices = @transform_2, window_bounds = array<i64: 1, 128>}, {pipeline_mode = #tpu.pipeline_mode<synchronous>, transform_indices = @transform_3, window_bounds = array<i64: 1, 128>}, {pipeline_mode = #tpu.pipeline_mode<synchronous>, transform_indices = @transform_4, window_bounds = array<i64: 128, 128>}, {pipeline_mode = #tpu.pipeline_mode<synchronous>, transform_indices = @transform_5, window_bounds = array<i64: 8, 128, 16>}, {transform_indices = @transform_6, window_bounds = array<i64: 1, 8, 16, 16>}]} {
    %c0 = arith.constant 0 : index
    %c0_0 = arith.constant 0 : index
    %0 = vector.load %arg2[%c0, %c0_0] : memref<2x128xf32, #tpu.memory_space<vmem>>, vector<2x128xf32>
    %c0_1 = arith.constant 0 : index
    %c0_2 = arith.constant 0 : index
    %1 = vector.load %arg3[%c0_1, %c0_2] : memref<1x128xf32, #tpu.memory_space<vmem>>, vector<1x128xf32>
    %c0_3 = arith.constant 0 : index
    %c0_4 = arith.constant 0 : index
    %2 = vector.load %arg4[%c0_3, %c0_4] : memref<1x128xf32, #tpu.memory_space<vmem>>, vector<1x128xf32>
    %c0_5 = arith.constant 0 : index
    %c0_6 = arith.constant 0 : index
    %3 = vector.load %arg5[%c0_5, %c0_6] : memref<128x128xf32, #tpu.memory_space<vmem>>, vector<128x128xf32>
    %4 = vector.extract_strided_slice %0 {offsets = [0, 0], sizes = [1, 128], strides = [1, 1]} : vector<2x128xf32> to vector<1x128xf32>
    %cst = arith.constant 0.001953125 : f32
    %5 = vector.broadcast %cst : f32 to vector<1x128xf32>
    %6 = arith.mulf %4, %5 : vector<1x128xf32>
    %7 = vector.extract_strided_slice %0 {offsets = [1, 0], sizes = [1, 128], strides = [1, 1]} : vector<2x128xf32> to vector<1x128xf32>
    %cst_7 = arith.constant 0.001953125 : f32
    %8 = vector.broadcast %cst_7 : f32 to vector<1x128xf32>
    %9 = arith.mulf %7, %8 : vector<1x128xf32>
    %10 = arith.mulf %6, %6 : vector<1x128xf32>
    %11 = arith.subf %9, %10 : vector<1x128xf32>
    %cst_8 = arith.constant 0.000000e+00 : f32
    %12 = vector.broadcast %cst_8 : f32 to vector<1x128xf32>
    %13 = arith.maximumf %11, %12 : vector<1x128xf32>
    %cst_9 = arith.constant 9.99999974E-6 : f32
    %14 = vector.broadcast %cst_9 : f32 to vector<1x128xf32>
    %15 = arith.addf %13, %14 : vector<1x128xf32>
    %16 = math.rsqrt %15 : vector<1x128xf32>
    %17 = arith.mulf %1, %16 : vector<1x128xf32>
    %18 = arith.mulf %6, %17 : vector<1x128xf32>
    %19 = arith.subf %2, %18 : vector<1x128xf32>
    %cst_10 = arith.constant dense<0.000000e+00> : vector<1x128xf32>
    %20 = tpu.matmul %17, %3, %cst_10 {dimension_numbers = #tpu.dot_dimension_numbers<[1], [0], [0], [1], [0, 0, 1, 1], [], []>} : vector<1x128xf32>, vector<128x128xf32>, vector<1x128xf32> -> vector<1x128xf32>
    %cst_11 = arith.constant dense<0.000000e+00> : vector<1x128xf32>
    %21 = tpu.matmul %19, %3, %cst_11 {dimension_numbers = #tpu.dot_dimension_numbers<[1], [0], [0], [1], [0, 0, 1, 1], [], []>} : vector<1x128xf32>, vector<128x128xf32>, vector<1x128xf32> -> vector<1x128xf32>
    %c0_12 = arith.constant 0 : index
    %c0_13 = arith.constant 0 : index
    %22 = vector.load %arg1[%c0_12, %c0_13] : memref<16x128xbf16, #tpu.memory_space<vmem>>, vector<16x128xbf16>
    %23 = arith.extf %22 : vector<16x128xbf16> to vector<16x128xf32>
    %24 = vector.broadcast %20 : vector<1x128xf32> to vector<16x128xf32>
    %25 = arith.mulf %23, %24 : vector<16x128xf32>
    %26 = vector.broadcast %21 : vector<1x128xf32> to vector<16x128xf32>
    %27 = arith.addf %25, %26 : vector<16x128xf32>
    %cst_14 = arith.constant 0.000000e+00 : f32
    %28 = vector.broadcast %cst_14 : f32 to vector<16x128xf32>
    %29 = arith.maximumf %27, %28 : vector<16x128xf32>
    %c0_15 = arith.constant 0 : index
    %c0_16 = arith.constant 0 : index
    %c0_17 = arith.constant 0 : index
    %30 = vector.load %arg6[%c0_15, %c0_16, %c0_17] : memref<8x128x16xf32, #tpu.memory_space<vmem>>, vector<1x128x16xf32>
    %31 = vector.shape_cast %30 : vector<1x128x16xf32> to vector<128x16xf32>
    %cst_18 = arith.constant dense<0.000000e+00> : vector<16x16xf32>
    %32 = tpu.matmul %29, %31, %cst_18 {dimension_numbers = #tpu.dot_dimension_numbers<[1], [0], [0], [1], [0, 0, 1, 1], [], []>} : vector<16x128xf32>, vector<128x16xf32>, vector<16x16xf32> -> vector<16x16xf32>
    %c0_19 = arith.constant 0 : index
    %c0_20 = arith.constant 0 : index
    %c0_21 = arith.constant 0 : index
    %c0_22 = arith.constant 0 : index
    %33 = vector.load %arg7[%c0_19, %c0_20, %c0_21, %c0_22] : memref<1x8x16x16xf32, #tpu.memory_space<vmem>>, vector<1x1x16x16xf32>
    %34 = vector.shape_cast %33 : vector<1x1x16x16xf32> to vector<16x16xf32>
    %35 = vector.shape_cast %32 : vector<16x16xf32> to vector<1x1x16x16xf32>
    tpu.vector_store %arg7[%c0_19, %c0_20, %c0_21, %c0_22], %35 {strides = array<i32>} : memref<1x8x16x16xf32, #tpu.memory_space<vmem>>, vector<1x1x16x16xf32>,
    %c1 = arith.constant 1 : index
    %c0_23 = arith.constant 0 : index
    %c0_24 = arith.constant 0 : index
    %36 = vector.load %arg6[%c1, %c0_23, %c0_24] : memref<8x128x16xf32, #tpu.memory_space<vmem>>, vector<1x128x16xf32>
    %37 = vector.shape_cast %36 : vector<1x128x16xf32> to vector<128x16xf32>
    %cst_25 = arith.constant dense<0.000000e+00> : vector<16x16xf32>
    %38 = tpu.matmul %29, %37, %cst_25 {dimension_numbers = #tpu.dot_dimension_numbers<[1], [0], [0], [1], [0, 0, 1, 1], [], []>} : vector<16x128xf32>, vector<128x16xf32>, vector<16x16xf32> -> vector<16x16xf32>
    %c0_26 = arith.constant 0 : index
    %c1_27 = arith.constant 1 : index
    %c0_28 = arith.constant 0 : index
    %c0_29 = arith.constant 0 : index
    %39 = vector.load %arg7[%c0_26, %c1_27, %c0_28, %c0_29] : memref<1x8x16x16xf32, #tpu.memory_space<vmem>>, vector<1x1x16x16xf32>
    %40 = vector.shape_cast %39 : vector<1x1x16x16xf32> to vector<16x16xf32>
    %41 = vector.shape_cast %38 : vector<16x16xf32> to vector<1x1x16x16xf32>
    tpu.vector_store %arg7[%c0_26, %c1_27, %c0_28, %c0_29], %41 {strides = array<i32>} : memref<1x8x16x16xf32, #tpu.memory_space<vmem>>, vector<1x1x16x16xf32>,
    %c2 = arith.constant 2 : index
    %c0_30 = arith.constant 0 : index
    %c0_31 = arith.constant 0 : index
    %42 = vector.load %arg6[%c2, %c0_30, %c0_31] : memref<8x128x16xf32, #tpu.memory_space<vmem>>, vector<1x128x16xf32>
    %43 = vector.shape_cast %42 : vector<1x128x16xf32> to vector<128x16xf32>
    %cst_32 = arith.constant dense<0.000000e+00> : vector<16x16xf32>
    %44 = tpu.matmul %29, %43, %cst_32 {dimension_numbers = #tpu.dot_dimension_numbers<[1], [0], [0], [1], [0, 0, 1, 1], [], []>} : vector<16x128xf32>, vector<128x16xf32>, vector<16x16xf32> -> vector<16x16xf32>
    %c0_33 = arith.constant 0 : index
    %c2_34 = arith.constant 2 : index
    %c0_35 = arith.constant 0 : index
    %c0_36 = arith.constant 0 : index
    %45 = vector.load %arg7[%c0_33, %c2_34, %c0_35, %c0_36] : memref<1x8x16x16xf32, #tpu.memory_space<vmem>>, vector<1x1x16x16xf32>
    %46 = vector.shape_cast %45 : vector<1x1x16x16xf32> to vector<16x16xf32>
    %47 = vector.shape_cast %44 : vector<16x16xf32> to vector<1x1x16x16xf32>
    tpu.vector_store %arg7[%c0_33, %c2_34, %c0_35, %c0_36], %47 {strides = array<i32>} : memref<1x8x16x16xf32, #tpu.memory_space<vmem>>, vector<1x1x16x16xf32>,
    %c3 = arith.constant 3 : index
    %c0_37 = arith.constant 0 : index
    %c0_38 = arith.constant 0 : index
    %48 = vector.load %arg6[%c3, %c0_37, %c0_38] : memref<8x128x16xf32, #tpu.memory_space<vmem>>, vector<1x128x16xf32>
    %49 = vector.shape_cast %48 : vector<1x128x16xf32> to vector<128x16xf32>
    %cst_39 = arith.constant dense<0.000000e+00> : vector<16x16xf32>
    %50 = tpu.matmul %29, %49, %cst_39 {dimension_numbers = #tpu.dot_dimension_numbers<[1], [0], [0], [1], [0, 0, 1, 1], [], []>} : vector<16x128xf32>, vector<128x16xf32>, vector<16x16xf32> -> vector<16x16xf32>
    %c0_40 = arith.constant 0 : index
    %c3_41 = arith.constant 3 : index
    %c0_42 = arith.constant 0 : index
    %c0_43 = arith.constant 0 : index
    %51 = vector.load %arg7[%c0_40, %c3_41, %c0_42, %c0_43] : memref<1x8x16x16xf32, #tpu.memory_space<vmem>>, vector<1x1x16x16xf32>
    %52 = vector.shape_cast %51 : vector<1x1x16x16xf32> to vector<16x16xf32>
    %53 = vector.shape_cast %50 : vector<16x16xf32> to vector<1x1x16x16xf32>
    tpu.vector_store %arg7[%c0_40, %c3_41, %c0_42, %c0_43], %53 {strides = array<i32>} : memref<1x8x16x16xf32, #tpu.memory_space<vmem>>, vector<1x1x16x16xf32>,
    %c4 = arith.constant 4 : index
    %c0_44 = arith.constant 0 : index
    %c0_45 = arith.constant 0 : index
    %54 = vector.load %arg6[%c4, %c0_44, %c0_45] : memref<8x128x16xf32, #tpu.memory_space<vmem>>, vector<1x128x16xf32>
    %55 = vector.shape_cast %54 : vector<1x128x16xf32> to vector<128x16xf32>
    %cst_46 = arith.constant dense<0.000000e+00> : vector<16x16xf32>
    %56 = tpu.matmul %29, %55, %cst_46 {dimension_numbers = #tpu.dot_dimension_numbers<[1], [0], [0], [1], [0, 0, 1, 1], [], []>} : vector<16x128xf32>, vector<128x16xf32>, vector<16x16xf32> -> vector<16x16xf32>
    %c0_47 = arith.constant 0 : index
    %c4_48 = arith.constant 4 : index
    %c0_49 = arith.constant 0 : index
    %c0_50 = arith.constant 0 : index
    %57 = vector.load %arg7[%c0_47, %c4_48, %c0_49, %c0_50] : memref<1x8x16x16xf32, #tpu.memory_space<vmem>>, vector<1x1x16x16xf32>
    %58 = vector.shape_cast %57 : vector<1x1x16x16xf32> to vector<16x16xf32>
    %59 = vector.shape_cast %56 : vector<16x16xf32> to vector<1x1x16x16xf32>
    tpu.vector_store %arg7[%c0_47, %c4_48, %c0_49, %c0_50], %59 {strides = array<i32>} : memref<1x8x16x16xf32, #tpu.memory_space<vmem>>, vector<1x1x16x16xf32>,
    %c5 = arith.constant 5 : index
    %c0_51 = arith.constant 0 : index
    %c0_52 = arith.constant 0 : index
    %60 = vector.load %arg6[%c5, %c0_51, %c0_52] : memref<8x128x16xf32, #tpu.memory_space<vmem>>, vector<1x128x16xf32>
    %61 = vector.shape_cast %60 : vector<1x128x16xf32> to vector<128x16xf32>
    %cst_53 = arith.constant dense<0.000000e+00> : vector<16x16xf32>
    %62 = tpu.matmul %29, %61, %cst_53 {dimension_numbers = #tpu.dot_dimension_numbers<[1], [0], [0], [1], [0, 0, 1, 1], [], []>} : vector<16x128xf32>, vector<128x16xf32>, vector<16x16xf32> -> vector<16x16xf32>
    %c0_54 = arith.constant 0 : index
    %c5_55 = arith.constant 5 : index
    %c0_56 = arith.constant 0 : index
    %c0_57 = arith.constant 0 : index
    %63 = vector.load %arg7[%c0_54, %c5_55, %c0_56, %c0_57] : memref<1x8x16x16xf32, #tpu.memory_space<vmem>>, vector<1x1x16x16xf32>
    %64 = vector.shape_cast %63 : vector<1x1x16x16xf32> to vector<16x16xf32>
    %65 = vector.shape_cast %62 : vector<16x16xf32> to vector<1x1x16x16xf32>
    tpu.vector_store %arg7[%c0_54, %c5_55, %c0_56, %c0_57], %65 {strides = array<i32>} : memref<1x8x16x16xf32, #tpu.memory_space<vmem>>, vector<1x1x16x16xf32>,
    %c6 = arith.constant 6 : index
    %c0_58 = arith.constant 0 : index
    %c0_59 = arith.constant 0 : index
    %66 = vector.load %arg6[%c6, %c0_58, %c0_59] : memref<8x128x16xf32, #tpu.memory_space<vmem>>, vector<1x128x16xf32>
    %67 = vector.shape_cast %66 : vector<1x128x16xf32> to vector<128x16xf32>
    %cst_60 = arith.constant dense<0.000000e+00> : vector<16x16xf32>
    %68 = tpu.matmul %29, %67, %cst_60 {dimension_numbers = #tpu.dot_dimension_numbers<[1], [0], [0], [1], [0, 0, 1, 1], [], []>} : vector<16x128xf32>, vector<128x16xf32>, vector<16x16xf32> -> vector<16x16xf32>
    %c0_61 = arith.constant 0 : index
    %c6_62 = arith.constant 6 : index
    %c0_63 = arith.constant 0 : index
    %c0_64 = arith.constant 0 : index
    %69 = vector.load %arg7[%c0_61, %c6_62, %c0_63, %c0_64] : memref<1x8x16x16xf32, #tpu.memory_space<vmem>>, vector<1x1x16x16xf32>
    %70 = vector.shape_cast %69 : vector<1x1x16x16xf32> to vector<16x16xf32>
    %71 = vector.shape_cast %68 : vector<16x16xf32> to vector<1x1x16x16xf32>
    tpu.vector_store %arg7[%c0_61, %c6_62, %c0_63, %c0_64], %71 {strides = array<i32>} : memref<1x8x16x16xf32, #tpu.memory_space<vmem>>, vector<1x1x16x16xf32>,
    %c7 = arith.constant 7 : index
    %c0_65 = arith.constant 0 : index
    %c0_66 = arith.constant 0 : index
    %72 = vector.load %arg6[%c7, %c0_65, %c0_66] : memref<8x128x16xf32, #tpu.memory_space<vmem>>, vector<1x128x16xf32>
    %73 = vector.shape_cast %72 : vector<1x128x16xf32> to vector<128x16xf32>
    %cst_67 = arith.constant dense<0.000000e+00> : vector<16x16xf32>
    %74 = tpu.matmul %29, %73, %cst_67 {dimension_numbers = #tpu.dot_dimension_numbers<[1], [0], [0], [1], [0, 0, 1, 1], [], []>} : vector<16x128xf32>, vector<128x16xf32>, vector<16x16xf32> -> vector<16x16xf32>
    %c0_68 = arith.constant 0 : index
    %c7_69 = arith.constant 7 : index
    %c0_70 = arith.constant 0 : index
    %c0_71 = arith.constant 0 : index
    %75 = vector.load %arg7[%c0_68, %c7_69, %c0_70, %c0_71] : memref<1x8x16x16xf32, #tpu.memory_space<vmem>>, vector<1x1x16x16xf32>
    %76 = vector.shape_cast %75 : vector<1x1x16x16xf32> to vector<16x16xf32>
    %77 = vector.shape_cast %74 : vector<16x16xf32> to vector<1x1x16x16xf32>
    tpu.vector_store %arg7[%c0_68, %c7_69, %c0_70, %c0_71], %77 {strides = array<i32>} : memref<1x8x16x16xf32, #tpu.memory_space<vmem>>, vector<1x1x16x16xf32>,
    return
  }
  func.func @transform_0(%arg0: i32) -> (i32, i32) {
    %c0_i32 = arith.constant 0 : i32
    %c0_i32_0 = arith.constant 0 : i32
    return %arg0, %c0_i32 : i32, i32
  }
  func.func @transform_1(%arg0: i32) -> (i32, i32) {
    %c0_i32 = arith.constant 0 : i32
    %c0_i32_0 = arith.constant 0 : i32
    %c0_i32_1 = arith.constant 0 : i32
    return %c0_i32, %c0_i32_0 : i32, i32
  }
  func.func @transform_2(%arg0: i32) -> (i32, i32) {
    %c0_i32 = arith.constant 0 : i32
    %c0_i32_0 = arith.constant 0 : i32
    %c0_i32_1 = arith.constant 0 : i32
    return %c0_i32, %c0_i32_0 : i32, i32
  }
  func.func @transform_3(%arg0: i32) -> (i32, i32) {
    %c0_i32 = arith.constant 0 : i32
    %c0_i32_0 = arith.constant 0 : i32
    %c0_i32_1 = arith.constant 0 : i32
    return %c0_i32, %c0_i32_0 : i32, i32
  }
  func.func @transform_4(%arg0: i32) -> (i32, i32) {
    %c0_i32 = arith.constant 0 : i32
    %c0_i32_0 = arith.constant 0 : i32
    %c0_i32_1 = arith.constant 0 : i32
    return %c0_i32, %c0_i32_0 : i32, i32
  }
  func.func @transform_5(%arg0: i32) -> (i32, i32, i32) {
    %c0_i32 = arith.constant 0 : i32
    %c0_i32_0 = arith.constant 0 : i32
    %c0_i32_1 = arith.constant 0 : i32
    %c0_i32_2 = arith.constant 0 : i32
    return %c0_i32, %c0_i32_0, %c0_i32_1 : i32, i32, i32
  }
  func.func @transform_6(%arg0: i32) -> (i32, i32, i32, i32) {
    %c0_i32 = arith.constant 0 : i32
    %c0_i32_0 = arith.constant 0 : i32
    %c0_i32_1 = arith.constant 0 : i32
    %c0_i32_2 = arith.constant 0 : i32
    return %arg0, %c0_i32, %c0_i32_0, %c0_i32_1 : i32, i32, i32, i32
  }
}

</mosaic_0001>

<bundles_post_ra>
// kernel: double_conv.3
= control target key start
LH: loop header
LB: loop body
LE: loop exit
PB: predicated region body
PF: predicated region fallthrough
CT: control target
= control target key end

     0   :  { %10 = vsyncpa [#allocation3], 0  ;;  %s1010_s0 = inlined_call_operand.hbm [shape: f32[32,64], index: 0, kind: input, shape index: {}]   ;;  %s1011_s1 = inlined_call_operand.hbm [shape: bf16[3,64,128], index: 1, kind: input, shape index: {}]   ;;  %s1012_s2 = inlined_call_operand.hbm [shape: f32[128,128], index: 2, kind: input, shape index: {}]   ;;  %s1013_s3 = inlined_call_operand.hbm [shape: bf16[32,128], index: 3, kind: output, shape index: {0}]   ;;  %s1014_s4 = inlined_call_operand.hbm [shape: f32[1,2,128], index: 4, kind: output, shape index: {1}]  }
   0x1   :  { %11 = vsyncpa [#allocation6], 0 }
   0x2   :  { %12 = vsyncpa [#allocation4], 0 }
   0x3   :  { %13 = vsyncpa [#allocation10], 0  ;;  %s897_s15 = smov [#allocation5]   ;;  %s779_s19 = scalar_lea.hbm %s1011_s1, 1536 }
   0x4   :  { %s31_s16 = sshll.u32 %s897_s15, 4  ;;  %p780_p0 = scmp.ne.s32.totalorder %s1011_s1, %s779_s19  ;;  %s32_s16 = int_to_ptr.vmem [resolvable:$true] %s31_s16 }
   0x5   :  { %p783_p1 = scmp.lt.u32.totalorder %s779_s19, %s1011_s1 }
   0x7   :  { %p785_p2 = pnand %p783_p1, %p780_p0 }
   0x9   :  { %788 = shalt.err (!%p785_p2)
}
   0xa   :  { %s789_s24 = scalar_lea.vmem %s32_s16, 1536  ;;  %p794_p4 = scmp.lt.s32.totalorder %s32_s16, %s32_s16 }
   0xb   :  { %p790_p3 = scmp.ne.s32.totalorder %s32_s16, %s789_s24  ;;  %p795_p5 = scmp.lt.s32.totalorder %s789_s24, %s789_s24 }
   0xd   :  { %p796_p6 = por %p795_p5, %p794_p4 }
   0xf   :  { %p797_p7 = pnand %p796_p6, %p790_p3 }
  0x11   :  { %800 = shalt.err (!%p797_p7)
}
  0x12   :  { %s898_s25 = smov 64   ;;  %s899_s26 = smov 4  }
  0x13   :  { %37 = dma.hbm_to_vmem [thread:$0]  %s1011_s1, 1536, %s32_s16, [#allocation6], %s898_s25, %s898_s25, %s899_s26  }
  0x14   :  { %s900_s29 = smov [#allocation2]   ;;  %s801_s7 = scalar_lea.hbm %s1010_s0, 512 }
  0x15   :  { %s19_s30 = sshll.u32 %s900_s29, 4  ;;  %p802_p8 = scmp.ne.s32.totalorder %s1010_s0, %s801_s7  ;;  %s20_s30 = int_to_ptr.vmem [resolvable:$true] %s19_s30 }
  0x16   :  { %p805_p9 = scmp.lt.u32.totalorder %s801_s7, %s1010_s0 }
  0x18   :  { %p807_p10 = pnand %p805_p9, %p802_p8 }
  0x1a   :  { %810 = shalt.err (!%p807_p10)
}
  0x1b   :  { %s811_s12 = scalar_lea.vmem %s20_s30, 512  ;;  %p816_p12 = scmp.lt.s32.totalorder %s20_s30, %s20_s30 }
  0x1c   :  { %p812_p11 = scmp.ne.s32.totalorder %s20_s30, %s811_s12  ;;  %p817_p13 = scmp.lt.s32.totalorder %s811_s12, %s811_s12 }
  0x1e   :  { %p818_p0 = por %p817_p13, %p816_p12 }
  0x20   :  { %p819_p1 = pnand %p818_p0, %p812_p11 }
  0x22   :  { %822 = shalt.err (!%p819_p1)
}
  0x23   :  { %s901_s1 = smov 128   ;;  %s902_s13 = smov 8  }
  0x24   :  { %25 = dma.hbm_to_vmem [thread:$0]  %s1010_s0, 512, %s20_s30, [#allocation3], %s901_s1, %s901_s1, %s902_s13  }
  0x25   :  { %s903_s16 = smov [#allocation7]   ;;  %s823_s20 = scalar_lea.hbm %s1012_s2, 2048 }
  0x26   :  { %s43_s17 = sshll.u32 %s903_s16, 4  ;;  %p824_p2 = scmp.ne.s32.totalorder %s1012_s2, %s823_s20  ;;  %s44_s17 = int_to_ptr.vmem [resolvable:$true] %s43_s17 }
  0x27   :  { %p827_p3 = scmp.lt.u32.totalorder %s823_s20, %s1012_s2 }
  0x29   :  { %p829_p4 = pnand %p827_p3, %p824_p2 }
  0x2b   :  { %832 = shalt.err (!%p829_p4)
}
  0x2c   :  { %s833_s27 = scalar_lea.vmem %s44_s17, 2048  ;;  %p838_p6 = scmp.lt.s32.totalorder %s44_s17, %s44_s17 }
  0x2d   :  { %p834_p5 = scmp.ne.s32.totalorder %s44_s17, %s833_s27  ;;  %p839_p7 = scmp.lt.s32.totalorder %s833_s27, %s833_s27 }
  0x2f   :  { %p840_p8 = por %p839_p7, %p838_p6 }
  0x31   :  { %p841_p9 = pnand %p840_p8, %p834_p5 }
  0x33   :  { %844 = shalt.err (!%p841_p9)
}
  0x34   :  { %49 = dma.hbm_to_vmem [thread:$0]  %s1012_s2, 2048, %s44_s17, [#allocation6], %s901_s1, %s901_s1, %s902_s13  }
  0x35   :  { %889 = dma.done.wait [#allocation3], 512  }
  0x36   :  { %890 = vsyncadd [#allocation3], 4294966784 }
  0x37   :  { %891 = dma.done.wait [#allocation6], 3584  }
  0x38   :  { %892 = vsyncadd [#allocation6], 4294963712  ;;  %v767_v0 = vld [vmem:[#allocation5] sm:$0xff]   ;;  %v768_v1 = vld [vmem:[#allocation5 + $0x8] sm:$0xff]   ;;  %vm98_vm0 = vcmask 523264   ;;  %v904_v18 = vmov 0.0|0.0   ;;  %v245_v44 = vlaneseq }
  0x39   :  { %660 = vmatprep.subr.bf16.mxu0 %v767_v0  ;;  %v770_v2 = vld [vmem:[#allocation5 + $0x40] sm:$0xff]   ;;  %v769_v3 = vld [vmem:[#allocation5 + $0x10] sm:$0xff]   ;;  %v61_v5 = vld [vmem:[#allocation2 + $0x8] sm:$0xff]  ;;  %vm905_vm1 = vmmov 0   ;;  %v906_v39 = vmov 0.0   ;;  %vm467_vm8 = vcmask 1040384  }
  0x3a   :  { %661 = vmatpush3.bf16.msra.mxu0 %v767_v0  ;;  %672 = vmatprep.subr.bf16.mxu1 %v770_v2  ;;  %v60_v4 = vld [vmem:[#allocation2] sm:$0xff]  ;;  %v772_v7 = vld [vmem:[#allocation5 + $0x48] sm:$0xff]   ;;  %v771_v8 = vld [vmem:[#allocation5 + $0x18] sm:$0xff]   ;;  %v246_v46 = vshrl.u32 %v245_v44, 7  ;;  %s907_s2 = smov [#allocation8]  }
  0x3b   :  { %662 = vmatprep.subr.bf16.mxu0 %v768_v1  ;;  %673 = vmatpush3.bf16.msra.mxu1 %v770_v2  ;;  %v64_v6 = vpack.c.bf16 %v61_v5, %v60_v4  ;;  %v62_v9 = vld [vmem:[#allocation2 + $0x10] sm:$0xff]  ;;  %v63_v11 = vld [vmem:[#allocation2 + $0x18] sm:$0xff]  ;;  %v773_v13 = vld [vmem:[#allocation5 + $0x20] sm:$0xff]   ;;  %s561_s29 = sshll.u32 %s907_s2, 4  ;;  %s562_s29 = int_to_ptr.vmem [resolvable:$true] %s561_s29 }
  0x3c   :  { %674 = vmatprep.subr.bf16.mxu1 %v772_v7  ;;  %v774_v10 = vld [vmem:[#allocation5 + $0x50] sm:$0xff]   ;;  %v776_v12 = vld [vmem:[#allocation5 + $0x58] sm:$0xff]   ;;  %v65_v14 = vpack.c.bf16 %v63_v11, %v62_v9  ;;  %v775_v15 = vld [vmem:[#allocation5 + $0x28] sm:$0xff]   ;;  %vm306_vm2 = vcmp.lt.s32.totalorder %v246_v46, 1  ;;  %v248_v57 = vadd.s32 16, %v246_v46  ;;  %vm404_vm3 = vcmp.lt.s32.totalorder %v246_v46, 7  ;;  %p850_p11 = scmp.lt.s32.totalorder %s562_s29, %s562_s29 }
  0x3d   :  { %668 = vmatprep.mubr.msk.bf16.mxu0 %vm98_vm0, %v64_v6  ;;  %680 = vmatprep.mubr.msk.bf16.mxu1 %vm98_vm0, %v64_v6  ;;  %v777_v16 = vld [vmem:[#allocation5 + $0x30] sm:$0xff]   ;;  %v778_v17 = vld [vmem:[#allocation5 + $0x38] sm:$0xff]   ;;  %v469_v19 = vld [vmem:[#allocation7] sm:$0xff]  ;;  %v254_v9 = vand.u32 15, %v246_v46  ;;  %s845_s30 = scalar_lea.vmem %s562_s29, 256 }
  0x3e   :  { %663 = vmatpush3.bf16.msra.mxu0 %v768_v1  ;;  %v470_v20 = vld [vmem:[#allocation7 + $0x8] sm:$0xff]  ;;  %v471_v22 = vld [vmem:[#allocation7 + $0x10] sm:$0xff]  ;;  %v472_v23 = vld [vmem:[#allocation7 + $0x18] sm:$0xff]  ;;  %v268_v5 = vand.u32 15, %v248_v57  ;;  %p846_p10 = scmp.ne.s32.totalorder %s562_s29, %s845_s30  ;;  %p851_p12 = scmp.lt.s32.totalorder %s845_s30, %s845_s30 }
  0x3f   :  { %664 = vmatprep.subr.bf16.mxu0 %v769_v3  ;;  %675 = vmatpush3.bf16.msra.mxu1 %v772_v7  ;;  %v732_v21 = vpack.c.bf16 %v470_v20, %v469_v19  ;;  %v735_v24 = vpack.c.bf16 %v472_v23, %v471_v22  ;;  %v473_v25 = vld [vmem:[#allocation7 + $0x20] sm:$0xff]  ;;  %v474_v26 = vld [vmem:[#allocation7 + $0x28] sm:$0xff]  ;;  %v475_v28 = vld [vmem:[#allocation7 + $0x30] sm:$0xff]  ;;  %v249_v7 = vadd.s32 24, %v246_v46  ;;  %vm298_vm5 = vcmp.ne.s32.totalorder %v254_v9, 0 }
  0x40   :  { %676 = vmatprep.subr.bf16.mxu1 %v774_v10  ;;  %v738_v27 = vpack.c.bf16 %v474_v26, %v473_v25  ;;  %v476_v29 = vld [vmem:[#allocation7 + $0x38] sm:$0xff]  ;;  %v477_v31 = vld [vmem:[#allocation7 + $0x40] sm:$0xff]  ;;  %v478_v32 = vld [vmem:[#allocation7 + $0x48] sm:$0xff]  ;;  %vm300_vm4 = vcmp.ne.s32.totalorder %v268_v5, 0  ;;  %p852_p13 = por %p851_p12, %p850_p11 }
  0x41   :  { %v741_v30 = vpack.c.bf16 %v476_v29, %v475_v28  ;;  %v744_v33 = vpack.c.bf16 %v478_v32, %v477_v31  ;;  %v479_v34 = vld [vmem:[#allocation7 + $0x50] sm:$0xff]  ;;  %v480_v35 = vld [vmem:[#allocation7 + $0x58] sm:$0xff]  ;;  %v481_v37 = vld [vmem:[#allocation7 + $0x60] sm:$0xff]  ;;  %v275_v11 = vand.u32 15, %v249_v7 }
  0x42   :  { %665 = vmatpush3.bf16.msra.mxu0 %v769_v3  ;;  %v747_v36 = vpack.c.bf16 %v480_v35, %v479_v34  ;;  %v482_v38 = vld [vmem:[#allocation7 + $0x68] sm:$0xff]  ;;  %v483_v41 = vld [vmem:[#allocation7 + $0x70] sm:$0xff]  ;;  %v484_v42 = vld [vmem:[#allocation7 + $0x78] sm:$0xff]  ;;  %p853_p0 = pnand %p852_p13, %p846_p10 }
  0x43   :  { %666 = vmatprep.subr.bf16.mxu0 %v771_v8  ;;  %677 = vmatpush3.bf16.msra.mxu1 %v774_v10  ;;  %v750_v40 = vpack.c.bf16 %v482_v38, %v481_v37  ;;  %v753_v43 = vpack.c.bf16 %v484_v42, %v483_v41  ;;  %v247_v10 = vadd.s32 8, %v246_v46  ;;  %vm399_vm6 = vcmp.ne.s32.totalorder %v275_v11, 15 }
  0x44   :  { %678 = vmatprep.subr.bf16.mxu1 %v776_v12 }
  0x46   :  { %667 = vmatpush3.bf16.msra.mxu0 %v771_v8 }
  0x47   :  { %684 = vmatprep.subr.bf16.mxu0 %v773_v13  ;;  %679 = vmatpush3.bf16.msra.mxu1 %v776_v12  ;;  %v261_v12 = vand.u32 15, %v247_v10 }
  0x48   :  { %731 = vmatprep.subr.bf16.mxu1 %v904_v18 }
  0x49   :  { %669 = vmatmul.mubr.msk.bf16.vlgmr.msra.gmra.mrb[0].mxu0 %vm98_vm0, %v65_v14  ;;  %vm397_vm7 = vcmp.ne.s32.totalorder %v261_v12, 15 }
  0x4a   :  { %685 = vmatpush3.bf16.msra.mxu0 %v773_v13  ;;  %692 = vmatprep.mubr.msk.bf16.mxu0 %vm98_vm0, %v64_v6 }
  0x4b   :  { %686 = vmatprep.subr.bf16.mxu0 %v775_v15  ;;  %681 = vmatmul.mubr.msk.bf16.vlgmr.msra.gmra.mrb[0].mxu1 %vm98_vm0, %v65_v14 }
  0x4c   :  { %733 = vmatpush3.bf16.msra.mxu1 %v732_v21  ;;  %728 = vmatprep.mubr.msk.f32.mxu1 %vm905_vm1, %v906_v39 }
  0x4d   :  { %734 = vmatprep.subr.bf16.mxu1 %v904_v18 }
  0x4e   :  { %687 = vmatpush3.bf16.msra.mxu0 %v775_v15 }
  0x4f   :  { %688 = vmatprep.subr.bf16.mxu0 %v777_v16 }
  0x50   :  { %736 = vmatpush3.bf16.msra.mxu1 %v735_v24 }
  0x51   :  { %737 = vmatprep.subr.bf16.mxu1 %v904_v18 }
  0x52   :  { %689 = vmatpush3.bf16.msra.mxu0 %v777_v16 }
  0x53   :  { %690 = vmatprep.subr.bf16.mxu0 %v778_v17 }
  0x54   :  { %739 = vmatpush3.bf16.msra.mxu1 %v738_v27 }
  0x55   :  { %740 = vmatprep.subr.bf16.mxu1 %v904_v18 }
  0x56   :  { %691 = vmatpush3.bf16.msra.mxu0 %v778_v17 }
  0x58   :  { %742 = vmatpush3.bf16.msra.mxu1 %v741_v30 }
  0x59   :  { %693 = vmatmul.mubr.msk.bf16.vlgmr.msra.gmra.mrb[4].mxu0 %vm98_vm0, %v65_v14  ;;  %743 = vmatprep.subr.bf16.mxu1 %v904_v18 }
  0x5c   :  { %745 = vmatpush3.bf16.msra.mxu1 %v744_v33 }
  0x5d   :  { %746 = vmatprep.subr.bf16.mxu1 %v904_v18 }
  0x60   :  { %748 = vmatpush3.bf16.msra.mxu1 %v747_v36 }
  0x61   :  { %749 = vmatprep.subr.bf16.mxu1 %v904_v18 }
  0x64   :  { %751 = vmatpush3.bf16.msra.mxu1 %v750_v40 }
  0x65   :  { %752 = vmatprep.subr.bf16.mxu1 %v904_v18 }
  0x68   :  { %754 = vmatpush3.bf16.msra.mxu1 %v753_v43 }
 0x11c   :  { %v670_v45 = vpop.f32.mrb[0].mxu0 }
 0x11d   :  { %v304_v47 = vrot.slane %v670_v45, 7  ;;  %v139_v48 = vpop.f32.mrb[1].mxu0 }
 0x11e   :  { %v302_v49 = vrot.slane %v139_v48, 7  ;;  %v671_v50 = vpop.f32.mrb[2].mxu0  ;;  %v682_v53 = vpop.f32.mrb[0].mxu1 }
 0x11f   :  { %v305_v51 = vrot.slane %v671_v50, 7  ;;  %v142_v52 = vpop.f32.mrb[3].mxu0  ;;  %v402_v55 = vrot.slane %v682_v53, 1  ;;  %v230_v56 = vpop.f32.mrb[1].mxu1 }
 0x120   :  { %v303_v54 = vrot.slane %v142_v52, 7  ;;  %v400_v58 = vrot.slane %v230_v56, 1  ;;  %v683_v59 = vpop.f32.mrb[2].mxu1 }
 0x121   :  { %v310_v60 = vsel %vm306_vm2, %v305_v51, %v302_v49  ;;  %v307_v61 = vsel %vm306_vm2, %v304_v47, %v305_v51  ;;  %v403_v62 = vrot.slane %v683_v59, 1  ;;  %v233_v63 = vpop.f32.mrb[3].mxu1 }
 0x122   :  { %v308_v0 = vsel %vm306_vm2, %v303_v54, %v304_v47  ;;  %v309_v1 = vsel %vm306_vm2, %v302_v49, %v303_v54  ;;  %v401_v2 = vrot.slane %v233_v63, 1  ;;  %v319_v16 = vsel %vm298_vm5, %v310_v60, 0.0 }
 0x123   :  { %v405_v3 = vsel %vm404_vm3, %v402_v55, %v403_v62  ;;  %v408_v4 = vsel %vm404_vm3, %v403_v62, %v400_v58  ;;  %v321_v13 = vsel %vm300_vm4, %v308_v0, 0.0 }
 0x124   :  { %v407_v6 = vsel %vm404_vm3, %v400_v58, %v401_v2  ;;  %v406_v8 = vsel %vm404_vm3, %v401_v2, %v402_v55  ;;  %v420_v24 = vsel %vm399_vm6, %v408_v4, 0.0 }
 0x125   :  { %v418_v27 = vsel %vm397_vm7, %v406_v8, 0.0 }
 0x12c   :  { %v694_v14 = vpop.f32.mrb[4].mxu0 }
 0x12d   :  { %v390_v15 = vadd.f32 %v694_v14, %v321_v13  ;;  %v381_v17 = vpop.f32.mrb[5].mxu0 }
 0x12e   :  { %v382_v18 = vadd.f32 %v381_v17, %v319_v16  ;;  %v695_v19 = vpop.f32.mrb[6].mxu0 }
 0x12f   :  { %v423_v20 = vadd.f32 %v405_v3, %v390_v15  ;;  %v393_v21 = vadd.f32 %v695_v19, %v307_v61  ;;  %v384_v22 = vpop.f32.mrb[7].mxu0 }
 0x130   :  { %v421_v23 = vadd.f32 %v407_v6, %v382_v18  ;;  %v385_v25 = vadd.f32 %v384_v22, %v309_v1 }
 0x131   :  { %v424_v26 = vadd.f32 %v420_v24, %v393_v21  ;;  %v456_v34 = vmul.f32 %v423_v20, %v423_v20 }
 0x132   :  { %v422_v28 = vadd.f32 %v418_v27, %v385_v25  ;;  %v454_v30 = vmul.f32 %v421_v23, %v421_v23 }
 0x133   :  { %v622_v29 = vpack.c.bf16 %v424_v26, %v423_v20  ;;  %v457_v37 = vmul.f32 %v424_v26, %v424_v26 }
 0x134   :  { %v445_v31 = vadd.f32 %v422_v28, %v421_v23  ;;  %v455_v32 = vmul.f32 %v422_v28, %v422_v28  ;;  %v617_v33 = vpack.c.bf16 %v422_v28, %v421_v23 }
 0x135   :  { %624 = vst [vmem:[#allocation8 + $0x8] sm:$0xff] %v622_v29  }
 0x136   :  { %v446_v35 = vadd.f32 %v445_v31, %v423_v20  ;;  %v458_v36 = vadd.f32 %v455_v32, %v454_v30  ;;  %618 = vst [vmem:[#allocation8] sm:$0xff] %v617_v33  }
 0x138   :  { %v447_v38 = vadd.f32 %v446_v35, %v424_v26  ;;  %v459_v39 = vadd.f32 %v458_v36, %v456_v34 }
 0x13a   :  { %v448_v40 = vrot.slane %v447_v38, 4  ;;  %v460_v41 = vadd.f32 %v459_v39, %v457_v37 }
 0x13c   :  { %v449_v42 = vadd.f32 %v448_v40, %v447_v38  ;;  %v461_v43 = vrot.slane %v460_v41, 4 }
 0x13e   :  { %v450_v44 = vrot.slane %v449_v42, 2  ;;  %v462_v45 = vadd.f32 %v461_v43, %v460_v41 }
 0x140   :  { %v451_v46 = vadd.f32 %v450_v44, %v449_v42  ;;  %v463_v47 = vrot.slane %v462_v45, 2 }
 0x142   :  { %v452_v48 = vrot.slane %v451_v46, 1  ;;  %v464_v49 = vadd.f32 %v463_v47, %v462_v45 }
 0x144   :  { %v465_v50 = vrot.slane %v464_v49, 1  ;;  %v453_v51 = vadd.f32 %v452_v48, %v451_v46 }
 0x146   :  { %v466_v52 = vadd.f32 %v465_v50, %v464_v49 }
 0x148   :  { %v468_v53 = vsel %vm467_vm8, %v453_v51, %v466_v52 }
 0x149   :  { %729 = vmatmul.mubr.f32.vlgmr.msra.gmra.mrb[4].mxu1 %v468_v53 }
 0x14a   :  { %856 = shalt.err (!%p853_p0)
}
 0x14b   :  { %s857_s7 = scalar_lea.hbm %s1013_s3, 256 }
 0x14c   :  { %p858_p1 = scmp.ne.s32.totalorder %s1013_s3, %s857_s7  ;;  %p861_p2 = scmp.lt.u32.totalorder %s857_s7, %s1013_s3 }
 0x14e   :  { %p863_p3 = pnand %p861_p2, %p858_p1 }
 0x150   :  { %866 = shalt.err (!%p863_p3)
}
 0x151   :  { %567 = dma.vmem_to_hbm [thread:$0]  %s562_s29, 256, %s1013_s3, [#allocation4], %s898_s25, %s898_s25, %s899_s26  }
 0x152   :  { %s908_s13 = smov [#allocation9]  }
 0x153   :  { %s574_s14 = sshll.u32 %s908_s13, 4  ;;  %s575_s14 = int_to_ptr.vmem [resolvable:$true] %s574_s14 }
 0x154   :  { %s867_s15 = scalar_lea.vmem %s575_s14, 32  ;;  %p872_p5 = scmp.lt.s32.totalorder %s575_s14, %s575_s14 }
 0x155   :  { %p868_p4 = scmp.ne.s32.totalorder %s575_s14, %s867_s15  ;;  %p873_p6 = scmp.lt.s32.totalorder %s867_s15, %s867_s15 }
 0x157   :  { %p874_p7 = por %p873_p6, %p872_p5 }
 0x159   :  { %p875_p8 = pnand %p874_p7, %p868_p4 }
 0x21c   :  { %v551_v54 = vpop.f32.mrb[4].mxu1 }
 0x21d   :  { %555 = vst [vmem:[#allocation9] sm:$0x3] %v551_v54  ;;  %v730_v55 = vpop.f32.mrb[5].mxu1 }
 0x21e   :  { %878 = shalt.err (!%p875_p8)
}
 0x21f   :  { %s879_s18 = scalar_lea.hbm %s1014_s4, 32 }
 0x220   :  { %p880_p9 = scmp.ne.s32.totalorder %s1014_s4, %s879_s18  ;;  %p883_p10 = scmp.lt.u32.totalorder %s879_s18, %s1014_s4 }
 0x222   :  { %p885_p11 = pnand %p883_p10, %p880_p9 }
 0x224   :  { %888 = shalt.err (!%p885_p11)
}
 0x225   :  { %577 = dma.vmem_to_hbm [thread:$0]  %s575_s14, 32, %s1014_s4, [#allocation10]  }
 0x226   :  { %893 = dma.done.wait [#allocation4], 256  }
 0x227   :  { %894 = vsyncadd [#allocation4], 4294967040 }
 0x228   :  { %895 = dma.done.wait [#allocation10], 32  }
 0x229   :  { %896 = vsyncadd [#allocation10], 4294967264 }
 0x22a   :  { %584 = vsyncpa [#allocation3], 1 }
 0x22b   :  { %585 = vsyncpa [#allocation6], 1 }
 0x22c   :  { %586 = vsyncpa [#allocation4], 1 }
 0x22d   :  { %587 = vsyncpa [#allocation10], 1 }

// kernel: double_conv.4
= control target key start
LH: loop header
LB: loop body
LE: loop exit
PB: predicated region body
PF: predicated region fallthrough
CT: control target
= control target key end

     0   :  { %14 = vsyncpa [#allocation3], 0  ;;  %s1821_s0 = inlined_call_operand.hbm [shape: bf16[32,128], index: 0, kind: input, shape index: {}]   ;;  %s1822_s1 = inlined_call_operand.hbm [shape: bf16[3,128,128], index: 1, kind: input, shape index: {}]   ;;  %s1823_s2 = inlined_call_operand.hbm [shape: f32[128,128], index: 2, kind: input, shape index: {}]   ;;  %s1824_s3 = inlined_call_operand.hbm [shape: f32[128,128], index: 3, kind: input, shape index: {}]   ;;  %s1825_s4 = inlined_call_operand.hbm [shape: f32[2,128], index: 4, kind: input, shape index: {}]   ;;  %s1826_s5 = inlined_call_operand.hbm [shape: f32[1,128], index: 5, kind: input, shape index: {}]   ;;  %s1827_s6 = inlined_call_operand.hbm [shape: f32[1,128], index: 6, kind: input, shape index: {}]   ;;  %s1828_s7 = inlined_call_operand.hbm [shape: bf16[32,128], index: 7, kind: output, shape index: {0}]   ;;  %s1829_s8 = inlined_call_operand.hbm [shape: f32[1,2,128], index: 8, kind: output, shape index: {1}]  }
   0x1   :  { %15 = vsyncpa [#allocation6], 0 }
   0x2   :  { %16 = vsyncpa [#allocation9], 0 }
   0x3   :  { %17 = vsyncpa [#allocation12], 0 }
   0x4   :  { %18 = vsyncpa [#allocation4], 0 }
   0x5   :  { %19 = vsyncpa [#allocation16], 0  ;;  %s1574_s27 = smov [#allocation5]   ;;  %s1364_s9 = scalar_lea.hbm %s1822_s1, 3072 }
   0x6   :  { %s37_s28 = sshll.u32 %s1574_s27, 4  ;;  %p1365_p0 = scmp.ne.s32.totalorder %s1822_s1, %s1364_s9  ;;  %s38_s28 = int_to_ptr.vmem [resolvable:$true] %s37_s28 }
   0x7   :  { %p1368_p1 = scmp.lt.u32.totalorder %s1364_s9, %s1822_s1 }
   0x9   :  { %p1370_p2 = pnand %p1368_p1, %p1365_p0 }
   0xb   :  { %1373 = shalt.err (!%p1370_p2)
}
   0xc   :  { %s1374_s14 = scalar_lea.vmem %s38_s28, 3072  ;;  %p1379_p4 = scmp.lt.s32.totalorder %s38_s28, %s38_s28 }
   0xd   :  { %p1375_p3 = scmp.ne.s32.totalorder %s38_s28, %s1374_s14  ;;  %p1380_p5 = scmp.lt.s32.totalorder %s1374_s14, %s1374_s14 }
   0xf   :  { %p1381_p6 = por %p1380_p5, %p1379_p4 }
  0x11   :  { %p1382_p7 = pnand %p1381_p6, %p1375_p3 }
  0x13   :  { %1385 = shalt.err (!%p1382_p7)
}
  0x14   :  { %s1575_s15 = smov 64   ;;  %s1576_s16 = smov 4  }
  0x15   :  { %43 = dma.hbm_to_vmem [thread:$0]  %s1822_s1, 3072, %s38_s28, [#allocation6], %s1575_s15, %s1575_s15, %s1576_s16  }
  0x16   :  { %s1577_s19 = smov [#allocation8]   ;;  %s1578_s21 = smov [#allocation11]  }
  0x17   :  { %s61_s20 = sshll.u32 %s1577_s19, 4  ;;  %s84_s22 = sshll.u32 %s1578_s21, 4  ;;  %s62_s20 = int_to_ptr.vmem [resolvable:$true] %s61_s20  ;;  %s85_s22 = int_to_ptr.vmem [resolvable:$true] %s84_s22 }
  0x18   :  { %s1386_s25 = scalar_lea.hbm %s1824_s3, 2048 }
  0x19   :  { %p1387_p8 = scmp.ne.s32.totalorder %s1824_s3, %s1386_s25  ;;  %p1390_p9 = scmp.lt.u32.totalorder %s1386_s25, %s1824_s3 }
  0x1b   :  { %p1392_p10 = pnand %p1390_p9, %p1387_p8 }
  0x1d   :  { %1395 = shalt.err (!%p1392_p10)
}
  0x1e   :  { %s1396_s1 = scalar_lea.vmem %s62_s20, 2048  ;;  %p1401_p12 = scmp.lt.s32.totalorder %s62_s20, %s62_s20 }
  0x1f   :  { %p1397_p11 = scmp.ne.s32.totalorder %s62_s20, %s1396_s1  ;;  %p1402_p13 = scmp.lt.s32.totalorder %s1396_s1, %s1396_s1 }
  0x21   :  { %p1403_p0 = por %p1402_p13, %p1401_p12 }
  0x23   :  { %p1404_p1 = pnand %p1403_p0, %p1397_p11 }
  0x25   :  { %1407 = shalt.err (!%p1404_p1)
}
  0x26   :  { %s1579_s28 = smov 128   ;;  %s1580_s9 = smov 8  }
  0x27   :  { %67 = dma.hbm_to_vmem [thread:$0]  %s1824_s3, 2048, %s62_s20, [#allocation9], %s1579_s28, %s1579_s28, %s1580_s9  }
  0x28   :  { %s1408_s14 = scalar_lea.hbm %s1826_s5, 16 }
  0x29   :  { %p1409_p2 = scmp.ne.s32.totalorder %s1826_s5, %s1408_s14  ;;  %p1412_p3 = scmp.lt.u32.totalorder %s1408_s14, %s1826_s5 }
  0x2b   :  { %p1414_p4 = pnand %p1412_p3, %p1409_p2 }
  0x2d   :  { %1417 = shalt.err (!%p1414_p4)
}
  0x2e   :  { %s1418_s23 = scalar_lea.vmem %s85_s22, 16  ;;  %s1422_s24 = scalar_lea.vmem %s85_s22, 32 }
  0x2f   :  { %p1419_p5 = scmp.ne.s32.totalorder %s85_s22, %s1418_s23  ;;  %p1423_p6 = scmp.lt.s32.totalorder %s85_s22, %s85_s22 }
  0x30   :  { %p1424_p7 = scmp.lt.s32.totalorder %s1422_s24, %s1418_s23 }
  0x32   :  { %p1425_p8 = por %p1424_p7, %p1423_p6 }
  0x34   :  { %p1426_p9 = pnand %p1425_p8, %p1419_p5 }
  0x36   :  { %1429 = shalt.err (!%p1426_p9)
}
  0x37   :  { %87 = dma.hbm_to_vmem [thread:$0]  %s1826_s5, 16, %s85_s22, [#allocation12]  }
  0x38   :  { %s1581_s25 = smov [#allocation2]   ;;  %s1582_s27 = smov [#allocation7]  }
  0x39   :  { %s25_s26 = sshll.u32 %s1581_s25, 4  ;;  %s49_s29 = sshll.u32 %s1582_s27, 4  ;;  %s26_s26 = int_to_ptr.vmem [resolvable:$true] %s25_s26  ;;  %s50_s29 = int_to_ptr.vmem [resolvable:$true] %s49_s29 }
  0x3a   :  { %s1430_s10 = scalar_lea.hbm %s1821_s0, 256 }
  0x3b   :  { %p1431_p10 = scmp.ne.s32.totalorder %s1821_s0, %s1430_s10  ;;  %p1434_p11 = scmp.lt.u32.totalorder %s1430_s10, %s1821_s0 }
  0x3d   :  { %p1436_p12 = pnand %p1434_p11, %p1431_p10 }
  0x3f   :  { %1439 = shalt.err (!%p1436_p12)
}
  0x40   :  { %s1440_s5 = scalar_lea.vmem %s26_s26, 256  ;;  %p1445_p0 = scmp.lt.s32.totalorder %s26_s26, %s26_s26 }
  0x41   :  { %p1441_p13 = scmp.ne.s32.totalorder %s26_s26, %s1440_s5  ;;  %p1446_p1 = scmp.lt.s32.totalorder %s1440_s5, %s1440_s5 }
  0x43   :  { %p1447_p2 = por %p1446_p1, %p1445_p0 }
  0x45   :  { %p1448_p3 = pnand %p1447_p2, %p1441_p13 }
  0x47   :  { %1451 = shalt.err (!%p1448_p3)
}
  0x48   :  { %31 = dma.hbm_to_vmem [thread:$0]  %s1821_s0, 256, %s26_s26, [#allocation3], %s1575_s15, %s1575_s15, %s1576_s16  }
  0x49   :  { %s1452_s21 = scalar_lea.hbm %s1823_s2, 2048 }
  0x4a   :  { %p1453_p4 = scmp.ne.s32.totalorder %s1823_s2, %s1452_s21  ;;  %p1456_p5 = scmp.lt.u32.totalorder %s1452_s21, %s1823_s2 }
  0x4c   :  { %p1458_p6 = pnand %p1456_p5, %p1453_p4 }
  0x4e   :  { %1461 = shalt.err (!%p1458_p6)
}
  0x4f   :  { %s1462_s25 = scalar_lea.vmem %s50_s29, 2048  ;;  %p1467_p8 = scmp.lt.s32.totalorder %s50_s29, %s50_s29 }
  0x50   :  { %p1463_p7 = scmp.ne.s32.totalorder %s50_s29, %s1462_s25  ;;  %p1468_p9 = scmp.lt.s32.totalorder %s1462_s25, %s1462_s25 }
  0x52   :  { %p1469_p10 = por %p1468_p9, %p1467_p8 }
  0x54   :  { %p1470_p11 = pnand %p1469_p10, %p1463_p7 }
  0x56   :  { %1473 = shalt.err (!%p1470_p11)
}
  0x57   :  { %55 = dma.hbm_to_vmem [thread:$0]  %s1823_s2, 2048, %s50_s29, [#allocation6], %s1579_s28, %s1579_s28, %s1580_s9  }
  0x58   :  { %s1583_s27 = smov [#allocation10]   ;;  %s1584_s1 = smov [#allocation13]  }
  0x59   :  { %s74_s30 = sshll.u32 %s1583_s27, 4  ;;  %s94_s10 = sshll.u32 %s1584_s1, 4  ;;  %s75_s30 = int_to_ptr.vmem [resolvable:$true] %s74_s30  ;;  %s95_s10 = int_to_ptr.vmem [resolvable:$true] %s94_s10 }
  0x5a   :  { %s1474_s13 = scalar_lea.hbm %s1825_s4, 32 }
  0x5b   :  { %p1475_p12 = scmp.ne.s32.totalorder %s1825_s4, %s1474_s13  ;;  %p1478_p13 = scmp.lt.u32.totalorder %s1474_s13, %s1825_s4 }
  0x5d   :  { %p1480_p0 = pnand %p1478_p13, %p1475_p12 }
  0x5f   :  { %1483 = shalt.err (!%p1480_p0)
}
  0x60   :  { %s1484_s2 = scalar_lea.vmem %s75_s30, 32  ;;  %p1489_p2 = scmp.lt.s32.totalorder %s75_s30, %s75_s30 }
  0x61   :  { %p1485_p1 = scmp.ne.s32.totalorder %s75_s30, %s1484_s2  ;;  %p1490_p3 = scmp.lt.s32.totalorder %s1484_s2, %s1484_s2 }
  0x63   :  { %p1491_p4 = por %p1490_p3, %p1489_p2 }
  0x65   :  { %p1492_p5 = pnand %p1491_p4, %p1485_p1 }
  0x67   :  { %1495 = shalt.err (!%p1492_p5)
}
  0x68   :  { %77 = dma.hbm_to_vmem [thread:$0]  %s1825_s4, 32, %s75_s30, [#allocation9]  }
  0x69   :  { %s1496_s19 = scalar_lea.hbm %s1827_s6, 16 }
  0x6a   :  { %p1497_p6 = scmp.ne.s32.totalorder %s1827_s6, %s1496_s19  ;;  %p1500_p7 = scmp.lt.u32.totalorder %s1496_s19, %s1827_s6 }
  0x6c   :  { %p1502_p8 = pnand %p1500_p7, %p1497_p6 }
  0x6e   :  { %1505 = shalt.err (!%p1502_p8)
}
  0x6f   :  { %s1506_s20 = scalar_lea.vmem %s95_s10, 16  ;;  %s1510_s25 = scalar_lea.vmem %s95_s10, 32 }
  0x70   :  { %p1507_p9 = scmp.ne.s32.totalorder %s95_s10, %s1506_s20  ;;  %p1511_p10 = scmp.lt.s32.totalorder %s95_s10, %s95_s10 }
  0x71   :  { %p1512_p11 = scmp.lt.s32.totalorder %s1510_s25, %s1506_s20 }
  0x73   :  { %p1513_p12 = por %p1512_p11, %p1511_p10 }
  0x75   :  { %p1514_p13 = pnand %p1513_p12, %p1507_p9 }
  0x77   :  { %1517 = shalt.err (!%p1514_p13)
}
  0x78   :  { %97 = dma.hbm_to_vmem [thread:$0]  %s1827_s6, 16, %s95_s10, [#allocation12]  }
  0x79   :  { %1562 = dma.done.wait [#allocation3], 256  }
  0x7a   :  { %1563 = vsyncadd [#allocation3], 4294967040 }
  0x7b   :  { %1564 = dma.done.wait [#allocation6], 5120  }
  0x7c   :  { %1565 = vsyncadd [#allocation6], 4294962176 }
  0x7d   :  { %1566 = dma.done.wait [#allocation9], 2080  }
  0x7e   :  { %1567 = vsyncadd [#allocation9], 4294965216 }
  0x7f   :  { %1568 = dma.done.wait [#allocation12], 32  }
  0x80   :  { %1569 = vsyncadd [#allocation12], 4294967264  ;;  %v1585_v0 = vmov 0.0|0.0   ;;  %vm1586_vm0 = vmmov 0   ;;  %v1587_v1 = vmov 0.0   ;;  %v131_v2 = vld [vmem:[#allocation8] sm:$0xff]  ;;  %v160_v21 = vlaneseq }
  0x81   :  { %1249 = vmatprep.subr.bf16.mxu0 %v1585_v0  ;;  %1273 = vmatprep.subr.bf16.mxu1 %v1585_v0  ;;  %v132_v3 = vld [vmem:[#allocation8 + $0x8] sm:$0xff]  ;;  %v133_v4 = vld [vmem:[#allocation8 + $0x10] sm:$0xff]  ;;  %v134_v6 = vld [vmem:[#allocation8 + $0x18] sm:$0xff]  ;;  %v1588_v27 = vmov 1966171168   ;;  %vm828_vm7 = vcmask 1040384  }
  0x82   :  { %1116 = vmatprep.mubr.msk.f32.mxu0 %vm1586_vm0, %v1587_v1  ;;  %1151 = vmatprep.mubr.msk.f32.mxu1 %vm1586_vm0, %v1587_v1  ;;  %v1250_v5 = vpack.c.bf16 %v132_v3, %v131_v2  ;;  %v1253_v7 = vpack.c.bf16 %v134_v6, %v133_v4  ;;  %v135_v8 = vld [vmem:[#allocation8 + $0x20] sm:$0xff]  ;;  %v136_v9 = vld [vmem:[#allocation8 + $0x28] sm:$0xff]  ;;  %v137_v11 = vld [vmem:[#allocation8 + $0x30] sm:$0xff]  ;;  %v158_v28 = vunpack.c.l.s4 %v1588_v27  ;;  %v1751_v29 = vshrl.u32 %v160_v21, 7  ;;  %s1589_s6 = smov [#allocation14]  }
  0x83   :  { %v128_v10 = vld [vmem:[#allocation10] sm:$0x3]  ;;  %v1256_v13 = vpack.c.bf16 %v136_v9, %v135_v8  ;;  %v138_v14 = vld [vmem:[#allocation8 + $0x38] sm:$0xff]  ;;  %v140_v19 = vld [vmem:[#allocation8 + $0x48] sm:$0xff]  ;;  %s922_s26 = sshll.u32 %s1589_s6, 4  ;;  %s923_s26 = int_to_ptr.vmem [resolvable:$true] %s922_s26 }
  0x84   :  { %1251 = vmatpush3.bf16.msra.mxu0 %v1250_v5  ;;  %1275 = vmatpush3.bf16.msra.mxu1 %v1250_v5  ;;  %v1740_v12 = vmul.f32 0.001953125, %v128_v10  ;;  %v1259_v17 = vpack.c.bf16 %v138_v14, %v137_v11  ;;  %v139_v18 = vld [vmem:[#allocation8 + $0x40] sm:$0xff]  ;;  %v141_v24 = vld [vmem:[#allocation8 + $0x50] sm:$0xff]  ;;  %v142_v25 = vld [vmem:[#allocation8 + $0x58] sm:$0xff]  ;;  %v159_v33 = vunpack.c.0.s8 %v158_v28  ;;  %v318_v5 = vsub.s32 0, %v1751_v29  ;;  %s1518_s27 = scalar_lea.vmem %s923_s26, 256  ;;  %p1523_p1 = scmp.lt.s32.totalorder %s923_s26, %s923_s26 }
  0x85   :  { %1252 = vmatprep.subr.bf16.mxu0 %v1585_v0  ;;  %1276 = vmatprep.subr.bf16.mxu1 %v1585_v0  ;;  %v1262_v23 = vpack.c.bf16 %v140_v19, %v139_v18  ;;  %v143_v30 = vld [vmem:[#allocation8 + $0x60] sm:$0xff]  ;;  %v144_v31 = vld [vmem:[#allocation8 + $0x68] sm:$0xff]  ;;  %v1265_v32 = vpack.c.bf16 %v142_v25, %v141_v24  ;;  %v145_v34 = vld [vmem:[#allocation8 + $0x70] sm:$0xff]  ;;  %vm643_vm1 = vcmp.lt.s32.totalorder %v1751_v29, 1  ;;  %vm765_vm2 = vcmp.lt.s32.totalorder %v1751_v29, 7  ;;  %p1519_p0 = scmp.ne.s32.totalorder %s923_s26, %s1518_s27  ;;  %p1524_p2 = scmp.lt.s32.totalorder %s1518_s27, %s1518_s27 }
  0x86   :  { %v148_v15 = vmul.f32 %v1740_v12, %v1740_v12  ;;  %v146_v35 = vld [vmem:[#allocation8 + $0x78] sm:$0xff]  ;;  %v1268_v36 = vpack.c.bf16 %v144_v31, %v143_v30  ;;  %v162_v37 = vsub.s32 %v159_v33, %v1751_v29  ;;  %v1338_v40 = vld [vmem:[#allocation5] sm:$0xff]   ;;  %v1340_v47 = vld [vmem:[#allocation5 + $0x8] sm:$0xff]  }
  0x87   :  { %v1271_v38 = vpack.c.bf16 %v146_v35, %v145_v34  ;;  %v1339_v41 = vld [vmem:[#allocation5 + $0x80] sm:$0xff]   ;;  %v1341_v51 = vld [vmem:[#allocation5 + $0x88] sm:$0xff]   ;;  %v1342_v52 = vld [vmem:[#allocation5 + $0x10] sm:$0xff]   ;;  %p1525_p3 = por %p1524_p2, %p1523_p1 }
  0x88   :  { %1254 = vmatpush3.bf16.msra.mxu0 %v1253_v7  ;;  %1278 = vmatpush3.bf16.msra.mxu1 %v1253_v7  ;;  %v150_v16 = vrot.slane %v148_v15, 7  ;;  %v129_v44 = vld [vmem:[#allocation11] sm:$0x1]  ;;  %v130_v48 = vld [vmem:[#allocation13] sm:$0x1]  ;;  %v1343_v53 = vld [vmem:[#allocation5 + $0x90] sm:$0xff]  }
  0x89   :  { %1255 = vmatprep.subr.bf16.mxu0 %v1585_v0  ;;  %1279 = vmatprep.subr.bf16.mxu1 %v1585_v0  ;;  %v1344_v54 = vld [vmem:[#allocation5 + $0x18] sm:$0xff]   ;;  %v1346_v56 = vld [vmem:[#allocation5 + $0x20] sm:$0xff]   ;;  %v1348_v58 = vld [vmem:[#allocation5 + $0x28] sm:$0xff]   ;;  %p1526_p4 = pnand %p1525_p3, %p1519_p0 }
  0x8a   :  { %v152_v20 = vsub.f32 %v1740_v12, %v150_v16  ;;  %v1345_v55 = vld [vmem:[#allocation5 + $0x98] sm:$0xff]   ;;  %v1347_v57 = vld [vmem:[#allocation5 + $0xa0] sm:$0xff]   ;;  %v1349_v59 = vld [vmem:[#allocation5 + $0xa8] sm:$0xff]  }
  0x8b   :  { %v1350_v60 = vld [vmem:[#allocation5 + $0x30] sm:$0xff]   ;;  %v1352_v62 = vld [vmem:[#allocation5 + $0x38] sm:$0xff]   ;;  %v1354_v2 = vld [vmem:[#allocation5 + $0x40] sm:$0xff]  }
  0x8c   :  { %1257 = vmatpush3.bf16.msra.mxu0 %v1256_v13  ;;  %1281 = vmatpush3.bf16.msra.mxu1 %v1256_v13  ;;  %v153_v22 = vmax.f32 %v152_v20, 0.0  ;;  %v1351_v61 = vld [vmem:[#allocation5 + $0xb0] sm:$0xff]   ;;  %v1353_v63 = vld [vmem:[#allocation5 + $0xb8] sm:$0xff]   ;;  %v1355_v31 = vld [vmem:[#allocation5 + $0x48] sm:$0xff]  }
  0x8d   :  { %1258 = vmatprep.subr.bf16.mxu0 %v1585_v0  ;;  %1282 = vmatprep.subr.bf16.mxu1 %v1585_v0  ;;  %v1001_v3 = vld [vmem:[#allocation2 + $0x8] sm:$0xff]   ;;  %v984_v4 = vld [vmem:[#allocation2] sm:$0xff]   ;;  %v1358_v34 = vld [vmem:[#allocation5 + $0x60] sm:$0xff]  }
  0x8e   :  { %v154_v26 = vadd.f32 1e-05, %v153_v22  ;;  %v989_v6 = vunpack.c.l.bf16 %v1001_v3  ;;  %v990_v7 = vunpack.c.h.bf16 %v1001_v3  ;;  %v985_v8 = vunpack.c.l.bf16 %v984_v4  ;;  %v1357_v33 = vld [vmem:[#allocation5 + $0x58] sm:$0xff]   ;;  %v1359_v35 = vld [vmem:[#allocation5 + $0x68] sm:$0xff]  }
  0x8f   :  { %v986_v9 = vunpack.c.h.bf16 %v984_v4 }
  0x90   :  { %1260 = vmatpush3.bf16.msra.mxu0 %v1259_v17  ;;  %1284 = vmatpush3.bf16.msra.mxu1 %v1259_v17  ;;  %1362 = vrsqrt.f32 %v154_v26 }
  0x91   :  { %1261 = vmatprep.subr.bf16.mxu0 %v1585_v0  ;;  %1285 = vmatprep.subr.bf16.mxu1 %v1585_v0 }
  0x94   :  { %1263 = vmatpush3.bf16.msra.mxu0 %v1262_v23  ;;  %1287 = vmatpush3.bf16.msra.mxu1 %v1262_v23 }
  0x95   :  { %1264 = vmatprep.subr.bf16.mxu0 %v1585_v0  ;;  %1288 = vmatprep.subr.bf16.mxu1 %v1585_v0 }
  0x98   :  { %1266 = vmatpush3.bf16.msra.mxu0 %v1265_v32  ;;  %1290 = vmatpush3.bf16.msra.mxu1 %v1265_v32  ;;  %v1356_v32 = vld [vmem:[#allocation5 + $0x50] sm:$0xff]  }
  0x99   :  { %1267 = vmatprep.subr.bf16.mxu0 %v1585_v0  ;;  %1291 = vmatprep.subr.bf16.mxu1 %v1585_v0 }
  0x9a   :  { %v1363_v39 = vpop.eup %1362 }
  0x9b   :  { %v163_v42 = vrot.slane %v1363_v39, %v162_v37 }
  0x9c   :  { %1269 = vmatpush3.bf16.msra.mxu0 %v1268_v36  ;;  %1293 = vmatpush3.bf16.msra.mxu1 %v1268_v36  ;;  %v1360_v36 = vld [vmem:[#allocation5 + $0x70] sm:$0xff]  }
  0x9d   :  { %1270 = vmatprep.subr.bf16.mxu0 %v1585_v0  ;;  %1294 = vmatprep.subr.bf16.mxu1 %v1585_v0  ;;  %v164_v43 = vcombine.high %v163_v42, %v163_v42 }
  0x9f   :  { %v171_v45 = vrot.slane %v164_v43, %v162_v37  ;;  %v1361_v37 = vld [vmem:[#allocation5 + $0x78] sm:$0xff]   ;;  %v834_v43 = vld [vmem:[#allocation7 + $0x20] sm:$0xff] }
  0xa0   :  { %1272 = vmatpush3.bf16.msra.mxu0 %v1271_v38  ;;  %1296 = vmatpush3.bf16.msra.mxu1 %v1271_v38  ;;  %v831_v38 = vld [vmem:[#allocation7 + $0x8] sm:$0xff] }
  0xa1   :  { %1154 = vmatprep.subr.bf16.mxu0 %v1338_v40  ;;  %1174 = vmatprep.subr.bf16.mxu1 %v1339_v41  ;;  %v173_v46 = vmul.f32 %v171_v45, %v129_v44  ;;  %v835_v44 = vld [vmem:[#allocation7 + $0x28] sm:$0xff] }
  0xa2   :  { %v1304_v45 = vpack.c.bf16 %v835_v44, %v834_v43 }
  0xa3   :  { %1117 = vmatmul.mubr.f32.vlgmr.msra.gmra.mrb[0].mxu0 %v173_v46  ;;  %v174_v49 = vmul.f32 %v173_v46, %v1740_v12  ;;  %v836_v46 = vld [vmem:[#allocation7 + $0x30] sm:$0xff] }
  0xa4   :  { %1155 = vmatpush3.bf16.msra.mxu0 %v1338_v40  ;;  %v832_v40 = vld [vmem:[#allocation7 + $0x10] sm:$0xff] }
  0xa5   :  { %v175_v50 = vsub.f32 %v130_v48, %v174_v49  ;;  %1156 = vmatprep.subr.bf16.mxu0 %v1340_v47  ;;  %v838_v49 = vld [vmem:[#allocation7 + $0x40] sm:$0xff] }
  0xa7   :  { %1152 = vmatmul.mubr.f32.vlgmr.msra.gmra.mrb[0].mxu1 %v175_v50  ;;  %v839_v50 = vld [vmem:[#allocation7 + $0x48] sm:$0xff] }
  0xa8   :  { %1175 = vmatpush3.bf16.msra.mxu1 %v1339_v41  ;;  %1157 = vmatpush3.bf16.msra.mxu0 %v1340_v47  ;;  %v833_v41 = vld [vmem:[#allocation7 + $0x18] sm:$0xff] }
  0xa9   :  { %1176 = vmatprep.subr.bf16.mxu1 %v1341_v51  ;;  %1158 = vmatprep.subr.bf16.mxu0 %v1342_v52  ;;  %v1301_v42 = vpack.c.bf16 %v833_v41, %v832_v40  ;;  %v837_v47 = vld [vmem:[#allocation7 + $0x38] sm:$0xff] }
  0xaa   :  { %v1307_v48 = vpack.c.bf16 %v837_v47, %v836_v46 }
  0xac   :  { %1177 = vmatpush3.bf16.msra.mxu1 %v1341_v51  ;;  %1159 = vmatpush3.bf16.msra.mxu0 %v1342_v52  ;;  %v1310_v51 = vpack.c.bf16 %v839_v50, %v838_v49  ;;  %v840_v52 = vld [vmem:[#allocation7 + $0x50] sm:$0xff] }
  0xad   :  { %1178 = vmatprep.subr.bf16.mxu1 %v1343_v53  ;;  %1160 = vmatprep.subr.bf16.mxu0 %v1344_v54 }
  0xb0   :  { %1179 = vmatpush3.bf16.msra.mxu1 %v1343_v53  ;;  %1161 = vmatpush3.bf16.msra.mxu0 %v1344_v54  ;;  %v841_v53 = vld [vmem:[#allocation7 + $0x58] sm:$0xff] }
  0xb1   :  { %1180 = vmatprep.subr.bf16.mxu1 %v1345_v55  ;;  %1162 = vmatprep.subr.bf16.mxu0 %v1346_v56  ;;  %v1313_v54 = vpack.c.bf16 %v841_v53, %v840_v52 }
  0xb4   :  { %1181 = vmatpush3.bf16.msra.mxu1 %v1345_v55  ;;  %1163 = vmatpush3.bf16.msra.mxu0 %v1346_v56  ;;  %v842_v55 = vld [vmem:[#allocation7 + $0x60] sm:$0xff]  ;;  %v843_v56 = vld [vmem:[#allocation7 + $0x68] sm:$0xff] }
  0xb5   :  { %1182 = vmatprep.subr.bf16.mxu1 %v1347_v57  ;;  %1164 = vmatprep.subr.bf16.mxu0 %v1348_v58 }
  0xb8   :  { %1183 = vmatpush3.bf16.msra.mxu1 %v1347_v57  ;;  %1165 = vmatpush3.bf16.msra.mxu0 %v1348_v58  ;;  %v1316_v57 = vpack.c.bf16 %v843_v56, %v842_v55  ;;  %v844_v58 = vld [vmem:[#allocation7 + $0x70] sm:$0xff] }
  0xb9   :  { %1184 = vmatprep.subr.bf16.mxu1 %v1349_v59  ;;  %1166 = vmatprep.subr.bf16.mxu0 %v1350_v60 }
  0xbc   :  { %1185 = vmatpush3.bf16.msra.mxu1 %v1349_v59  ;;  %1167 = vmatpush3.bf16.msra.mxu0 %v1350_v60  ;;  %v845_v59 = vld [vmem:[#allocation7 + $0x78] sm:$0xff] }
  0xbd   :  { %1186 = vmatprep.subr.bf16.mxu1 %v1351_v61  ;;  %1168 = vmatprep.subr.bf16.mxu0 %v1352_v62  ;;  %v1319_v60 = vpack.c.bf16 %v845_v59, %v844_v58 }
  0xc0   :  { %1187 = vmatpush3.bf16.msra.mxu1 %v1351_v61  ;;  %1169 = vmatpush3.bf16.msra.mxu0 %v1352_v62 }
  0xc1   :  { %1188 = vmatprep.subr.bf16.mxu1 %v1353_v63  ;;  %1194 = vmatprep.subr.bf16.mxu0 %v1354_v2 }
  0xc4   :  { %1189 = vmatpush3.bf16.msra.mxu1 %v1353_v63 }
  0xc5   :  { %1297 = vmatprep.subr.bf16.mxu1 %v1585_v0 }
 0x176   :  { %v242_v10 = vpop.f32.mrb[0].mxu0 }
 0x177   :  { %v319_v11 = vrot.slane %v242_v10, %v318_v5  ;;  %v1118_v12 = vpop.f32.mrb[1].mxu0 }
 0x179   :  { %v322_v13 = vmul.f32 %v989_v6, %v319_v11  ;;  %v323_v14 = vmul.f32 %v990_v7, %v319_v11  ;;  %v320_v15 = vmul.f32 %v985_v8, %v319_v11  ;;  %v321_v16 = vmul.f32 %v986_v9, %v319_v11 }
 0x17a   :  { %v312_v17 = vpop.f32.mrb[0].mxu1 }
 0x17b   :  { %v327_v18 = vrot.slane %v312_v17, %v318_v5  ;;  %v1153_v19 = vpop.f32.mrb[1].mxu1 }
 0x17d   :  { %v330_v20 = vadd.f32 %v327_v18, %v322_v13  ;;  %v331_v21 = vadd.f32 %v327_v18, %v323_v14  ;;  %v328_v22 = vadd.f32 %v327_v18, %v320_v15  ;;  %v329_v23 = vadd.f32 %v327_v18, %v321_v16 }
 0x17f   :  { %v334_v24 = vmax.f32 %v330_v20, 0.0  ;;  %v335_v25 = vmax.f32 %v331_v21, 0.0  ;;  %v332_v26 = vmax.f32 %v328_v22, 0.0  ;;  %v333_v27 = vmax.f32 %v329_v23, 0.0 }
 0x180   :  { %v585_v22 = vadd.s32 16, %v1751_v29 }
 0x181   :  { %v336_v28 = vpack.c.bf16 %v333_v27, %v332_v26  ;;  %v337_v30 = vpack.c.bf16 %v335_v25, %v334_v24  ;;  %v586_v24 = vadd.s32 24, %v1751_v29  ;;  %v591_v25 = vand.u32 15, %v1751_v29 }
 0x182   :  { %v605_v23 = vand.u32 15, %v585_v22  ;;  %v584_v26 = vadd.s32 8, %v1751_v29 }
 0x183   :  { %1170 = vmatprep.mubr.bf16.mxu0 %v336_v28  ;;  %1190 = vmatprep.mubr.bf16.mxu1 %v336_v28  ;;  %v612_v27 = vand.u32 15, %v586_v24  ;;  %vm635_vm4 = vcmp.ne.s32.totalorder %v591_v25, 0 }
 0x184   :  { %1171 = vmatmul.mubr.bf16.vlgmr.msra.gmra.mrb[4].mxu0 %v337_v30  ;;  %1191 = vmatmul.mubr.bf16.vlgmr.msra.gmra.mrb[4].mxu1 %v337_v30  ;;  %vm637_vm3 = vcmp.ne.s32.totalorder %v605_v23, 0 }
 0x185   :  { %1195 = vmatpush3.bf16.msra.mxu0 %v1354_v2  ;;  %1210 = vmatprep.mubr.bf16.mxu0 %v336_v28  ;;  %v598_v28 = vand.u32 15, %v584_v26  ;;  %vm760_vm5 = vcmp.ne.s32.totalorder %v612_v27, 15 }
 0x186   :  { %1196 = vmatprep.subr.bf16.mxu0 %v1355_v31  ;;  %1246 = vmatprep.mubr.msk.f32.mxu1 %vm1586_vm0, %v1587_v1  ;;  %v830_v1 = vld [vmem:[#allocation7] sm:$0xff] }
 0x187   :  { %v1298_v39 = vpack.c.bf16 %v831_v38, %v830_v1  ;;  %vm758_vm6 = vcmp.ne.s32.totalorder %v598_v28, 15 }
 0x189   :  { %1197 = vmatpush3.bf16.msra.mxu0 %v1355_v31  ;;  %1299 = vmatpush3.bf16.msra.mxu1 %v1298_v39 }
 0x18a   :  { %1198 = vmatprep.subr.bf16.mxu0 %v1356_v32  ;;  %1300 = vmatprep.subr.bf16.mxu1 %v1585_v0 }
 0x18d   :  { %1199 = vmatpush3.bf16.msra.mxu0 %v1356_v32  ;;  %1302 = vmatpush3.bf16.msra.mxu1 %v1301_v42 }
 0x18e   :  { %1200 = vmatprep.subr.bf16.mxu0 %v1357_v33  ;;  %1303 = vmatprep.subr.bf16.mxu1 %v1585_v0 }
 0x191   :  { %1201 = vmatpush3.bf16.msra.mxu0 %v1357_v33  ;;  %1305 = vmatpush3.bf16.msra.mxu1 %v1304_v45 }
 0x192   :  { %1202 = vmatprep.subr.bf16.mxu0 %v1358_v34  ;;  %1306 = vmatprep.subr.bf16.mxu1 %v1585_v0 }
 0x195   :  { %1203 = vmatpush3.bf16.msra.mxu0 %v1358_v34  ;;  %1308 = vmatpush3.bf16.msra.mxu1 %v1307_v48 }
 0x196   :  { %1204 = vmatprep.subr.bf16.mxu0 %v1359_v35  ;;  %1309 = vmatprep.subr.bf16.mxu1 %v1585_v0 }
 0x199   :  { %1205 = vmatpush3.bf16.msra.mxu0 %v1359_v35  ;;  %1311 = vmatpush3.bf16.msra.mxu1 %v1310_v51 }
 0x19a   :  { %1206 = vmatprep.subr.bf16.mxu0 %v1360_v36  ;;  %1312 = vmatprep.subr.bf16.mxu1 %v1585_v0 }
 0x19d   :  { %1207 = vmatpush3.bf16.msra.mxu0 %v1360_v36  ;;  %1314 = vmatpush3.bf16.msra.mxu1 %v1313_v54 }
 0x19e   :  { %1208 = vmatprep.subr.bf16.mxu0 %v1361_v37  ;;  %1315 = vmatprep.subr.bf16.mxu1 %v1585_v0 }
 0x1a1   :  { %1209 = vmatpush3.bf16.msra.mxu0 %v1361_v37  ;;  %1317 = vmatpush3.bf16.msra.mxu1 %v1316_v57 }
 0x1a2   :  { %1318 = vmatprep.subr.bf16.mxu1 %v1585_v0 }
 0x1a4   :  { %1211 = vmatmul.mubr.bf16.vlgmr.msra.gmra.mrb[8].mxu0 %v337_v30 }
 0x1a5   :  { %1320 = vmatpush3.bf16.msra.mxu1 %v1319_v60 }
 0x257   :  { %v1172_v61 = vpop.f32.mrb[4].mxu0  ;;  %v1192_v62 = vpop.f32.mrb[4].mxu1 }
 0x258   :  { %v436_v63 = vpop.f32.mrb[5].mxu0  ;;  %v567_v2 = vpop.f32.mrb[5].mxu1  ;;  %v641_v7 = vrot.slane %v1172_v61, 7  ;;  %v763_v8 = vrot.slane %v1192_v62, 1 }
 0x259   :  { %v639_v3 = vrot.slane %v436_v63, 7  ;;  %v761_v4 = vrot.slane %v567_v2, 1  ;;  %v1173_v5 = vpop.f32.mrb[6].mxu0  ;;  %v1193_v6 = vpop.f32.mrb[6].mxu1 }
 0x25a   :  { %v642_v9 = vrot.slane %v1173_v5, 7  ;;  %v764_v10 = vrot.slane %v1193_v6, 1  ;;  %v439_v11 = vpop.f32.mrb[7].mxu0  ;;  %v570_v12 = vpop.f32.mrb[7].mxu1 }
 0x25b   :  { %v640_v0 = vrot.slane %v439_v11, 7  ;;  %v762_v13 = vrot.slane %v570_v12, 1 }
 0x25c   :  { %v766_v14 = vsel %vm765_vm2, %v763_v8, %v764_v10  ;;  %v647_v15 = vsel %vm643_vm1, %v642_v9, %v639_v3  ;;  %v644_v16 = vsel %vm643_vm1, %v641_v7, %v642_v9  ;;  %v769_v17 = vsel %vm765_vm2, %v764_v10, %v761_v4 }
 0x25d   :  { %v645_v18 = vsel %vm643_vm1, %v640_v0, %v641_v7  ;;  %v768_v19 = vsel %vm765_vm2, %v761_v4, %v762_v13  ;;  %v646_v20 = vsel %vm643_vm1, %v639_v3, %v640_v0  ;;  %v767_v21 = vsel %vm765_vm2, %v762_v13, %v763_v8 }
 0x25e   :  { %v658_v30 = vsel %vm637_vm3, %v645_v18, 0.0  ;;  %v656_v33 = vsel %vm635_vm4, %v647_v15, 0.0  ;;  %v781_v40 = vsel %vm760_vm5, %v769_v17, 0.0  ;;  %v779_v42 = vsel %vm758_vm6, %v767_v21, 0.0 }
 0x277   :  { %v1212_v31 = vpop.f32.mrb[8].mxu0 }
 0x278   :  { %v751_v32 = vadd.f32 %v1212_v31, %v658_v30  ;;  %v742_v34 = vpop.f32.mrb[9].mxu0 }
 0x279   :  { %v743_v35 = vadd.f32 %v742_v34, %v656_v33  ;;  %v1213_v36 = vpop.f32.mrb[10].mxu0 }
 0x27a   :  { %v784_v37 = vadd.f32 %v766_v14, %v751_v32  ;;  %v754_v1 = vadd.f32 %v1213_v36, %v644_v16  ;;  %v745_v38 = vpop.f32.mrb[11].mxu0 }
 0x27b   :  { %v782_v39 = vadd.f32 %v768_v19, %v743_v35  ;;  %v746_v41 = vadd.f32 %v745_v38, %v646_v20 }
 0x27c   :  { %v785_v29 = vadd.f32 %v781_v40, %v754_v1  ;;  %v817_v49 = vmul.f32 %v784_v37, %v784_v37 }
 0x27d   :  { %v783_v43 = vadd.f32 %v779_v42, %v746_v41  ;;  %v815_v45 = vmul.f32 %v782_v39, %v782_v39 }
 0x27e   :  { %v999_v44 = vpack.c.bf16 %v785_v29, %v784_v37  ;;  %v818_v52 = vmul.f32 %v785_v29, %v785_v29 }
 0x27f   :  { %v806_v46 = vadd.f32 %v783_v43, %v782_v39  ;;  %v816_v47 = vmul.f32 %v783_v43, %v783_v43  ;;  %v994_v48 = vpack.c.bf16 %v783_v43, %v782_v39 }
 0x280   :  { %1002 = vst [vmem:[#allocation14 + $0x8] sm:$0xff] %v999_v44  }
 0x281   :  { %v807_v50 = vadd.f32 %v806_v46, %v784_v37  ;;  %v819_v51 = vadd.f32 %v816_v47, %v815_v45  ;;  %995 = vst [vmem:[#allocation14] sm:$0xff] %v994_v48  }
 0x283   :  { %v808_v53 = vadd.f32 %v807_v50, %v785_v29  ;;  %v820_v54 = vadd.f32 %v819_v51, %v817_v49 }
 0x285   :  { %v809_v55 = vrot.slane %v808_v53, 4  ;;  %v821_v56 = vadd.f32 %v820_v54, %v818_v52 }
 0x287   :  { %v810_v57 = vadd.f32 %v809_v55, %v808_v53  ;;  %v822_v58 = vrot.slane %v821_v56, 4 }
 0x289   :  { %v811_v59 = vrot.slane %v810_v57, 2  ;;  %v823_v60 = vadd.f32 %v822_v58, %v821_v56 }
 0x28b   :  { %v812_v61 = vadd.f32 %v811_v59, %v810_v57  ;;  %v824_v62 = vrot.slane %v823_v60, 2 }
 0x28d   :  { %v813_v63 = vrot.slane %v812_v61, 1  ;;  %v825_v2 = vadd.f32 %v824_v62, %v823_v60 }
 0x28f   :  { %v826_v3 = vrot.slane %v825_v2, 1  ;;  %v814_v4 = vadd.f32 %v813_v63, %v812_v61 }
 0x291   :  { %v827_v5 = vadd.f32 %v826_v3, %v825_v2 }
 0x293   :  { %v829_v6 = vsel %vm828_vm7, %v814_v4, %v827_v5 }
 0x294   :  { %1247 = vmatmul.mubr.f32.vlgmr.msra.gmra.mrb[2].mxu1 %v829_v6 }
 0x295   :  { %1529 = shalt.err (!%p1526_p4)
}
 0x296   :  { %s1530_s10 = scalar_lea.hbm %s1828_s7, 256 }
 0x297   :  { %p1531_p5 = scmp.ne.s32.totalorder %s1828_s7, %s1530_s10  ;;  %p1534_p6 = scmp.lt.u32.totalorder %s1530_s10, %s1828_s7 }
 0x299   :  { %p1536_p7 = pnand %p1534_p6, %p1531_p5 }
 0x29b   :  { %1539 = shalt.err (!%p1536_p7)
}
 0x29c   :  { %928 = dma.vmem_to_hbm [thread:$0]  %s923_s26, 256, %s1828_s7, [#allocation4], %s1575_s15, %s1575_s15, %s1576_s16  }
 0x29d   :  { %s1590_s17 = smov [#allocation15]  }
 0x29e   :  { %s935_s2 = sshll.u32 %s1590_s17, 4  ;;  %s936_s2 = int_to_ptr.vmem [resolvable:$true] %s935_s2 }
 0x29f   :  { %s1540_s28 = scalar_lea.vmem %s936_s2, 32  ;;  %p1545_p9 = scmp.lt.s32.totalorder %s936_s2, %s936_s2 }
 0x2a0   :  { %p1541_p8 = scmp.ne.s32.totalorder %s936_s2, %s1540_s28  ;;  %p1546_p10 = scmp.lt.s32.totalorder %s1540_s28, %s1540_s28 }
 0x2a2   :  { %p1547_p11 = por %p1546_p10, %p1545_p9 }
 0x2a4   :  { %p1548_p12 = pnand %p1547_p11, %p1541_p8 }
 0x367   :  { %v912_v7 = vpop.f32.mrb[2].mxu1 }
 0x368   :  { %916 = vst [vmem:[#allocation15] sm:$0x3] %v912_v7  ;;  %v1248_v8 = vpop.f32.mrb[3].mxu1 }
 0x369   :  { %1551 = shalt.err (!%p1548_p12)
}
 0x36a   :  { %s1552_s18 = scalar_lea.hbm %s1829_s8, 32 }
 0x36b   :  { %p1553_p13 = scmp.ne.s32.totalorder %s1829_s8, %s1552_s18  ;;  %p1556_p0 = scmp.lt.u32.totalorder %s1552_s18, %s1829_s8 }
 0x36d   :  { %p1558_p1 = pnand %p1556_p0, %p1553_p13 }
 0x36f   :  { %1561 = shalt.err (!%p1558_p1)
}
 0x370   :  { %938 = dma.vmem_to_hbm [thread:$0]  %s936_s2, 32, %s1829_s8, [#allocation16]  }
 0x371   :  { %1570 = dma.done.wait [#allocation4], 256  }
 0x372   :  { %1571 = vsyncadd [#allocation4], 4294967040 }
 0x373   :  { %1572 = dma.done.wait [#allocation16], 32  }
 0x374   :  { %1573 = vsyncadd [#allocation16], 4294967264 }
 0x375   :  { %945 = vsyncpa [#allocation3], 1 }
 0x376   :  { %946 = vsyncpa [#allocation6], 1 }
 0x377   :  { %947 = vsyncpa [#allocation9], 1 }
 0x378   :  { %948 = vsyncpa [#allocation12], 1 }
 0x379   :  { %949 = vsyncpa [#allocation4], 1 }
 0x37a   :  { %950 = vsyncpa [#allocation16], 1 }

// kernel: double_conv.5
= control target key start
LH: loop header
LB: loop body
LE: loop exit
PB: predicated region body
PF: predicated region fallthrough
CT: control target
= control target key end

     0   :  { %11 = vsyncpa [#allocation3], 0  ;;  %s3116_s0 = inlined_call_operand.hbm [shape: bf16[32,128], index: 0, kind: input, shape index: {}]   ;;  %s3117_s1 = inlined_call_operand.hbm [shape: f32[2,128], index: 1, kind: input, shape index: {}]   ;;  %s3118_s2 = inlined_call_operand.hbm [shape: f32[1,128], index: 2, kind: input, shape index: {}]   ;;  %s3119_s3 = inlined_call_operand.hbm [shape: f32[1,128], index: 3, kind: input, shape index: {}]   ;;  %s3120_s4 = inlined_call_operand.hbm [shape: f32[128,128], index: 4, kind: input, shape index: {}]   ;;  %s3121_s5 = inlined_call_operand.hbm [shape: f32[8,128,16], index: 5, kind: input, shape index: {}]   ;;  %s3122_s6 = inlined_call_operand.hbm [shape: f32[2,8,16,16], index: 6, kind: output, shape index: {}]  }
   0x1   :  { %13 = vsyncpa [#allocation3 + $0x1], 0 }
   0x2   :  { %14 = vsyncpa [#allocation6], 0 }
   0x3   :  { %15 = vsyncpa [#allocation9], 0 }
   0x4   :  { %16 = vsyncpa [#allocation12], 0 }
   0x5   :  { %17 = vsyncpa [#allocation4], 0 }
   0x6   :  { %19 = vsyncpa [#allocation4 + $0x1], 0  ;;  %s2725_s21 = smov 0   ;;  %s2727_s22 = smov 0  }
   0x7   :  { %s2729_s23 = smov 0   ;;  %s2731_s24 = smov 0  }
   0x8 LB: > { %s2673_s25 = smov [#allocation5]   ;;  %s2746_s27 = sadd.s32 4294967295, %s2671_s24   ;;  %s2671_s24 = sphi %s2731_s24, %s3147_s24   ;;  %s2667_s23 = sphi %s2729_s23, %s3146_s23   ;;  %s2663_s22 = sphi %s2727_s22, %s3145_s22   ;;  %s2659_s21 = sphi %s2725_s21, %s3144_s21  }
   0x9   : > { %s200_s26 = sshll.u32 %s2673_s25, 4  ;;  %p1439_p0 = scmp.ge.s32.totalorder %s2671_s24, 1  ;;  %s2751_s26 = int_to_ptr.vmem [resolvable:$true] %s200_s26 }
   0xa   : > { %p3123_p1 = scmp.eq.s32.totalorder %s2746_s27, 0  ;;  %p187_p2 = scmp.lt.s32.totalorder %s2671_s24, 3 }
   0xb   : > { %s2674_s29 = smov [#allocation8]   ;;  %s2675_s7 = smov [#allocation7]  }
   0xc   : > { %p2753_p3 = pnand %p1439_p0, %p187_p2  ;;  %s222_s30 = sshll.u32 %s2674_s29, 4  ;;  %s2760_s30 = int_to_ptr.vmem [resolvable:$true] %s222_s30 }
   0xd   : > { %s211_s8 = sshll.u32 %s2675_s7, 4  ;;  %s2676_s10 = smov [#allocation10]   ;;  %s2768_s8 = int_to_ptr.vmem [resolvable:$true] %s211_s8 }
   0xe   : > { %s3126_s28 = scalar_select %p2753_p3, 1, 0 }
   0xf   : > { %p2338_p5 = pneg %p2753_p3  ;;  %s2770_s11 = sshll.u32 %s2676_s10, 4  ;;  %s233_s11 = int_to_ptr.vmem [resolvable:$true] %s2770_s11 }
  0x10   : > { %s2423_s14 = scalar_lea.hbm %s3117_s1, 32 }
  0x11   : > { %p2764_p6 = pnand %p2338_p5, %p3123_p1  ;;  %p2424_p7 = scmp.ne.s32.totalorder %s3117_s1, %s2423_s14 }
  0x12   : > { %p2430_p11 = scmp.lt.u32.totalorder %s2423_s14, %s3117_s1 }
  0x13   : > { %p2780_p8 = pneg %p2764_p6 }
  0x15   : > { %p2426_p9 = pnand %p2780_p8, %p2424_p7 }
  0x17   : > { %p2427_p10 = pneg %p2426_p9 }
  0x19   : > { %p2432_p12 = pnand %p2430_p11, %p2427_p10 }
  0x1b   : > { %2435 = shalt.err (!%p2432_p12)
}
  0x1c   : > { %s2436_s20 = scalar_lea.vmem %s2751_s26, 32  ;;  %p2444_p5 = scmp.lt.s32.totalorder %s2751_s26, %s2751_s26 }
  0x1d   : > { %p2437_p13 = scmp.ne.s32.totalorder %s2751_s26, %s2436_s20  ;;  %p2445_p4 = scmp.lt.s32.totalorder %s2436_s20, %s2436_s20 }
  0x1f   : > { %p2439_p0 = pnand %p2437_p13, %p2780_p8  ;;  %p2446_p7 = por %p2445_p4, %p2444_p5 }
  0x21   : > { %p2440_p2 = pneg %p2439_p0 }
  0x23   : > { %p2447_p9 = pnand %p2446_p7, %p2440_p2 }
  0x25   : > { %2450 = shalt.err (!%p2447_p9)
}
  0x26   : > { %2341 = dma.hbm_to_vmem [thread:$0]  (!%p2764_p6), %s3117_s1, 32, %s2751_s26, [#allocation6]  }
  0x27   : > { %s2451_s12 = scalar_lea.hbm %s3119_s3, 16 }
  0x28   : > { %p2452_p10 = scmp.ne.s32.totalorder %s3119_s3, %s2451_s12  ;;  %p2458_p12 = scmp.lt.u32.totalorder %s2451_s12, %s3119_s3 }
  0x2a   : > { %p2454_p4 = pnand %p2452_p10, %p2780_p8 }
  0x2c   : > { %p2455_p11 = pneg %p2454_p4 }
  0x2e   : > { %p2460_p13 = pnand %p2458_p12, %p2455_p11 }
  0x30   : > { %2463 = shalt.err (!%p2460_p13)
}
  0x31   : > { %s2464_s26 = scalar_lea.vmem %s2760_s30, 16  ;;  %s2471_s18 = scalar_lea.vmem %s2760_s30, 32 }
  0x32   : > { %p2465_p0 = scmp.ne.s32.totalorder %s2760_s30, %s2464_s26  ;;  %p2472_p7 = scmp.lt.s32.totalorder %s2760_s30, %s2760_s30 }
  0x33   : > { %p2473_p9 = scmp.lt.s32.totalorder %s2471_s18, %s2464_s26 }
  0x34   : > { %p2467_p2 = pnand %p2465_p0, %p2780_p8 }
  0x35   : > { %p2474_p10 = por %p2473_p9, %p2472_p7 }
  0x36   : > { %p2468_p5 = pneg %p2467_p2 }
  0x38   : > { %p2475_p4 = pnand %p2474_p10, %p2468_p5 }
  0x3a   : > { %2478 = shalt.err (!%p2475_p4)
}
  0x3b   : > { %2347 = dma.hbm_to_vmem [thread:$0]  (!%p2764_p6), %s3119_s3, 16, %s2760_s30, [#allocation9]  }
  0x3c   : > { %s2479_s7 = scalar_lea.hbm %s3118_s2, 16 }
  0x3d   : > { %p2480_p11 = scmp.ne.s32.totalorder %s3118_s2, %s2479_s7  ;;  %p2486_p0 = scmp.lt.u32.totalorder %s2479_s7, %s3118_s2 }
  0x3f   : > { %p2482_p12 = pnand %p2480_p11, %p2780_p8 }
  0x41   : > { %p2483_p13 = pneg %p2482_p12 }
  0x43   : > { %p2488_p2 = pnand %p2486_p0, %p2483_p13 }
  0x45   : > { %2491 = shalt.err (!%p2488_p2)
}
  0x46   : > { %s2492_s30 = scalar_lea.vmem %s2768_s8, 16  ;;  %s2499_s15 = scalar_lea.vmem %s2768_s8, 32 }
  0x47   : > { %p2493_p5 = scmp.ne.s32.totalorder %s2768_s8, %s2492_s30  ;;  %p2500_p10 = scmp.lt.s32.totalorder %s2768_s8, %s2768_s8 }
  0x48   : > { %p2501_p4 = scmp.lt.s32.totalorder %s2499_s15, %s2492_s30 }
  0x49   : > { %p2495_p7 = pnand %p2493_p5, %p2780_p8 }
  0x4a   : > { %p2502_p11 = por %p2501_p4, %p2500_p10 }
  0x4b   : > { %p2496_p9 = pneg %p2495_p7 }
  0x4d   : > { %p2503_p12 = pnand %p2502_p11, %p2496_p9 }
  0x4f   : > { %2506 = shalt.err (!%p2503_p12)
}
  0x50   : > { %2344 = dma.hbm_to_vmem [thread:$0]  (!%p2764_p6), %s3118_s2, 16, %s2768_s8, [#allocation6]  }
  0x51   : > { %s2507_s20 = scalar_lea.hbm %s3120_s4, 2048 }
  0x52   : > { %p2508_p13 = scmp.ne.s32.totalorder %s3120_s4, %s2507_s20  ;;  %p2514_p5 = scmp.lt.u32.totalorder %s2507_s20, %s3120_s4 }
  0x54   : > { %p2510_p0 = pnand %p2508_p13, %p2780_p8 }
  0x56   : > { %p2511_p2 = pneg %p2510_p0 }
  0x58   : > { %p2516_p7 = pnand %p2514_p5, %p2511_p2 }
  0x5a   : > { %2519 = shalt.err (!%p2516_p7)
}
  0x5b   : > { %s2520_s12 = scalar_lea.vmem %s233_s11, 2048  ;;  %p2528_p11 = scmp.lt.s32.totalorder %s233_s11, %s233_s11 }
  0x5c   : > { %p2521_p9 = scmp.ne.s32.totalorder %s233_s11, %s2520_s12  ;;  %p2529_p12 = scmp.lt.s32.totalorder %s2520_s12, %s2520_s12 }
  0x5e   : > { %p2523_p10 = pnand %p2521_p9, %p2780_p8  ;;  %p2530_p1 = por %p2529_p12, %p2528_p11 }
  0x60   : > { %p2524_p4 = pneg %p2523_p10 }
  0x62   : > { %p2531_p3 = pnand %p2530_p1, %p2524_p4 }
  0x64   : > { %2534 = shalt.err (!%p2531_p3)
}
  0x65   : > { %s2677_s8 = smov 128   ;;  %s2678_s13 = smov 8  }
  0x66   : > { %2350 = dma.hbm_to_vmem [thread:$0]  (!%p2764_p6), %s3120_s4, 2048, %s233_s11, [#allocation9], %s2677_s8, %s2677_s8, %s2678_s13  }
  0x67   : > { %s2679_s15 = smov [#allocation11]   ;;  %s2535_s19 = scalar_lea.hbm %s3121_s5, 16384 }
  0x68   : > { %s245_s16 = sshll.u32 %s2679_s15, 4  ;;  %p2536_p1 = scmp.ne.s32.totalorder %s3121_s5, %s2535_s19  ;;  %s246_s16 = int_to_ptr.vmem [resolvable:$true] %s245_s16 }
  0x69   : > { %p2542_p0 = scmp.lt.u32.totalorder %s2535_s19, %s3121_s5 }
  0x6a   : > { %p2538_p3 = pnand %p2536_p1, %p2780_p8 }
  0x6c   : > { %p2539_p13 = pneg %p2538_p3 }
  0x6e   : > { %p2544_p2 = pnand %p2542_p0, %p2539_p13 }
  0x70   : > { %2547 = shalt.err (!%p2544_p2)
}
  0x71   : > { %s2548_s11 = scalar_lea.vmem %s246_s16, 16384  ;;  %p2556_p10 = scmp.lt.s32.totalorder %s246_s16, %s246_s16 }
  0x72   : > { %p2549_p5 = scmp.ne.s32.totalorder %s246_s16, %s2548_s11  ;;  %p2557_p4 = scmp.lt.s32.totalorder %s2548_s11, %s2548_s11 }
  0x74   : > { %p2551_p7 = pnand %p2549_p5, %p2780_p8  ;;  %p2558_p11 = por %p2557_p4, %p2556_p10 }
  0x76   : > { %p2552_p9 = pneg %p2551_p7 }
  0x78   : > { %p2559_p12 = pnand %p2558_p11, %p2552_p9 }
  0x7a   : > { %2562 = shalt.err (!%p2559_p12)
}
  0x7b   : > { %2353 = dma.hbm_to_vmem [thread:$0]  (!%p2764_p6), %s3121_s5, 16384, %s246_s16, [#allocation12], %s2677_s8, %s2677_s8, %s2678_s13  }
  0x7c   : > { %s1438_s17 = sadd.s32 4294967294, %s2671_s24   ;;  %s2888_s9 = sadd.s32 1, %s2671_s24  }
  0x7d   : > { %s32_s14 = sadd.s32 1, %s2667_s23  ;;  %s29_s30 = ssub.s32 %s2671_s24, %s2888_s9 }
  0x7e   : > { %p39_p8 = scmp.ne.s32.totalorder %s2667_s23, %s2663_s22  ;;  %p30_p1 = scmp.eq.s32.totalorder %s29_s30, 0 }
  0x7f   : > { %p40_p3 = scmp.eq.s32.totalorder %s2671_s24, 0  ;;  %p45_p13 = scmp.ne.s32.totalorder %s2663_s22, %s2659_s21 }
  0x80   : > { %p174_p0 = scmp.eq.s32.totalorder %s2746_s27, 1  ;;  %p3129_p5 = scmp.eq.s32.totalorder %s2746_s27, 0 }
  0x81   : > { %s2900_s15 = scalar_select %p30_p1, %s2667_s23, %s32_s14  }
  0x82   : > { %p41_p2 = por %p40_p3, %p39_p8  ;;  %p2904_p7 = por %p3129_p5, %p45_p13 }
  0x83   : > { %p2908_p6 = por %p174_p0, %p39_p8  ;;  %p180_p9 = scmp.eq.s32.totalorder %s1438_s17, 1 }
  0x84   : > { %p2367_p10 = scmp.lt.s32.totalorder %s2671_s24, 2  ;;  %s259_s13 = sand.u32 1, %s2667_s23  }
  0x85   : > { %s3131_s8 = scalar_select %p2908_p6, 1, 0 }
  0x86   : > { %p2914_p4 = por %p180_p9, %p45_p13  ;;  %s1446_s18 = sshll.u32 %s259_s13, 3 }
  0x87   : > { %s1476_s19 = sshll.u32 %s2671_s24, 7  ;;  %s263_s7 = scalar_lea.vmem [#allocation2], %s1446_s18 }
  0x88   : > { %s3132_s16 = scalar_select %p2914_p4, 1, 0 }
  0x89   : > { %s2922_s29 = scalar_lea.hbm %s3116_s0, %s1476_s19  ;;  %s270_s11 = sshll.u32 %s263_s7, 4  ;;  %s2928_s11 = int_to_ptr.vmem [resolvable:$true] %s270_s11 }
  0x8a   : > { %p2924_p11 = pnand %p2367_p10, %p41_p2  ;;  %s2930_s12 = scalar_lea.sflag [#allocation3], %s259_s13 }
  0x8b   : > { %s2563_s17 = scalar_lea.hbm %s2922_s29, 128  ;;  %s2568_s18 = scalar_lea.hbm %s3116_s0, 256 }
  0x8c   : > { %p2564_p12 = scmp.ne.s32.totalorder %s2922_s29, %s2563_s17  ;;  %p2565_p8 = pneg %p2924_p11 }
  0x8d   : > { %p2569_p13 = scmp.lt.u32.totalorder %s2922_s29, %s3116_s0  ;;  %p2570_p0 = scmp.lt.u32.totalorder %s2568_s18, %s2563_s17 }
  0x8e   : > { %p2566_p1 = pnand %p2565_p8, %p2564_p12  ;;  %p2572_p5 = scmp.lt.u32.totalorder %s2563_s17, %s2922_s29 }
  0x8f   : > { %p2571_p2 = por %p2570_p0, %p2569_p13 }
  0x90   : > { %p2567_p3 = pneg %p2566_p1 }
  0x91   : > { %p2573_p9 = por %p2572_p5, %p2571_p2 }
  0x93   : > { %p2574_p10 = pnand %p2573_p9, %p2567_p3 }
  0x95   : > { %2577 = shalt.err (!%p2574_p10)
}
  0x96   : > { %s2578_s13 = scalar_lea.vmem %s2928_s11, 128  ;;  %s2680_s25 = smov [#allocation2]  }
  0x97   : > { %p2579_p12 = scmp.ne.s32.totalorder %s2928_s11, %s2578_s13  ;;  %s2583_s7 = sshll.u32 %s2680_s25, 4  ;;  %s2584_s7 = int_to_ptr.vmem [resolvable:$false] %s2583_s7 }
  0x98   : > { %s2585_s14 = scalar_lea.vmem %s2584_s7, 256  ;;  %p2586_p6 = scmp.lt.s32.totalorder %s2928_s11, %s2584_s7 }
  0x99   : > { %p2581_p1 = pnand %p2579_p12, %p2565_p8  ;;  %p2587_p13 = scmp.lt.s32.totalorder %s2585_s14, %s2578_s13 }
  0x9b   : > { %p2582_p4 = pneg %p2581_p1  ;;  %p2588_p0 = por %p2587_p13, %p2586_p6 }
  0x9d   : > { %p2589_p2 = pnand %p2588_p0, %p2582_p4 }
  0x9f   : > { %2592 = shalt.err (!%p2589_p2)
}
  0xa0   : > { %s2681_s17 = smov 64   ;;  %s2682_s30 = smov 4  }
  0xa1   : > { %2357 = dma.hbm_to_vmem [thread:$0]  (!%p2924_p11), %s2922_s29, 128, %s2928_s11, %s2930_s12, %s2681_s17, %s2681_s17, %s2682_s30  }
  0xa2   : > { %p3134_p8 = scmp.ne.s32.totalorder %s3126_s28, 0 }
  0xa3   : > { %s2961_s18 = sand.u32 (!%p3134_p8), 1, %s2663_s22  }
  0xa4   : > { %282 = sbr.rel (%p3134_p8) target bundleno = 764 (0x2fc), region = 44  ;;  %s1450_s19 = sshll.u32 (!%p3134_p8), %s2961_s18, 3 }
  0xa5   : > { %s285_s20 = scalar_lea.sflag (!%p3134_p8), [#allocation3], %s2961_s18  ;;  %s2965_s13 = scalar_lea.vmem (!%p3134_p8), [#allocation2], %s1450_s19 }
  0xab   : > { %2638 = dma.done.wait (%p2904_p7), %s285_s20, 128  }
  0xac   : > { %2640 = vsyncadd (%p2904_p7), %s285_s20, 4294967168  ;;  %p3135_p6 = scmp.eq.s32.totalorder %s2746_s27, 0 }
  0xae   : > { %2642 = dma.done.wait (%p3135_p6), [#allocation6], 48   ;;  %p3136_p4 = pmov %p3135_p6 }
  0xb0   : > { %2644 = vsyncadd (%p3136_p4), [#allocation6], 4294967248  ;;  %p3137_p11 = pmov %p3136_p4 }
  0xb1   : > { %p3138_p3 = pmov %p3136_p4 }
  0xb2   : > { %2646 = dma.done.wait (%p3137_p11), [#allocation9], 2064  }
  0xb3   : > { %2648 = vsyncadd (%p3138_p3), [#allocation9], 4294965232  ;;  %p3139_p5 = pmov %p3138_p3 }
  0xb4   : > { %p3140_p9 = pmov %p3138_p3 }
  0xb5   : > { %2650 = dma.done.wait (%p3139_p5), [#allocation12], 16384  }
  0xb6   : > { %2652 = vsyncadd (%p3140_p9), [#allocation12], 4294950912  ;;  %v2683_v0 = vmov 0.0|0.0   ;;  %vm2684_vm0 = vmmov 0   ;;  %v2685_v1 = vmov 0.0   ;;  %v341_v2 = vld [vmem:[#allocation10] sm:$0xff]  ;;  %v370_v28 = vlaneseq }
  0xb7   : > { %2010 = vmatprep.subr.bf16.mxu0 %v2683_v0  ;;  %2034 = vmatprep.subr.bf16.mxu1 %v2683_v0  ;;  %v342_v3 = vld [vmem:[#allocation10 + $0x8] sm:$0xff]  ;;  %v343_v4 = vld [vmem:[#allocation10 + $0x10] sm:$0xff]  ;;  %v344_v6 = vld [vmem:[#allocation10 + $0x18] sm:$0xff]  ;;  %v2686_v26 = vmov 1966171168   ;;  %s1456_s28 = sshll.u32 %s2961_s18, 7 }
  0xb8   : > { %1692 = vmatprep.mubr.msk.f32.mxu0 %vm2684_vm0, %v2685_v1  ;;  %1727 = vmatprep.mubr.msk.f32.mxu1 %vm2684_vm0, %v2685_v1  ;;  %v2011_v5 = vpack.c.bf16 %v342_v3, %v341_v2  ;;  %v2014_v7 = vpack.c.bf16 %v344_v6, %v343_v4  ;;  %v345_v8 = vld [vmem:[#allocation10 + $0x20] sm:$0xff]  ;;  %v346_v9 = vld [vmem:[#allocation10 + $0x28] sm:$0xff]  ;;  %v338_v10 = vld [vmem:[#allocation5] sm:$0x3]  ;;  %v368_v27 = vunpack.c.l.s4 %v2686_v26  ;;  %v3000_v33 = vshrl.u32 %v370_v28, 7  ;;  %s3031_s26 = scalar_lea.vmem [#allocation13], %s1456_s28 }
  0xb9   : > { %v2987_v11 = vmul.f32 0.001953125, %v338_v10  ;;  %v2017_v12 = vpack.c.bf16 %v346_v9, %v345_v8  ;;  %v347_v13 = vld [vmem:[#allocation10 + $0x30] sm:$0xff]  ;;  %v348_v14 = vld [vmem:[#allocation10 + $0x38] sm:$0xff]  ;;  %v349_v18 = vld [vmem:[#allocation10 + $0x40] sm:$0xff]  ;;  %vm635_vm1 = vcmask 130048   ;;  %s1477_s29 = sshll.u32 %s2746_s27, 11 }
  0xba   : > { %2012 = vmatpush3.bf16.msra.mxu0 %v2011_v5  ;;  %2036 = vmatpush3.bf16.msra.mxu1 %v2011_v5  ;;  %v2020_v17 = vpack.c.bf16 %v348_v14, %v347_v13  ;;  %v350_v19 = vld [vmem:[#allocation10 + $0x48] sm:$0xff]  ;;  %v351_v23 = vld [vmem:[#allocation10 + $0x50] sm:$0xff]  ;;  %v352_v24 = vld [vmem:[#allocation10 + $0x58] sm:$0xff]  ;;  %v369_v32 = vunpack.c.0.s8 %v368_v27  ;;  %s1317_s11 = sshll.u32 %s3031_s26, 4  ;;  %s3062_s25 = scalar_lea.hbm %s3122_s6, %s1477_s29  ;;  %s3064_s11 = int_to_ptr.vmem [resolvable:$true] %s1317_s11 }
  0xbb   : > { %2013 = vmatprep.subr.bf16.mxu0 %v2683_v0  ;;  %2037 = vmatprep.subr.bf16.mxu1 %v2683_v0  ;;  %v358_v15 = vmul.f32 %v2987_v11, %v2987_v11  ;;  %v2023_v22 = vpack.c.bf16 %v350_v19, %v349_v18  ;;  %v2026_v29 = vpack.c.bf16 %v352_v24, %v351_v23  ;;  %v353_v30 = vld [vmem:[#allocation10 + $0x60] sm:$0xff]  ;;  %v354_v31 = vld [vmem:[#allocation10 + $0x68] sm:$0xff]  ;;  %v355_v35 = vld [vmem:[#allocation10 + $0x70] sm:$0xff]  ;;  %s1304_s27 = scalar_lea.sflag [#allocation4], %s2961_s18  ;;  %s2593_s7 = scalar_lea.vmem %s3064_s11, 2048 }
  0xbc   : > { %v2029_v34 = vpack.c.bf16 %v354_v31, %v353_v30  ;;  %v356_v36 = vld [vmem:[#allocation10 + $0x78] sm:$0xff]  ;;  %v544_v37 = vld [vmem:[#allocation11] sm:$0xff]  ;;  %v372_v38 = vsub.s32 %v369_v32, %v3000_v33  ;;  %v545_v39 = vld [vmem:[#allocation11 + $0x8] sm:$0xff]  ;;  %p2594_p7 = scmp.ne.s32.totalorder %s3064_s11, %s2593_s7  ;;  %p3141_p10 = scmp.ne.s32.totalorder %s3131_s8, 0 }
  0xbd   : > { %v360_v16 = vrot.slane %v358_v15, 7  ;;  %v639_v40 = vld [vmem:[#allocation11 + $0x80] sm:$0xff]  ;;  %v640_v41 = vld [vmem:[#allocation11 + $0x88] sm:$0xff]  ;;  %v2032_v42 = vpack.c.bf16 %v356_v36, %v355_v35  ;;  %v2058_v44 = vpack.c.bf16 %v545_v39, %v544_v37  ;;  %v339_v48 = vld [vmem:[#allocation7] sm:$0x1]  ;;  %s2687_s14 = smov [#allocation13]  }
  0xbe   : > { %2015 = vmatpush3.bf16.msra.mxu0 %v2014_v7  ;;  %2039 = vmatpush3.bf16.msra.mxu1 %v2014_v7  ;;  %v2090_v45 = vpack.c.bf16 %v640_v41, %v639_v40  ;;  %v546_v49 = vld [vmem:[#allocation11 + $0x10] sm:$0xff]  ;;  %v547_v50 = vld [vmem:[#allocation11 + $0x18] sm:$0xff]  ;;  %v548_v57 = vld [vmem:[#allocation11 + $0x20] sm:$0xff]  ;;  %v532_v40 = vsub.s32 0, %v3000_v33  ;;  %p2595_p12 = pnand %p2594_p7, %p3141_p10  ;;  %s2597_s17 = sshll.u32 %s2687_s14, 4  ;;  %s2598_s17 = int_to_ptr.vmem [resolvable:$false] %s2597_s17 }
  0xbf   : > { %2016 = vmatprep.subr.bf16.mxu0 %v2683_v0  ;;  %2040 = vmatprep.subr.bf16.mxu1 %v2683_v0  ;;  %v362_v20 = vsub.f32 %v2987_v11, %v360_v16  ;;  %v340_v53 = vld [vmem:[#allocation8] sm:$0x1]  ;;  %v2062_v54 = vpack.c.bf16 %v547_v50, %v546_v49  ;;  %v641_v55 = vld [vmem:[#allocation11 + $0x90] sm:$0xff]  ;;  %v549_v58 = vld [vmem:[#allocation11 + $0x28] sm:$0xff]  ;;  %s2599_s30 = scalar_lea.vmem %s2598_s17, 4096  ;;  %p2600_p13 = scmp.lt.s32.totalorder %s3064_s11, %s2598_s17 }
  0xc0   : > { %v642_v56 = vld [vmem:[#allocation11 + $0x98] sm:$0xff]  ;;  %v2066_v62 = vpack.c.bf16 %v549_v58, %v548_v57  ;;  %v643_v63 = vld [vmem:[#allocation11 + $0xa0] sm:$0xff]  ;;  %v550_v1 = vld [vmem:[#allocation11 + $0x30] sm:$0xff]  ;;  %p2596_p1 = pneg %p2595_p12  ;;  %p2601_p0 = scmp.lt.s32.totalorder %s2599_s30, %s2593_s7 }
  0xc1   : > { %v363_v21 = vmax.f32 %v362_v20, 0.0  ;;  %v2094_v61 = vpack.c.bf16 %v642_v56, %v641_v55  ;;  %v551_v2 = vld [vmem:[#allocation11 + $0x38] sm:$0xff]  ;;  %v645_v5 = vld [vmem:[#allocation11 + $0xb0] sm:$0xff]  ;;  %v552_v7 = vld [vmem:[#allocation11 + $0x40] sm:$0xff] }
  0xc2   : > { %2018 = vmatpush3.bf16.msra.mxu0 %v2017_v12  ;;  %2042 = vmatpush3.bf16.msra.mxu1 %v2017_v12  ;;  %v2070_v4 = vpack.c.bf16 %v551_v2, %v550_v1  ;;  %v646_v6 = vld [vmem:[#allocation11 + $0xb8] sm:$0xff]  ;;  %v553_v8 = vld [vmem:[#allocation11 + $0x48] sm:$0xff]  ;;  %v554_v13 = vld [vmem:[#allocation11 + $0x50] sm:$0xff]  ;;  %p2602_p2 = por %p2601_p0, %p2600_p13 }
  0xc3   : > { %2019 = vmatprep.subr.bf16.mxu0 %v2683_v0  ;;  %2043 = vmatprep.subr.bf16.mxu1 %v2683_v0  ;;  %v364_v25 = vadd.f32 1e-05, %v363_v21  ;;  %v2102_v9 = vpack.c.bf16 %v646_v6, %v645_v5  ;;  %v2074_v10 = vpack.c.bf16 %v553_v8, %v552_v7  ;;  %v648_v12 = vld [vmem:[#allocation11 + $0xc8] sm:$0xff]  ;;  %v555_v14 = vld [vmem:[#allocation11 + $0x58] sm:$0xff]  ;;  %v556_v20 = vld [vmem:[#allocation11 + $0x60] sm:$0xff] }
  0xc4   : > { %v2078_v16 = vpack.c.bf16 %v555_v14, %v554_v13  ;;  %v650_v18 = vld [vmem:[#allocation11 + $0xd8] sm:$0xff]  ;;  %v557_v21 = vld [vmem:[#allocation11 + $0x68] sm:$0xff]  ;;  %v651_v23 = vld [vmem:[#allocation11 + $0xe0] sm:$0xff]  ;;  %p2603_p8 = pnand %p2602_p2, %p2596_p1 }
  0xc5   : > { %2421 = vrsqrt.f32 %v364_v25  ;;  %v652_v24 = vld [vmem:[#allocation11 + $0xe8] sm:$0xff]  ;;  %v558_v26 = vld [vmem:[#allocation11 + $0x70] sm:$0xff]  ;;  %v559_v27 = vld [vmem:[#allocation11 + $0x78] sm:$0xff] }
  0xc6   : > { %2021 = vmatpush3.bf16.msra.mxu0 %v2020_v17  ;;  %2045 = vmatpush3.bf16.msra.mxu1 %v2020_v17  ;;  %v649_v17 = vld [vmem:[#allocation11 + $0xd0] sm:$0xff]  ;;  %v2114_v25 = vpack.c.bf16 %v652_v24, %v651_v23  ;;  %v654_v30 = vld [vmem:[#allocation11 + $0xf8] sm:$0xff]  ;;  %v734_v32 = vld [vmem:[#allocation11 + $0x100] sm:$0xff] }
  0xc7   : > { %2022 = vmatprep.subr.bf16.mxu0 %v2683_v0  ;;  %2046 = vmatprep.subr.bf16.mxu1 %v2683_v0  ;;  %v2110_v19 = vpack.c.bf16 %v650_v18, %v649_v17  ;;  %v653_v28 = vld [vmem:[#allocation11 + $0xf0] sm:$0xff]  ;;  %v829_v35 = vld [vmem:[#allocation11 + $0x180] sm:$0xff]  ;;  %v830_v37 = vld [vmem:[#allocation11 + $0x188] sm:$0xff] }
  0xc8   : > { %v2118_v31 = vpack.c.bf16 %v654_v30, %v653_v28  ;;  %v1479_v39 = vld [vmem:[%s2965_s13] sm:$0xff]   ;;  %v738_v33 = vld [vmem:[#allocation11 + $0x120] sm:$0xff] }
  0xc9   : > { %v1480_v41 = vunpack.c.l.bf16 %v1479_v39  ;;  %v831_v55 = vld [vmem:[#allocation11 + $0x190] sm:$0xff]  ;;  %v832_v56 = vld [vmem:[#allocation11 + $0x198] sm:$0xff]  ;;  %v742_v8 = vld [vmem:[#allocation11 + $0x140] sm:$0xff] }
  0xca   : > { %2024 = vmatpush3.bf16.msra.mxu0 %v2023_v22  ;;  %2048 = vmatpush3.bf16.msra.mxu1 %v2023_v22  ;;  %v2082_v22 = vpack.c.bf16 %v557_v21, %v556_v20  ;;  %v740_v2 = vld [vmem:[#allocation11 + $0x130] sm:$0xff]  ;;  %v836_v5 = vld [vmem:[#allocation11 + $0x1b8] sm:$0xff]  ;;  %v746_v20 = vld [vmem:[#allocation11 + $0x160] sm:$0xff] }
  0xcb   : > { %2025 = vmatprep.subr.bf16.mxu0 %v2683_v0  ;;  %2049 = vmatprep.subr.bf16.mxu1 %v2683_v0  ;;  %v744_v14 = vld [vmem:[#allocation11 + $0x150] sm:$0xff]  ;;  %v840_v17 = vld [vmem:[#allocation11 + $0x1d8] sm:$0xff]  ;;  %v747_v21 = vld [vmem:[#allocation11 + $0x168] sm:$0xff] }
  0xcc   : > { %v842_v23 = vld [vmem:[#allocation11 + $0x1e8] sm:$0xff]  ;;  %v2146_v24 = vpack.c.bf16 %v747_v21, %v746_v20  ;;  %v843_v28 = vld [vmem:[#allocation11 + $0x1f0] sm:$0xff]  ;;  %v1209_v20 = vld [vmem:[#allocation11 + $0x380] sm:$0xff] }
  0xcd   : > { %v1210_v21 = vld [vmem:[#allocation11 + $0x388] sm:$0xff] }
  0xce   : > { %2027 = vmatpush3.bf16.msra.mxu0 %v2026_v29  ;;  %2051 = vmatpush3.bf16.msra.mxu1 %v2026_v29  ;;  %v2086_v29 = vpack.c.bf16 %v559_v27, %v558_v26  ;;  %v748_v26 = vld [vmem:[#allocation11 + $0x170] sm:$0xff]  ;;  %v749_v27 = vld [vmem:[#allocation11 + $0x178] sm:$0xff] }
  0xcf   : > { %2028 = vmatprep.subr.bf16.mxu0 %v2683_v0  ;;  %2052 = vmatprep.subr.bf16.mxu1 %v2683_v0  ;;  %v2422_v43 = vpop.eup %2421  ;;  %v2150_v30 = vpack.c.bf16 %v749_v27, %v748_v26  ;;  %v1211_v26 = vld [vmem:[#allocation11 + $0x390] sm:$0xff]  ;;  %v1212_v27 = vld [vmem:[#allocation11 + $0x398] sm:$0xff] }
  0xd0   : > { %v373_v46 = vrot.slane %v2422_v43, %v372_v38 }
  0xd2   : > { %2030 = vmatpush3.bf16.msra.mxu0 %v2029_v34  ;;  %2054 = vmatpush3.bf16.msra.mxu1 %v2029_v34  ;;  %v374_v47 = vcombine.high %v373_v46, %v373_v46  ;;  %v735_v34 = vld [vmem:[#allocation11 + $0x108] sm:$0xff] }
  0xd3   : > { %2031 = vmatprep.subr.bf16.mxu0 %v2683_v0  ;;  %2055 = vmatprep.subr.bf16.mxu1 %v2683_v0  ;;  %v644_v0 = vld [vmem:[#allocation11 + $0xa8] sm:$0xff]  ;;  %v2122_v36 = vpack.c.bf16 %v735_v34, %v734_v32  ;;  %v924_v32 = vld [vmem:[#allocation11 + $0x200] sm:$0xff] }
  0xd4   : > { %v381_v51 = vrot.slane %v374_v47, %v372_v38  ;;  %v2098_v3 = vpack.c.bf16 %v644_v0, %v643_v63  ;;  %v2154_v38 = vpack.c.bf16 %v830_v37, %v829_v35  ;;  %v834_v63 = vld [vmem:[#allocation11 + $0x1a8] sm:$0xff]  ;;  %v1019_v35 = vld [vmem:[#allocation11 + $0x280] sm:$0xff] }
  0xd5   : > { %v925_v34 = vld [vmem:[#allocation11 + $0x208] sm:$0xff] }
  0xd6   : > { %2033 = vmatpush3.bf16.msra.mxu0 %v2032_v42  ;;  %2057 = vmatpush3.bf16.msra.mxu1 %v2032_v42  ;;  %v383_v52 = vmul.f32 %v381_v51, %v339_v48  ;;  %v1481_v42 = vunpack.c.h.bf16 %v1479_v39  ;;  %v2186_v37 = vpack.c.bf16 %v925_v34, %v924_v32  ;;  %v926_v39 = vld [vmem:[#allocation11 + $0x210] sm:$0xff]  ;;  %v1213_v32 = vld [vmem:[#allocation11 + $0x3a0] sm:$0xff]  ;;  %v1214_v34 = vld [vmem:[#allocation11 + $0x3a8] sm:$0xff] }
  0xd7   : > { %2059 = vmatprep.subr.bf16.mxu0 %v2058_v44  ;;  %2091 = vmatprep.subr.bf16.mxu1 %v2090_v45 }
  0xd8   : > { %v384_v59 = vmul.f32 %v383_v52, %v2987_v11  ;;  %v647_v11 = vld [vmem:[#allocation11 + $0xc0] sm:$0xff] }
  0xd9   : > { %1693 = vmatmul.mubr.f32.vlgmr.msra.gmra.mrb[0].mxu0 %v383_v52  ;;  %v2106_v15 = vpack.c.bf16 %v648_v12, %v647_v11  ;;  %v838_v11 = vld [vmem:[#allocation11 + $0x1c8] sm:$0xff] }
  0xda   : > { %2061 = vmatpush3.bf16.msra.mxu0 %v2058_v44  ;;  %v385_v60 = vsub.f32 %v340_v53, %v384_v59  ;;  %v736_v53 = vld [vmem:[#allocation11 + $0x110] sm:$0xff] }
  0xdb   : > { %2063 = vmatprep.subr.bf16.mxu0 %v2062_v54 }
  0xdc   : > { %1728 = vmatmul.mubr.f32.vlgmr.msra.gmra.mrb[0].mxu1 %v385_v60  ;;  %v2158_v60 = vpack.c.bf16 %v832_v56, %v831_v55 }
  0xdd   : > { %2093 = vmatpush3.bf16.msra.mxu1 %v2090_v45 }
  0xde   : > { %2065 = vmatpush3.bf16.msra.mxu0 %v2062_v54  ;;  %2095 = vmatprep.subr.bf16.mxu1 %v2094_v61  ;;  %v737_v54 = vld [vmem:[#allocation11 + $0x118] sm:$0xff] }
  0xdf   : > { %2067 = vmatprep.subr.bf16.mxu0 %v2066_v62  ;;  %v2126_v59 = vpack.c.bf16 %v737_v54, %v736_v53  ;;  %v1025_v53 = vld [vmem:[#allocation11 + $0x2b0] sm:$0xff]  ;;  %v1026_v54 = vld [vmem:[#allocation11 + $0x2b8] sm:$0xff] }
  0xe0   : > { %v2230_v56 = vpack.c.bf16 %v1026_v54, %v1025_v53  ;;  %v1126_v54 = vld [vmem:[#allocation11 + $0x360] sm:$0xff] }
  0xe1   : > { %2097 = vmatpush3.bf16.msra.mxu1 %v2094_v61  ;;  %v739_v61 = vld [vmem:[#allocation11 + $0x128] sm:$0xff] }
  0xe2   : > { %2069 = vmatpush3.bf16.msra.mxu0 %v2066_v62  ;;  %2099 = vmatprep.subr.bf16.mxu1 %v2098_v3  ;;  %v833_v62 = vld [vmem:[#allocation11 + $0x1a0] sm:$0xff]  ;;  %v2130_v0 = vpack.c.bf16 %v739_v61, %v738_v33  ;;  %v1028_v61 = vld [vmem:[#allocation11 + $0x2c8] sm:$0xff] }
  0xe3   : > { %2071 = vmatprep.subr.bf16.mxu0 %v2070_v4  ;;  %v2162_v1 = vpack.c.bf16 %v834_v63, %v833_v62  ;;  %v932_v33 = vld [vmem:[#allocation11 + $0x240] sm:$0xff] }
  0xe5   : > { %2101 = vmatpush3.bf16.msra.mxu1 %v2098_v3  ;;  %v741_v3 = vld [vmem:[#allocation11 + $0x138] sm:$0xff] }
  0xe6   : > { %2073 = vmatpush3.bf16.msra.mxu0 %v2070_v4  ;;  %2103 = vmatprep.subr.bf16.mxu1 %v2102_v9  ;;  %v835_v4 = vld [vmem:[#allocation11 + $0x1b0] sm:$0xff]  ;;  %v2134_v6 = vpack.c.bf16 %v741_v3, %v740_v2  ;;  %v1030_v3 = vld [vmem:[#allocation11 + $0x2d8] sm:$0xff] }
  0xe7   : > { %2075 = vmatprep.subr.bf16.mxu0 %v2074_v10  ;;  %v2166_v7 = vpack.c.bf16 %v836_v5, %v835_v4  ;;  %v1029_v2 = vld [vmem:[#allocation11 + $0x2d0] sm:$0xff] }
  0xe8   : > { %v2238_v5 = vpack.c.bf16 %v1030_v3, %v1029_v2 }
  0xe9   : > { %2105 = vmatpush3.bf16.msra.mxu1 %v2102_v9  ;;  %v743_v9 = vld [vmem:[#allocation11 + $0x148] sm:$0xff] }
  0xea   : > { %2077 = vmatpush3.bf16.msra.mxu0 %v2074_v10  ;;  %2107 = vmatprep.subr.bf16.mxu1 %v2106_v15  ;;  %v837_v10 = vld [vmem:[#allocation11 + $0x1c0] sm:$0xff]  ;;  %v2138_v12 = vpack.c.bf16 %v743_v9, %v742_v8  ;;  %v1032_v9 = vld [vmem:[#allocation11 + $0x2e8] sm:$0xff] }
  0xeb   : > { %2079 = vmatprep.subr.bf16.mxu0 %v2078_v16  ;;  %v2170_v13 = vpack.c.bf16 %v838_v11, %v837_v10  ;;  %v1031_v8 = vld [vmem:[#allocation11 + $0x2e0] sm:$0xff] }
  0xec   : > { %v2242_v11 = vpack.c.bf16 %v1032_v9, %v1031_v8 }
  0xed   : > { %2109 = vmatpush3.bf16.msra.mxu1 %v2106_v15  ;;  %v745_v15 = vld [vmem:[#allocation11 + $0x158] sm:$0xff] }
  0xee   : > { %2081 = vmatpush3.bf16.msra.mxu0 %v2078_v16  ;;  %2111 = vmatprep.subr.bf16.mxu1 %v2110_v19  ;;  %v839_v16 = vld [vmem:[#allocation11 + $0x1d0] sm:$0xff]  ;;  %v2142_v18 = vpack.c.bf16 %v745_v15, %v744_v14  ;;  %v1034_v15 = vld [vmem:[#allocation11 + $0x2f8] sm:$0xff] }
  0xef   : > { %2083 = vmatprep.subr.bf16.mxu0 %v2082_v22  ;;  %v1033_v14 = vld [vmem:[#allocation11 + $0x2f0] sm:$0xff] }
  0xf1   : > { %2113 = vmatpush3.bf16.msra.mxu1 %v2110_v19  ;;  %v2174_v19 = vpack.c.bf16 %v840_v17, %v839_v16  ;;  %v2246_v17 = vpack.c.bf16 %v1034_v15, %v1033_v14 }
  0xf2   : > { %2115 = vmatprep.subr.bf16.mxu1 %v2114_v25  ;;  %2085 = vmatpush3.bf16.msra.mxu0 %v2082_v22  ;;  %v841_v22 = vld [vmem:[#allocation11 + $0x1e0] sm:$0xff] }
  0xf3   : > { %2087 = vmatprep.subr.bf16.mxu0 %v2086_v29 }
  0xf5   : > { %2117 = vmatpush3.bf16.msra.mxu1 %v2114_v25  ;;  %v2178_v25 = vpack.c.bf16 %v842_v23, %v841_v22  ;;  %v2282_v23 = vpack.c.bf16 %v1210_v21, %v1209_v20 }
  0xf6   : > { %2119 = vmatprep.subr.bf16.mxu1 %v2118_v31  ;;  %2089 = vmatpush3.bf16.msra.mxu0 %v2086_v29  ;;  %v844_v29 = vld [vmem:[#allocation11 + $0x1f8] sm:$0xff] }
  0xf7   : > { %2123 = vmatprep.subr.bf16.mxu0 %v2122_v36 }
  0xf9   : > { %2121 = vmatpush3.bf16.msra.mxu1 %v2118_v31  ;;  %v2182_v31 = vpack.c.bf16 %v844_v29, %v843_v28  ;;  %v1118_v29 = vld [vmem:[#allocation11 + $0x320] sm:$0xff] }
  0xfa   : > { %2155 = vmatprep.subr.bf16.mxu1 %v2154_v38 }
 0x1ac   : > { %v452_v43 = vpop.f32.mrb[0].mxu0 }
 0x1ad   : > { %v533_v44 = vrot.slane %v452_v43, %v532_v40  ;;  %v1694_v45 = vpop.f32.mrb[1].mxu0 }
 0x1ae   : > { %v928_v45 = vld [vmem:[#allocation11 + $0x220] sm:$0xff] }
 0x1af   : > { %v534_v46 = vmul.f32 %v1480_v41, %v533_v44  ;;  %v535_v47 = vmul.f32 %v1481_v42, %v533_v44  ;;  %v522_v48 = vpop.f32.mrb[0].mxu1  ;;  %v1021_v41 = vld [vmem:[#allocation11 + $0x290] sm:$0xff]  ;;  %v1022_v42 = vld [vmem:[#allocation11 + $0x298] sm:$0xff] }
 0x1b0   : > { %v539_v49 = vrot.slane %v522_v48, %v532_v40  ;;  %v1729_v50 = vpop.f32.mrb[1].mxu1  ;;  %v927_v40 = vld [vmem:[#allocation11 + $0x218] sm:$0xff]  ;;  %v2222_v44 = vpack.c.bf16 %v1022_v42, %v1021_v41  ;;  %v1024_v48 = vld [vmem:[#allocation11 + $0x2a8] sm:$0xff] }
 0x1b1   : > { %v2190_v43 = vpack.c.bf16 %v927_v40, %v926_v39  ;;  %v1215_v39 = vld [vmem:[#allocation11 + $0x3b0] sm:$0xff]  ;;  %v1216_v40 = vld [vmem:[#allocation11 + $0x3b8] sm:$0xff] }
 0x1b2   : > { %v540_v51 = vadd.f32 %v539_v49, %v534_v46  ;;  %v541_v52 = vadd.f32 %v539_v49, %v535_v47  ;;  %v929_v46 = vld [vmem:[#allocation11 + $0x228] sm:$0xff]  ;;  %v1023_v47 = vld [vmem:[#allocation11 + $0x2a0] sm:$0xff]  ;;  %v2294_v42 = vpack.c.bf16 %v1216_v40, %v1215_v39 }
 0x1b3   : > { %v2194_v49 = vpack.c.bf16 %v929_v46, %v928_v45  ;;  %v2226_v50 = vpack.c.bf16 %v1024_v48, %v1023_v47  ;;  %v1217_v45 = vld [vmem:[#allocation11 + $0x3c0] sm:$0xff]  ;;  %v1218_v46 = vld [vmem:[#allocation11 + $0x3c8] sm:$0xff]  ;;  %v1124_v48 = vld [vmem:[#allocation11 + $0x350] sm:$0xff] }
 0x1b4   : > { %v3010_v57 = vmax.f32 %v540_v51, 0.0  ;;  %v3012_v58 = vmax.f32 %v541_v52, 0.0  ;;  %v930_v51 = vld [vmem:[#allocation11 + $0x230] sm:$0xff]  ;;  %v931_v52 = vld [vmem:[#allocation11 + $0x238] sm:$0xff]  ;;  %v2298_v47 = vpack.c.bf16 %v1218_v46, %v1217_v45 }
 0x1b5   : > { %v2198_v55 = vpack.c.bf16 %v931_v52, %v930_v51  ;;  %v1220_v51 = vld [vmem:[#allocation11 + $0x3d8] sm:$0xff] }
 0x1b6   : > { %1762 = vmatprep.mubr.f32.mxu0 %v3010_v57  ;;  %1797 = vmatprep.mubr.f32.mxu1 %v3010_v57 }
 0x1b7   : > { %1763 = vmatmul.mubr.f32.vlgmr.msra.gmra.mrb[2].mxu0 %v3012_v58  ;;  %1798 = vmatmul.mubr.f32.vlgmr.msra.gmra.mrb[2].mxu1 %v3012_v58 }
 0x1b8   : > { %2125 = vmatpush3.bf16.msra.mxu0 %v2122_v36  ;;  %2157 = vmatpush3.bf16.msra.mxu1 %v2154_v38  ;;  %v1020_v36 = vld [vmem:[#allocation11 + $0x288] sm:$0xff] }
 0x1b9   : > { %1832 = vmatprep.mubr.f32.mxu0 %v3010_v57  ;;  %1867 = vmatprep.mubr.f32.mxu1 %v3010_v57  ;;  %v2218_v38 = vpack.c.bf16 %v1020_v36, %v1019_v35  ;;  %v2290_v36 = vpack.c.bf16 %v1214_v34, %v1213_v32 }
 0x1ba   : > { %2127 = vmatprep.subr.bf16.mxu0 %v2126_v59  ;;  %2159 = vmatprep.subr.bf16.mxu1 %v2158_v60 }
 0x1bc   : > { %2129 = vmatpush3.bf16.msra.mxu0 %v2126_v59  ;;  %2161 = vmatpush3.bf16.msra.mxu1 %v2158_v60  ;;  %v933_v59 = vld [vmem:[#allocation11 + $0x248] sm:$0xff]  ;;  %v1027_v60 = vld [vmem:[#allocation11 + $0x2c0] sm:$0xff] }
 0x1bd   : > { %2131 = vmatprep.subr.bf16.mxu0 %v2130_v0  ;;  %2163 = vmatprep.subr.bf16.mxu1 %v2162_v1  ;;  %v2202_v62 = vpack.c.bf16 %v933_v59, %v932_v33  ;;  %v2234_v63 = vpack.c.bf16 %v1028_v61, %v1027_v60  ;;  %v1222_v33 = vld [vmem:[#allocation11 + $0x3e8] sm:$0xff]  ;;  %v1128_v61 = vld [vmem:[#allocation11 + $0x370] sm:$0xff] }
 0x1c0   : > { %2133 = vmatpush3.bf16.msra.mxu0 %v2130_v0  ;;  %2165 = vmatpush3.bf16.msra.mxu1 %v2162_v1  ;;  %v934_v0 = vld [vmem:[#allocation11 + $0x250] sm:$0xff]  ;;  %v935_v1 = vld [vmem:[#allocation11 + $0x258] sm:$0xff] }
 0x1c1   : > { %2135 = vmatprep.subr.bf16.mxu0 %v2134_v6  ;;  %2167 = vmatprep.subr.bf16.mxu1 %v2166_v7  ;;  %v2206_v4 = vpack.c.bf16 %v935_v1, %v934_v0  ;;  %v1224_v0 = vld [vmem:[#allocation11 + $0x3f8] sm:$0xff] }
 0x1c4   : > { %2137 = vmatpush3.bf16.msra.mxu0 %v2134_v6  ;;  %2169 = vmatpush3.bf16.msra.mxu1 %v2166_v7  ;;  %v936_v6 = vld [vmem:[#allocation11 + $0x260] sm:$0xff]  ;;  %v937_v7 = vld [vmem:[#allocation11 + $0x268] sm:$0xff] }
 0x1c5   : > { %2139 = vmatprep.subr.bf16.mxu0 %v2138_v12  ;;  %2171 = vmatprep.subr.bf16.mxu1 %v2170_v13  ;;  %v2210_v10 = vpack.c.bf16 %v937_v7, %v936_v6 }
 0x1c8   : > { %2141 = vmatpush3.bf16.msra.mxu0 %v2138_v12  ;;  %2173 = vmatpush3.bf16.msra.mxu1 %v2170_v13  ;;  %v938_v12 = vld [vmem:[#allocation11 + $0x270] sm:$0xff]  ;;  %v939_v13 = vld [vmem:[#allocation11 + $0x278] sm:$0xff] }
 0x1c9   : > { %2143 = vmatprep.subr.bf16.mxu0 %v2142_v18  ;;  %2175 = vmatprep.subr.bf16.mxu1 %v2174_v19  ;;  %v2214_v16 = vpack.c.bf16 %v939_v13, %v938_v12 }
 0x1cc   : > { %2145 = vmatpush3.bf16.msra.mxu0 %v2142_v18  ;;  %2177 = vmatpush3.bf16.msra.mxu1 %v2174_v19  ;;  %v1114_v18 = vld [vmem:[#allocation11 + $0x300] sm:$0xff]  ;;  %v1115_v19 = vld [vmem:[#allocation11 + $0x308] sm:$0xff] }
 0x1cd   : > { %2147 = vmatprep.subr.bf16.mxu0 %v2146_v24  ;;  %2179 = vmatprep.subr.bf16.mxu1 %v2178_v25  ;;  %v2250_v22 = vpack.c.bf16 %v1115_v19, %v1114_v18 }
 0x1d0   : > { %2149 = vmatpush3.bf16.msra.mxu0 %v2146_v24  ;;  %2181 = vmatpush3.bf16.msra.mxu1 %v2178_v25  ;;  %v1116_v24 = vld [vmem:[#allocation11 + $0x310] sm:$0xff]  ;;  %v1117_v25 = vld [vmem:[#allocation11 + $0x318] sm:$0xff] }
 0x1d1   : > { %2151 = vmatprep.subr.bf16.mxu0 %v2150_v30  ;;  %2183 = vmatprep.subr.bf16.mxu1 %v2182_v31  ;;  %v2254_v28 = vpack.c.bf16 %v1117_v25, %v1116_v24 }
 0x1d4   : > { %2153 = vmatpush3.bf16.msra.mxu0 %v2150_v30  ;;  %2185 = vmatpush3.bf16.msra.mxu1 %v2182_v31  ;;  %v1119_v30 = vld [vmem:[#allocation11 + $0x328] sm:$0xff]  ;;  %v2286_v31 = vpack.c.bf16 %v1212_v27, %v1211_v26 }
 0x1d5   : > { %2187 = vmatprep.subr.bf16.mxu0 %v2186_v37  ;;  %2219 = vmatprep.subr.bf16.mxu1 %v2218_v38  ;;  %v2258_v35 = vpack.c.bf16 %v1119_v30, %v1118_v29 }
 0x1d7   : > { %1833 = vmatmul.mubr.f32.vlgmr.msra.gmra.mrb[4].mxu0 %v3012_v58  ;;  %1868 = vmatmul.mubr.f32.vlgmr.msra.gmra.mrb[4].mxu1 %v3012_v58 }
 0x1d8   : > { %2189 = vmatpush3.bf16.msra.mxu0 %v2186_v37  ;;  %1902 = vmatprep.mubr.f32.mxu0 %v3010_v57  ;;  %v1120_v37 = vld [vmem:[#allocation11 + $0x330] sm:$0xff] }
 0x1d9   : > { %2221 = vmatpush3.bf16.msra.mxu1 %v2218_v38  ;;  %1937 = vmatprep.mubr.f32.mxu1 %v3010_v57  ;;  %v1121_v38 = vld [vmem:[#allocation11 + $0x338] sm:$0xff] }
 0x1da   : > { %2191 = vmatprep.subr.bf16.mxu0 %v2190_v43  ;;  %2223 = vmatprep.subr.bf16.mxu1 %v2222_v44  ;;  %v2262_v41 = vpack.c.bf16 %v1121_v38, %v1120_v37 }
 0x1dc   : > { %2193 = vmatpush3.bf16.msra.mxu0 %v2190_v43  ;;  %v1122_v43 = vld [vmem:[#allocation11 + $0x340] sm:$0xff] }
 0x1dd   : > { %2225 = vmatpush3.bf16.msra.mxu1 %v2222_v44  ;;  %2195 = vmatprep.subr.bf16.mxu0 %v2194_v49  ;;  %v1123_v44 = vld [vmem:[#allocation11 + $0x348] sm:$0xff] }
 0x1de   : > { %2227 = vmatprep.subr.bf16.mxu1 %v2226_v50 }
 0x1e0   : > { %2197 = vmatpush3.bf16.msra.mxu0 %v2194_v49  ;;  %v1125_v49 = vld [vmem:[#allocation11 + $0x358] sm:$0xff] }
 0x1e1   : > { %2229 = vmatpush3.bf16.msra.mxu1 %v2226_v50  ;;  %2199 = vmatprep.subr.bf16.mxu0 %v2198_v55  ;;  %v1219_v50 = vld [vmem:[#allocation11 + $0x3d0] sm:$0xff]  ;;  %v2270_v52 = vpack.c.bf16 %v1125_v49, %v1124_v48 }
 0x1e2   : > { %2231 = vmatprep.subr.bf16.mxu1 %v2230_v56  ;;  %v2302_v53 = vpack.c.bf16 %v1220_v51, %v1219_v50 }
 0x1e4   : > { %2201 = vmatpush3.bf16.msra.mxu0 %v2198_v55  ;;  %v1127_v55 = vld [vmem:[#allocation11 + $0x368] sm:$0xff] }
 0x1e5   : > { %2233 = vmatpush3.bf16.msra.mxu1 %v2230_v56  ;;  %2203 = vmatprep.subr.bf16.mxu0 %v2202_v62  ;;  %v1221_v56 = vld [vmem:[#allocation11 + $0x3e0] sm:$0xff]  ;;  %v2274_v59 = vpack.c.bf16 %v1127_v55, %v1126_v54 }
 0x1e6   : > { %2235 = vmatprep.subr.bf16.mxu1 %v2234_v63  ;;  %v2306_v60 = vpack.c.bf16 %v1222_v33, %v1221_v56 }
 0x1e8   : > { %2205 = vmatpush3.bf16.msra.mxu0 %v2202_v62  ;;  %v1129_v62 = vld [vmem:[#allocation11 + $0x378] sm:$0xff] }
 0x1e9   : > { %2237 = vmatpush3.bf16.msra.mxu1 %v2234_v63  ;;  %2207 = vmatprep.subr.bf16.mxu0 %v2206_v4  ;;  %v1223_v63 = vld [vmem:[#allocation11 + $0x3f0] sm:$0xff]  ;;  %v2278_v1 = vpack.c.bf16 %v1129_v62, %v1128_v61 }
 0x1ea   : > { %2239 = vmatprep.subr.bf16.mxu1 %v2238_v5  ;;  %v2310_v2 = vpack.c.bf16 %v1224_v0, %v1223_v63 }
 0x1ec   : > { %2209 = vmatpush3.bf16.msra.mxu0 %v2206_v4 }
 0x1ed   : > { %2241 = vmatpush3.bf16.msra.mxu1 %v2238_v5  ;;  %2211 = vmatprep.subr.bf16.mxu0 %v2210_v10 }
 0x1ee   : > { %2243 = vmatprep.subr.bf16.mxu1 %v2242_v11 }
 0x1f0   : > { %2213 = vmatpush3.bf16.msra.mxu0 %v2210_v10 }
 0x1f1   : > { %2245 = vmatpush3.bf16.msra.mxu1 %v2242_v11  ;;  %2215 = vmatprep.subr.bf16.mxu0 %v2214_v16 }
 0x1f2   : > { %2247 = vmatprep.subr.bf16.mxu1 %v2246_v17 }
 0x1f4   : > { %2217 = vmatpush3.bf16.msra.mxu0 %v2214_v16 }
 0x1f5   : > { %2249 = vmatpush3.bf16.msra.mxu1 %v2246_v17  ;;  %2251 = vmatprep.subr.bf16.mxu0 %v2250_v22 }
 0x1f6   : > { %2283 = vmatprep.subr.bf16.mxu1 %v2282_v23 }
 0x1f7   : > { %1903 = vmatmul.mubr.f32.vlgmr.msra.gmra.mrb[6].mxu0 %v3012_v58 }
 0x1f8   : > { %1938 = vmatmul.mubr.f32.vlgmr.msra.gmra.mrb[6].mxu1 %v3012_v58  ;;  %2253 = vmatpush3.bf16.msra.mxu0 %v2250_v22 }
 0x1f9   : > { %1972 = vmatprep.mubr.f32.mxu0 %v3010_v57  ;;  %2285 = vmatpush3.bf16.msra.mxu1 %v2282_v23 }
 0x1fa   : > { %2007 = vmatprep.mubr.f32.mxu1 %v3010_v57  ;;  %2255 = vmatprep.subr.bf16.mxu0 %v2254_v28  ;;  %v2266_v57 = vpack.c.bf16 %v1123_v44, %v1122_v43 }
 0x1fb   : > { %2287 = vmatprep.subr.bf16.mxu1 %v2286_v31 }
 0x1fc   : > { %2257 = vmatpush3.bf16.msra.mxu0 %v2254_v28 }
 0x1fd   : > { %2289 = vmatpush3.bf16.msra.mxu1 %v2286_v31  ;;  %2259 = vmatprep.subr.bf16.mxu0 %v2258_v35 }
 0x1fe   : > { %2291 = vmatprep.subr.bf16.mxu1 %v2290_v36 }
 0x200   : > { %2261 = vmatpush3.bf16.msra.mxu0 %v2258_v35 }
 0x201   : > { %2293 = vmatpush3.bf16.msra.mxu1 %v2290_v36  ;;  %2263 = vmatprep.subr.bf16.mxu0 %v2262_v41 }
 0x202   : > { %2295 = vmatprep.subr.bf16.mxu1 %v2294_v42 }
 0x204   : > { %2265 = vmatpush3.bf16.msra.mxu0 %v2262_v41 }
 0x205   : > { %2297 = vmatpush3.bf16.msra.mxu1 %v2294_v42  ;;  %2267 = vmatprep.subr.bf16.mxu0 %v2266_v57 }
 0x206   : > { %2299 = vmatprep.subr.bf16.mxu1 %v2298_v47 }
 0x208   : > { %2269 = vmatpush3.bf16.msra.mxu0 %v2266_v57 }
 0x209   : > { %2301 = vmatpush3.bf16.msra.mxu1 %v2298_v47  ;;  %2271 = vmatprep.subr.bf16.mxu0 %v2270_v52 }
 0x20a   : > { %2303 = vmatprep.subr.bf16.mxu1 %v2302_v53 }
 0x20c   : > { %2273 = vmatpush3.bf16.msra.mxu0 %v2270_v52 }
 0x20d   : > { %2305 = vmatpush3.bf16.msra.mxu1 %v2302_v53  ;;  %2275 = vmatprep.subr.bf16.mxu0 %v2274_v59 }
 0x20e   : > { %2307 = vmatprep.subr.bf16.mxu1 %v2306_v60 }
 0x210   : > { %2277 = vmatpush3.bf16.msra.mxu0 %v2274_v59 }
 0x211   : > { %2309 = vmatpush3.bf16.msra.mxu1 %v2306_v60  ;;  %2279 = vmatprep.subr.bf16.mxu0 %v2278_v1 }
 0x212   : > { %2311 = vmatprep.subr.bf16.mxu1 %v2310_v2 }
 0x214   : > { %2281 = vmatpush3.bf16.msra.mxu0 %v2278_v1 }
 0x215   : > { %2313 = vmatpush3.bf16.msra.mxu1 %v2310_v2 }
 0x217   : > { %1973 = vmatmul.mubr.f32.vlgmr.msra.gmra.mrb[8].mxu0 %v3012_v58 }
 0x218   : > { %2008 = vmatmul.mubr.f32.vlgmr.msra.gmra.mrb[8].mxu1 %v3012_v58 }
 0x28a   : > { %v1764_v3 = vpop.f32.mrb[2].mxu0  ;;  %v1799_v4 = vpop.f32.mrb[2].mxu1 }
 0x28b   : > { %637 = vst.msk [vmem:[%s3031_s26 + $0x8] sm:$0xff] %vm635_vm1, %v1764_v3  ;;  %1458 = vst.msk [vmem:[%s3031_s26 + $0x18] sm:$0xff] %vm635_vm1, %v1799_v4  ;;  %v626_v58 = vpop.f32.mrb[3].mxu0  ;;  %v721_v5 = vpop.f32.mrb[3].mxu1 }
 0x28c   : > { %636 = vst.msk [vmem:[%s3031_s26] sm:$0xff] %vm635_vm1, %v626_v58  ;;  %1457 = vst.msk [vmem:[%s3031_s26 + $0x10] sm:$0xff] %vm635_vm1, %v721_v5 }
 0x2aa   : > { %v1834_v6 = vpop.f32.mrb[4].mxu0  ;;  %v1869_v7 = vpop.f32.mrb[4].mxu1 }
 0x2ab   : > { %1460 = vst.msk [vmem:[%s3031_s26 + $0x28] sm:$0xff] %vm635_vm1, %v1834_v6  ;;  %1462 = vst.msk [vmem:[%s3031_s26 + $0x38] sm:$0xff] %vm635_vm1, %v1869_v7  ;;  %v816_v8 = vpop.f32.mrb[5].mxu0  ;;  %v911_v9 = vpop.f32.mrb[5].mxu1 }
 0x2ac   : > { %1459 = vst.msk [vmem:[%s3031_s26 + $0x20] sm:$0xff] %vm635_vm1, %v816_v8  ;;  %1461 = vst.msk [vmem:[%s3031_s26 + $0x30] sm:$0xff] %vm635_vm1, %v911_v9 }
 0x2ca   : > { %v1904_v10 = vpop.f32.mrb[6].mxu0 }
 0x2cb   : > { %1464 = vst.msk [vmem:[%s3031_s26 + $0x48] sm:$0xff] %vm635_vm1, %v1904_v10  ;;  %v1939_v11 = vpop.f32.mrb[6].mxu1  ;;  %v1006_v12 = vpop.f32.mrb[7].mxu0 }
 0x2cc   : > { %1466 = vst.msk [vmem:[%s3031_s26 + $0x58] sm:$0xff] %vm635_vm1, %v1939_v11  ;;  %1463 = vst.msk [vmem:[%s3031_s26 + $0x40] sm:$0xff] %vm635_vm1, %v1006_v12  ;;  %v1101_v13 = vpop.f32.mrb[7].mxu1 }
 0x2cd   : > { %1465 = vst.msk [vmem:[%s3031_s26 + $0x50] sm:$0xff] %vm635_vm1, %v1101_v13 }
 0x2ea   : > { %v1974_v14 = vpop.f32.mrb[8].mxu0 }
 0x2eb   : > { %1468 = vst.msk [vmem:[%s3031_s26 + $0x68] sm:$0xff] %vm635_vm1, %v1974_v14  ;;  %v2009_v15 = vpop.f32.mrb[8].mxu1  ;;  %v1196_v16 = vpop.f32.mrb[9].mxu0 }
 0x2ec   : > { %1470 = vst.msk [vmem:[%s3031_s26 + $0x78] sm:$0xff] %vm635_vm1, %v2009_v15  ;;  %1467 = vst.msk [vmem:[%s3031_s26 + $0x60] sm:$0xff] %vm635_vm1, %v1196_v16  ;;  %v1291_v17 = vpop.f32.mrb[9].mxu1 }
 0x2ed   : > { %1469 = vst.msk [vmem:[%s3031_s26 + $0x70] sm:$0xff] %vm635_vm1, %v1291_v17 }
 0x2ee   : > { %2606 = shalt.err (!%p2603_p8)
}
 0x2ef   : > { %s2607_s19 = scalar_lea.hbm %s3062_s25, 2048  ;;  %s2611_s28 = scalar_lea.hbm %s3122_s6, 4096 }
 0x2f0   : > { %p2608_p6 = scmp.ne.s32.totalorder %s3062_s25, %s2607_s19  ;;  %p2612_p3 = scmp.lt.u32.totalorder %s3062_s25, %s3122_s6 }
 0x2f1   : > { %p2613_p5 = scmp.lt.u32.totalorder %s2611_s28, %s2607_s19  ;;  %p2615_p7 = scmp.lt.u32.totalorder %s2607_s19, %s3062_s25 }
 0x2f2   : > { %p2609_p4 = pnand %p2608_p6, %p3141_p10 }
 0x2f3   : > { %p2614_p9 = por %p2613_p5, %p2612_p3 }
 0x2f4   : > { %p2610_p11 = pneg %p2609_p4 }
 0x2f5   : > { %p2616_p12 = por %p2615_p7, %p2614_p9 }
 0x2f7   : > { %p2617_p1 = pnand %p2616_p12, %p2610_p11 }
 0x2f9   : > { %2620 = shalt.err (!%p2617_p1)
}
 0x2fa   : > { %s2688_s10 = smov 128   ;;  %s2689_s12 = smov 8  }
 0x2fb   : > { %2336 = dma.vmem_to_hbm [thread:$0]  (%p3141_p10), %s3064_s11, 2048, %s3062_s25, %s1304_s27, %s2688_s10, %s2688_s10, %s2689_s12  }
 0x2fc PF: > { %s1332_s7 = sand.u32 1, %s2659_s21   ;;  %p3142_p13 = scmp.ne.s32.totalorder %s3132_s16, 0 }
 0x2fd   : > { %p3143_p0 = scmp.ge.s32.totalorder %s2671_s24, 2  ;;  %s1333_s14 = scalar_lea.sflag [#allocation4], %s1332_s7 }
 0x2ff   : > { %p2359_p2 = pnand %p3143_p0, %p3142_p13 }
 0x301   : > { %2654 = dma.done.wait (!%p2359_p2), %s1333_s14, 2048  }
 0x302   : > { %2656 = vsyncadd (!%p2359_p2), %s1333_s14, 4294965248  ;;  %p22_p8 = scmp.ge.s32.totalorder %s2888_s9, 4   ;;  %s3144_s21 = smov %s2663_s22 }
 0x303   : > { %s3145_s22 = smov %s2667_s23  ;;  %s3146_s23 = smov %s2900_s15 }
 0x304   : > { %s3147_s24 = smov %s2888_s9  ;;  %24 = sbr.rel (!%p22_p8) target bundleno = 8 (0x8), region = 123 }
 0x30b   :  { %1338 = vsyncpa [#allocation3], 1 }
 0x30c   :  { %1340 = vsyncpa [#allocation3 + $0x1], 1 }
 0x30d   :  { %1341 = vsyncpa [#allocation6], 1 }
 0x30e   :  { %1342 = vsyncpa [#allocation9], 1 }
 0x30f   :  { %1343 = vsyncpa [#allocation12], 1 }
 0x310   :  { %1344 = vsyncpa [#allocation4], 1 }
 0x311   :  { %1346 = vsyncpa [#allocation4 + $0x1], 1 }

</bundles_post_ra>
